<compile_context>
chip_gen: v6e
topology: v6e:2x2x1
jax: 0.10.0
libtpu: 0.0.40
codegen_flags: <defaults>
</compile_context>

<pallas_src>
import jax
import jax.numpy as jnp
from jax.experimental import pallas as pl
from jax.experimental.pallas import tpu as pltpu


def _round_up(x, m):
    return (x + m - 1) // m * m


def _mlp_kernel(x_ref, w1_ref, t1_ref, w2_ref, t2_ref, w3_ref, b3_ref, o_ref):
    # fc1 + dropout(id) + bn1 (scale folded into w1, shift in t1) + relu
    h1 = jnp.dot(x_ref[...], w1_ref[...], preferred_element_type=jnp.float32)
    h1 = jnp.maximum(h1 + t1_ref[...], 0.0).astype(w2_ref.dtype)
    # fc2 + dropout(id) + bn2 (scale folded into w2, shift in t2) + relu
    h2 = jnp.dot(h1, w2_ref[...], preferred_element_type=jnp.float32)
    h2 = jnp.maximum(h2 + t2_ref[...], 0.0).astype(w3_ref.dtype)
    # fc3 (plain affine; output lanes padded to a multiple of 128)
    o_ref[...] = jnp.dot(h2, w3_ref[...], preferred_element_type=jnp.float32) + b3_ref[...]


def out_mlp_pallas(x, params, k, *, batch_tile=256):
    """x: (B, 1024) float32 -> (B, k) float32 logits.

    params (see prepare_kernel_params):
      w1 (1024,512) bf16 (bn1 scale folded),  t1 (1,512) f32
      w2 ( 512,256) bf16 (bn2 scale folded),  t2 (1,256) f32
      w3 ( 256, KP) bf16 (lane-padded),       b3 (1, KP) f32,  KP = round_up(k,128)
    """
    w1, t1, w2, t2, w3p, b3p = params
    B, D_in = x.shape
    H1 = w1.shape[1]
    H2 = w2.shape[1]
    KP = w3p.shape[1]

    # Effective tile: as large as requested, but never (much) larger than the
    # batch itself; multiples of 16 keep bf16 sublane packing happy.
    tile = _round_up(min(batch_tile, _round_up(B, 16)), 16)
    B_pad = _round_up(B, tile)

    xb = x.astype(jnp.bfloat16)
    if B_pad != B:
        xb = jnp.pad(xb, ((0, B_pad - B), (0, 0)))

    grid = (B_pad // tile,)
    const = lambda i: (0, 0)  # weights / shifts: same block every grid step

    flops = 2 * B_pad * (D_in * H1 + H1 * H2 + H2 * KP)
    bytes_accessed = (xb.size * 2
                      + (w1.size + w2.size + w3p.size) * 2
                      + (t1.size + t2.size + b3p.size) * 4
                      + B_pad * KP * 4)

    out = pl.pallas_call(
        _mlp_kernel,
        out_shape=jax.ShapeDtypeStruct((B_pad, KP), jnp.float32),
        grid_spec=pltpu.PrefetchScalarGridSpec(
            num_scalar_prefetch=0,
            grid=grid,
            in_specs=[
                pl.BlockSpec((tile, D_in), lambda i: (i, 0)),  # x tile
                pl.BlockSpec((D_in, H1), const),               # w1 (bn1 folded)
                pl.BlockSpec((1, H1), const),                  # t1
                pl.BlockSpec((H1, H2), const),                 # w2 (bn2 folded)
                pl.BlockSpec((1, H2), const),                  # t2
                pl.BlockSpec((H2, KP), const),                 # w3 (lane-padded)
                pl.BlockSpec((1, KP), const),                  # b3
            ],
            out_specs=pl.BlockSpec((tile, KP), lambda i: (i, 0)),
        ),
        compiler_params=pltpu.CompilerParams(
            dimension_semantics=("parallel",)),
        cost_estimate=pl.CostEstimate(
            flops=flops, transcendentals=0, bytes_accessed=bytes_accessed),
    )(xb, w1, t1, w2, t2, w3p, b3p)

    return out[:B, :k]


def make_raw_params(key, k=10):
    """Deterministic synthetic parameters matching out_mlp(k) (PyTorch layout)."""
    ks = jax.random.split(key, 14)

    def lin(kw, kb, fan_in, fan_out):
        w = jax.random.normal(kw, (fan_in, fan_out), jnp.float32) / jnp.sqrt(fan_in)
        b = 0.01 * jax.random.normal(kb, (fan_out,), jnp.float32)
        return w, b

    def bn(kg, kb, km, kv, n):
        gamma = 1.0 + 0.1 * jax.random.normal(kg, (n,), jnp.float32)
        beta = 0.1 * jax.random.normal(kb, (n,), jnp.float32)
        mean = 0.1 * jax.random.normal(km, (n,), jnp.float32)
        var = 1.0 + 0.1 * jnp.abs(jax.random.normal(kv, (n,), jnp.float32))
        return gamma, beta, mean, var

    w1, b1 = lin(ks[0], ks[1], 1024, 512)
    w2, b2 = lin(ks[2], ks[3], 512, 256)
    w3, b3 = lin(ks[4], ks[5], 256, k)
    g1, be1, m1, v1 = bn(ks[6], ks[7], ks[8], ks[9], 512)
    g2, be2, m2, v2 = bn(ks[10], ks[11], ks[12], ks[13], 256)
    eps = 1e-5
    return (w1, b1, w2, b2, w3, b3, g1, be1, m1, v1, g2, be2, m2, v2, eps)


def prepare_kernel_params(raw):
    """Fold eval-mode bias+BN into the weights, cast to bf16, lane-pad fc3."""
    (w1, b1, w2, b2, w3, b3, g1, be1, m1, v1, g2, be2, m2, v2, eps) = raw
    s1 = g1 / jnp.sqrt(v1 + eps)
    t1 = (b1 - m1) * s1 + be1
    s2 = g2 / jnp.sqrt(v2 + eps)
    t2 = (b2 - m2) * s2 + be2

    k = w3.shape[1]
    kp = max(128, _round_up(k, 128))
    w3p = jnp.zeros((w3.shape[0], kp), jnp.float32).at[:, :k].set(w3)
    b3p = jnp.zeros((kp,), jnp.float32).at[:k].set(b3)

    return ((w1 * s1[None, :]).astype(jnp.bfloat16),
            t1.reshape(1, -1).astype(jnp.float32),
            (w2 * s2[None, :]).astype(jnp.bfloat16),
            t2.reshape(1, -1).astype(jnp.float32),
            w3p.astype(jnp.bfloat16),
            b3p.reshape(1, -1).astype(jnp.float32))


def reference_forward_f32(x, raw):
    """Pure-JAX, full-precision eval-mode PyTorch semantics."""
    (w1, b1, w2, b2, w3, b3, g1, be1, m1, v1, g2, be2, m2, v2, eps) = raw
    h = x @ w1 + b1
    h = (h - m1) / jnp.sqrt(v1 + eps) * g1 + be1
    h = jnp.maximum(h, 0.0)
    h = h @ w2 + b2
    h = (h - m2) / jnp.sqrt(v2 + eps) * g2 + be2
    h = jnp.maximum(h, 0.0)
    return h @ w3 + b3


def reference_forward_bf16(x, params, k):
    """Pure-JAX path with the same bf16-operand / f32-accum numerics as the kernel."""
    w1, t1, w2, t2, w3p, b3p = params
    h = jnp.dot(x.astype(jnp.bfloat16), w1, preferred_element_type=jnp.float32)
    h = jnp.maximum(h + t1, 0.0).astype(jnp.bfloat16)
    h = jnp.dot(h, w2, preferred_element_type=jnp.float32)
    h = jnp.maximum(h + t2, 0.0).astype(jnp.bfloat16)
    return (jnp.dot(h, w3p, preferred_element_type=jnp.float32) + b3p)[:, :k]


if __name__ == "__main__":
    key = jax.random.PRNGKey(0)
    kx, kp = jax.random.split(key)

    # Small demo shapes: B=200 (not a tile multiple -> exercises batch padding),
    # k=10 (exercises the 128-lane output padding + slice).
    B, K = 200, 10
    x = jax.random.normal(kx, (B, 1024), jnp.float32)

    raw = make_raw_params(kp, k=K)
    params = prepare_kernel_params(raw)

    out = out_mlp_pallas(x, params, K, batch_tile=128)   # grid = 2 parallel steps
    out = jax.block_until_ready(out)
    assert out.shape == (B, K)

    # Exact-numerics check: pure-JAX path with identical bf16/f32-accum math.
    ref_q = reference_forward_bf16(x, params, K)
    err_q = float(jnp.max(jnp.abs(out - ref_q)))
    assert jnp.allclose(out, ref_q, atol=1e-2, rtol=1e-2), err_q

    # Sanity check vs the full-precision eval-mode module semantics
    # (loose tolerance: bf16 weights/activations).
    ref = reference_forward_f32(x, raw)
    err = float(jnp.max(jnp.abs(out - ref)))
    assert jnp.allclose(out, ref, atol=0.25, rtol=0.05), err

    print("KERNEL_OK")
</pallas_src>

<mosaic_0001>
module attributes {stable_mosaic.version = 11 : i64} {
  func.func @_mlp_kernel(%arg0: i32, %arg1: memref<128x1024xbf16, #tpu.memory_space<vmem>>, %arg2: memref<1024x512xbf16, #tpu.memory_space<vmem>>, %arg3: memref<1x512xf32, #tpu.memory_space<vmem>>, %arg4: memref<512x256xbf16, #tpu.memory_space<vmem>>, %arg5: memref<1x256xf32, #tpu.memory_space<vmem>>, %arg6: memref<256x128xbf16, #tpu.memory_space<vmem>>, %arg7: memref<1x128xf32, #tpu.memory_space<vmem>>, %arg8: memref<128x128xf32, #tpu.memory_space<vmem>>) attributes {dimension_semantics = [#tpu.dimension_semantics<parallel>], iteration_bounds = array<i64: 2>, scalar_prefetch = 0 : i64, scratch_operands = 0 : i64, tpu.core_type = #tpu.core_type<tc>, window_params = [{transform_indices = @transform_0, window_bounds = array<i64: 128, 1024>}, {pipeline_mode = #tpu.pipeline_mode<synchronous>, transform_indices = @transform_1, window_bounds = array<i64: 1024, 512>}, {pipeline_mode = #tpu.pipeline_mode<synchronous>, transform_indices = @transform_2, window_bounds = array<i64: 1, 512>}, {pipeline_mode = #tpu.pipeline_mode<synchronous>, transform_indices = @transform_3, window_bounds = array<i64: 512, 256>}, {pipeline_mode = #tpu.pipeline_mode<synchronous>, transform_indices = @transform_4, window_bounds = array<i64: 1, 256>}, {pipeline_mode = #tpu.pipeline_mode<synchronous>, transform_indices = @transform_5, window_bounds = array<i64: 256, 128>}, {pipeline_mode = #tpu.pipeline_mode<synchronous>, transform_indices = @transform_6, window_bounds = array<i64: 1, 128>}, {transform_indices = @transform_7, window_bounds = array<i64: 128, 128>}]} {
    %c0 = arith.constant 0 : index
    %c0_0 = arith.constant 0 : index
    %0 = vector.load %arg1[%c0, %c0_0] : memref<128x1024xbf16, #tpu.memory_space<vmem>>, vector<128x1024xbf16>
    %c0_1 = arith.constant 0 : index
    %c0_2 = arith.constant 0 : index
    %1 = vector.load %arg2[%c0_1, %c0_2] : memref<1024x512xbf16, #tpu.memory_space<vmem>>, vector<1024x512xbf16>
    %cst = arith.constant dense<0.000000e+00> : vector<128x512xf32>
    %2 = tpu.matmul %0, %1, %cst {dimension_numbers = #tpu.dot_dimension_numbers<[1], [0], [0], [1], [0, 0, 1, 1], [], []>} : vector<128x1024xbf16>, vector<1024x512xbf16>, vector<128x512xf32> -> vector<128x512xf32>
    %c0_3 = arith.constant 0 : index
    %c0_4 = arith.constant 0 : index
    %3 = vector.load %arg3[%c0_3, %c0_4] : memref<1x512xf32, #tpu.memory_space<vmem>>, vector<1x512xf32>
    %4 = vector.broadcast %3 : vector<1x512xf32> to vector<128x512xf32>
    %5 = arith.addf %2, %4 : vector<128x512xf32>
    %cst_5 = arith.constant 0.000000e+00 : f32
    %6 = vector.broadcast %cst_5 : f32 to vector<128x512xf32>
    %7 = arith.maximumf %5, %6 : vector<128x512xf32>
    %8 = arith.truncf %7 : vector<128x512xf32> to vector<128x512xbf16>
    %c0_6 = arith.constant 0 : index
    %c0_7 = arith.constant 0 : index
    %9 = vector.load %arg4[%c0_6, %c0_7] : memref<512x256xbf16, #tpu.memory_space<vmem>>, vector<512x256xbf16>
    %cst_8 = arith.constant dense<0.000000e+00> : vector<128x256xf32>
    %10 = tpu.matmul %8, %9, %cst_8 {dimension_numbers = #tpu.dot_dimension_numbers<[1], [0], [0], [1], [0, 0, 1, 1], [], []>} : vector<128x512xbf16>, vector<512x256xbf16>, vector<128x256xf32> -> vector<128x256xf32>
    %c0_9 = arith.constant 0 : index
    %c0_10 = arith.constant 0 : index
    %11 = vector.load %arg5[%c0_9, %c0_10] : memref<1x256xf32, #tpu.memory_space<vmem>>, vector<1x256xf32>
    %12 = vector.broadcast %11 : vector<1x256xf32> to vector<128x256xf32>
    %13 = arith.addf %10, %12 : vector<128x256xf32>
    %cst_11 = arith.constant 0.000000e+00 : f32
    %14 = vector.broadcast %cst_11 : f32 to vector<128x256xf32>
    %15 = arith.maximumf %13, %14 : vector<128x256xf32>
    %16 = arith.truncf %15 : vector<128x256xf32> to vector<128x256xbf16>
    %c0_12 = arith.constant 0 : index
    %c0_13 = arith.constant 0 : index
    %17 = vector.load %arg6[%c0_12, %c0_13] : memref<256x128xbf16, #tpu.memory_space<vmem>>, vector<256x128xbf16>
    %cst_14 = arith.constant dense<0.000000e+00> : vector<128x128xf32>
    %18 = tpu.matmul %16, %17, %cst_14 {dimension_numbers = #tpu.dot_dimension_numbers<[1], [0], [0], [1], [0, 0, 1, 1], [], []>} : vector<128x256xbf16>, vector<256x128xbf16>, vector<128x128xf32> -> vector<128x128xf32>
    %c0_15 = arith.constant 0 : index
    %c0_16 = arith.constant 0 : index
    %19 = vector.load %arg7[%c0_15, %c0_16] : memref<1x128xf32, #tpu.memory_space<vmem>>, vector<1x128xf32>
    %20 = vector.broadcast %19 : vector<1x128xf32> to vector<128x128xf32>
    %21 = arith.addf %18, %20 : vector<128x128xf32>
    %c0_17 = arith.constant 0 : index
    %c0_18 = arith.constant 0 : index
    %22 = vector.load %arg8[%c0_17, %c0_18] : memref<128x128xf32, #tpu.memory_space<vmem>>, vector<128x128xf32>
    tpu.vector_store %arg8[%c0_17, %c0_18], %21 {strides = array<i32>} : memref<128x128xf32, #tpu.memory_space<vmem>>, vector<128x128xf32>,
    return
  }
  func.func @transform_0(%arg0: i32) -> (i32, i32) {
    %c0_i32 = arith.constant 0 : i32
    %c0_i32_0 = arith.constant 0 : i32
    return %arg0, %c0_i32 : i32, i32
  }
  func.func @transform_1(%arg0: i32) -> (i32, i32) {
    %c0_i32 = arith.constant 0 : i32
    %c0_i32_0 = arith.constant 0 : i32
    %c0_i32_1 = arith.constant 0 : i32
    return %c0_i32, %c0_i32_0 : i32, i32
  }
  func.func @transform_2(%arg0: i32) -> (i32, i32) {
    %c0_i32 = arith.constant 0 : i32
    %c0_i32_0 = arith.constant 0 : i32
    %c0_i32_1 = arith.constant 0 : i32
    return %c0_i32, %c0_i32_0 : i32, i32
  }
  func.func @transform_3(%arg0: i32) -> (i32, i32) {
    %c0_i32 = arith.constant 0 : i32
    %c0_i32_0 = arith.constant 0 : i32
    %c0_i32_1 = arith.constant 0 : i32
    return %c0_i32, %c0_i32_0 : i32, i32
  }
  func.func @transform_4(%arg0: i32) -> (i32, i32) {
    %c0_i32 = arith.constant 0 : i32
    %c0_i32_0 = arith.constant 0 : i32
    %c0_i32_1 = arith.constant 0 : i32
    return %c0_i32, %c0_i32_0 : i32, i32
  }
  func.func @transform_5(%arg0: i32) -> (i32, i32) {
    %c0_i32 = arith.constant 0 : i32
    %c0_i32_0 = arith.constant 0 : i32
    %c0_i32_1 = arith.constant 0 : i32
    return %c0_i32, %c0_i32_0 : i32, i32
  }
  func.func @transform_6(%arg0: i32) -> (i32, i32) {
    %c0_i32 = arith.constant 0 : i32
    %c0_i32_0 = arith.constant 0 : i32
    %c0_i32_1 = arith.constant 0 : i32
    return %c0_i32, %c0_i32_0 : i32, i32
  }
  func.func @transform_7(%arg0: i32) -> (i32, i32) {
    %c0_i32 = arith.constant 0 : i32
    %c0_i32_0 = arith.constant 0 : i32
    return %arg0, %c0_i32 : i32, i32
  }
}

</mosaic_0001>

<bundles_post_ra>
// kernel: tpu_custom_call.1
= control target key start
LH: loop header
LB: loop body
LE: loop exit
PB: predicated region body
PF: predicated region fallthrough
CT: control target
= control target key end

     0   :  { %s6724_s0 = inlined_call_operand.hbm [shape: bf16[256,1024], index: 0, kind: input, shape index: {}]   ;;  %s6725_s1 = inlined_call_operand.hbm [shape: bf16[1024,512], index: 1, kind: input, shape index: {}]   ;;  %s6726_s2 = inlined_call_operand.hbm [shape: f32[1,512], index: 2, kind: input, shape index: {}]   ;;  %s6727_s3 = inlined_call_operand.hbm [shape: bf16[512,256], index: 3, kind: input, shape index: {}]   ;;  %s6728_s4 = inlined_call_operand.vmem [shape: f32[1,256], index: 4, kind: input, shape index: {}]   ;;  %s6729_s5 = inlined_call_operand.hbm [shape: bf16[256,128], index: 5, kind: input, shape index: {}]   ;;  %s6730_s6 = inlined_call_operand.vmem [shape: f32[1,128], index: 6, kind: input, shape index: {}]   ;;  %s6731_s7 = inlined_call_operand.hbm [shape: f32[256,128], index: 7, kind: output, shape index: {}]  }
   0x1   :  { %6758 = sst [smem:[#allocation33_spill]] %s6725_s1 }
   0x2   :  { %12 = vsyncpa [#allocation3], 0 }
   0x3   :  { %14 = vsyncpa [#allocation3 + $0x1], 0 }
   0x4   :  { %15 = vsyncpa [#allocation6], 0 }
   0x5   :  { %16 = vsyncpa [#allocation9], 0 }
   0x6   :  { %17 = vsyncpa [#allocation4], 0 }
   0x7   :  { %19 = vsyncpa [#allocation4 + $0x1], 0  ;;  %s5704_s24 = smov 0   ;;  %s5706_s25 = smov 0  }
   0x8   :  { %s5708_s26 = smov 0   ;;  %s5710_s27 = smov 0  }
   0x9 LB: > { %s5725_s28 = sadd.s32 4294967295, %s5646_s27   ;;  %s4342_s29 = sadd.s32 4294967294, %s5646_s27   ;;  %s5646_s27 = sphi %s5710_s27, %s6838_s27   ;;  %s5642_s26 = sphi %s5708_s26, %s6837_s26   ;;  %s5638_s25 = sphi %s5706_s25, %s6836_s25   ;;  %s5634_s24 = sphi %s5704_s24, %s6835_s24  }
   0xa   : > { %p45_p0 = scmp.ne.s32.totalorder %s5638_s25, %s5634_s24  ;;  %p6732_p1 = scmp.eq.s32.totalorder %s5725_s28, 0 }
   0xb   : > { %p201_p3 = scmp.eq.s32.totalorder %s4342_s29, 1  ;;  %p4343_p5 = scmp.ge.s32.totalorder %s5646_s27, 1 }
   0xc   : > { %p5734_p4 = por %p6732_p1, %p45_p0  ;;  %p208_p7 = scmp.lt.s32.totalorder %s5646_s27, 3 }
   0xd   : > { %p5739_p6 = por %p201_p3, %p45_p0  ;;  %s5648_s10 = smov [#allocation5]  }
   0xe   : > { %s6759_s30 = scalar_select %p5734_p4, 1, 0 }
   0xf   : > { %s6760_s8 = scalar_select %p5739_p6, 1, 0 }
  0x10   : > { %p5744_p8 = pnand %p4343_p5, %p208_p7  ;;  %s220_s11 = sshll.u32 %s5648_s10, 4  ;;  %s221_s11 = int_to_ptr.vmem [resolvable:$true] %s220_s11 }
  0x11   : > { %s5649_s13 = smov [#allocation8]   ;;  %s5453_s15 = scalar_lea.vmem %s221_s11, 32768 }
  0x12   : > { %s6761_s9 = scalar_select %p5744_p8, 1, 0 }
  0x13   : > { %p4869_p9 = pneg %p5744_p8  ;;  %s244_s14 = sshll.u32 %s5649_s13, 4  ;;  %s245_s14 = int_to_ptr.vmem [resolvable:$true] %s244_s14 }
  0x14   : > { %p5454_p13 = scmp.ne.s32.totalorder %s221_s11, %s5453_s15  ;;  %p5461_p5 = scmp.lt.s32.totalorder %s221_s11, %s221_s11 }
  0x15   : > { %p5753_p11 = pnand %p4869_p9, %p6732_p1  ;;  %p5462_p7 = scmp.lt.s32.totalorder %s5453_s15, %s5453_s15 }
  0x17   : > { %p5444_p12 = pneg %p5753_p11  ;;  %p5463_p10 = por %p5462_p7, %p5461_p5 }
  0x19   : > { %p5456_p0 = pnand %p5454_p13, %p5444_p12 }
  0x1b   : > { %p5457_p3 = pneg %p5456_p0 }
  0x1d   : > { %p5464_p9 = pnand %p5463_p10, %p5457_p3 }
  0x1f   : > { %5467 = shalt.err (!%p5464_p9)
}
  0x20   : > { %s5650_s16 = smov 256   ;;  %s5651_s17 = smov 16  }
  0x21   : > { %s6763_s1 = sld [smem:[#allocation33_spill]]  ;;  %s5479_s20 = scalar_lea.vmem %s245_s14, 8192 }
  0x22   : > { %p5480_p1 = scmp.ne.s32.totalorder %s245_s14, %s5479_s20  ;;  %p5487_p2 = scmp.lt.s32.totalorder %s245_s14, %s245_s14 }
  0x23   : > { %p5488_p6 = scmp.lt.s32.totalorder %s5479_s20, %s5479_s20 }
  0x24   : > { %p5482_p13 = pnand %p5480_p1, %p5444_p12 }
  0x25   : > { %p5489_p5 = por %p5488_p6, %p5487_p2 }
  0x26   : > { %p5483_p0 = pneg %p5482_p13 }
  0x27   : > { %4872 = dma.hbm_to_vmem [thread:$0]  (!%p5753_p11), %s6763_s1, 32768, %s221_s11, [#allocation6], %s5650_s16, %s5650_s16, %s5651_s17  }
  0x28   : > { %p5490_p10 = pnand %p5489_p5, %p5483_p0 }
  0x2a   : > { %5493 = shalt.err (!%p5490_p10)
}
  0x2b   : > { %s5652_s21 = smov 128   ;;  %s5653_s22 = smov 8  }
  0x2c   : > { %4878 = dma.hbm_to_vmem [thread:$0]  (!%p5753_p11), %s6727_s3, 8192, %s245_s14, [#allocation9], %s5652_s21, %s5652_s21, %s5653_s22  }
  0x2d   : > { %s5654_s10 = smov [#allocation7]   ;;  %s5655_s13 = smov [#allocation10]  }
  0x2e   : > { %s234_s11 = sshll.u32 %s5654_s10, 4  ;;  %s260_s15 = sshll.u32 %s5655_s13, 4  ;;  %s235_s11 = int_to_ptr.vmem [resolvable:$true] %s234_s11  ;;  %s261_s15 = int_to_ptr.vmem [resolvable:$true] %s260_s15 }
  0x2f   : > { %s5505_s16 = scalar_lea.vmem %s235_s11, 64  ;;  %p5513_p3 = scmp.lt.s32.totalorder %s235_s11, %s235_s11 }
  0x30   : > { %p5506_p1 = scmp.ne.s32.totalorder %s235_s11, %s5505_s16  ;;  %p5514_p7 = scmp.lt.s32.totalorder %s5505_s16, %s5505_s16 }
  0x32   : > { %p5508_p2 = pnand %p5506_p1, %p5444_p12  ;;  %p5515_p9 = por %p5514_p7, %p5513_p3 }
  0x34   : > { %p5509_p6 = pneg %p5508_p2 }
  0x36   : > { %p5516_p13 = pnand %p5515_p9, %p5509_p6 }
  0x38   : > { %5519 = shalt.err (!%p5516_p13)
}
  0x39   : > { %4875 = dma.hbm_to_vmem [thread:$0]  (!%p5753_p11), %s6726_s2, 64, %s235_s11, [#allocation6]  }
  0x3a   : > { %s5531_s18 = scalar_lea.vmem %s261_s15, 2048  ;;  %p5539_p1 = scmp.lt.s32.totalorder %s261_s15, %s261_s15 }
  0x3b   : > { %p5532_p0 = scmp.ne.s32.totalorder %s261_s15, %s5531_s18  ;;  %p5540_p2 = scmp.lt.s32.totalorder %s5531_s18, %s5531_s18 }
  0x3d   : > { %p5534_p5 = pnand %p5532_p0, %p5444_p12  ;;  %p5541_p4 = por %p5540_p2, %p5539_p1 }
  0x3f   : > { %p5535_p10 = pneg %p5534_p5 }
  0x41   : > { %p5542_p8 = pnand %p5541_p4, %p5535_p10 }
  0x43   : > { %5545 = shalt.err (!%p5542_p8)
}
  0x44   : > { %s5656_s19 = smov 64   ;;  %s5657_s20 = smov 4  }
  0x45   : > { %4881 = dma.hbm_to_vmem [thread:$0]  (!%p5753_p11), %s6729_s5, 2048, %s261_s15, [#allocation9], %s5656_s19, %s5656_s19, %s5657_s20  }
  0x46   : > { %s5792_s23 = sadd.s32 1, %s5646_s27   ;;  %s32_s10 = sadd.s32 1, %s5642_s26 }
  0x47   : > { %s29_s29 = ssub.s32 %s5646_s27, %s5792_s23  ;;  %p39_p8 = scmp.ne.s32.totalorder %s5642_s26, %s5638_s25 }
  0x48   : > { %p30_p4 = scmp.eq.s32.totalorder %s29_s29, 0  ;;  %p40_p12 = scmp.eq.s32.totalorder %s5646_s27, 0 }
  0x49   : > { %p6764_p3 = scmp.eq.s32.totalorder %s5725_s28, 1  ;;  %p4894_p9 = scmp.lt.s32.totalorder %s5646_s27, 2 }
  0x4a   : > { %s5801_s11 = scalar_select %p30_p4, %s5642_s26, %s32_s10  }
  0x4b   : > { %p41_p6 = por %p40_p12, %p39_p8  ;;  %p5805_p7 = por %p6764_p3, %p39_p8 }
  0x4c   : > { %s277_s12 = sand.u32 1, %s5642_s26   ;;  %s4767_s15 = sshll.u32 %s5646_s27, 13 }
  0x4d   : > { %s6765_s13 = scalar_select %p5805_p7, 1, 0 }
  0x4e   : > { %s4349_s16 = sshll.u32 %s277_s12, 9  ;;  %s5815_s18 = scalar_lea.hbm %s6724_s0, %s4767_s15 }
  0x4f   : > { %s281_s19 = scalar_lea.vmem [#allocation2], %s4349_s16  ;;  %p5819_p11 = pnand %p4894_p9, %p41_p6 }
  0x50   : > { %s289_s20 = sshll.u32 %s281_s19, 4  ;;  %s5823_s22 = scalar_lea.sflag [#allocation3], %s277_s12  ;;  %s5817_s20 = int_to_ptr.vmem [resolvable:$true] %s289_s20 }
  0x51   : > { %s5546_s29 = scalar_lea.hbm %s5815_s18, 8192  ;;  %p5548_p0 = pneg %p5819_p11 }
  0x52   : > { %p5547_p13 = scmp.ne.s32.totalorder %s5815_s18, %s5546_s29  ;;  %s5551_s16 = scalar_lea.hbm %s6724_s0, 16384 }
  0x53   : > { %p5552_p1 = scmp.lt.s32.totalorder %s5815_s18, %s6724_s0  ;;  %p5553_p2 = scmp.lt.s32.totalorder %s5551_s16, %s5546_s29 }
  0x54   : > { %p5549_p5 = pnand %p5548_p0, %p5547_p13 }
  0x55   : > { %p5554_p4 = por %p5553_p2, %p5552_p1 }
  0x56   : > { %p5550_p10 = pneg %p5549_p5 }
  0x58   : > { %p5555_p8 = pnand %p5554_p4, %p5550_p10 }
  0x5a   : > { %5558 = shalt.err (!%p5555_p8)
}
  0x5b   : > { %s5559_s12 = scalar_lea.vmem %s5817_s20, 8192  ;;  %s5658_s19 = smov [#allocation2]  }
  0x5c   : > { %p5560_p12 = scmp.ne.s32.totalorder %s5817_s20, %s5559_s12  ;;  %s5564_s1 = sshll.u32 %s5658_s19, 4  ;;  %s5565_s1 = int_to_ptr.vmem [resolvable:$false] %s5564_s1 }
  0x5d   : > { %s5566_s10 = scalar_lea.vmem %s5565_s1, 16384  ;;  %p5567_p9 = scmp.lt.s32.totalorder %s5817_s20, %s5565_s1 }
  0x5e   : > { %p5562_p6 = pnand %p5560_p12, %p5548_p0  ;;  %p5568_p13 = scmp.lt.s32.totalorder %s5566_s10, %s5559_s12 }
  0x60   : > { %p5563_p3 = pneg %p5562_p6  ;;  %p5569_p5 = por %p5568_p13, %p5567_p9 }
  0x62   : > { %p5570_p7 = pnand %p5569_p5, %p5563_p3 }
  0x64   : > { %5573 = shalt.err (!%p5570_p7)
}
  0x65   : > { %s5659_s29 = smov 512   ;;  %s5660_s15 = smov 32  }
  0x66   : > { %4885 = dma.hbm_to_vmem [thread:$0]  (!%p5819_p11), %s5815_s18, 8192, %s5817_s20, %s5823_s22, %s5659_s29, %s5659_s29, %s5660_s15  }
  0x67   : > { %p6767_p0 = scmp.ne.s32.totalorder %s6761_s9, 0 }
  0x69   : > { %301 = sbr.rel (%p6767_p0) target bundleno = 1065 (0x429), region = 48 }
  0x6e   : > { %s5847_s16 = sand.u32 1, %s5638_s25   ;;  %p6768_p7 = scmp.ne.s32.totalorder %s6759_s30, 0 }
  0x6f   : > { %s4354_s1 = sshll.u32 %s5847_s16, 9  ;;  %s304_s14 = scalar_lea.sflag [#allocation3], %s5847_s16 }
  0x70   : > { %s5851_s17 = scalar_lea.vmem [#allocation2], %s4354_s1 }
  0x71   : > { %5617 = dma.done.wait (%p6768_p7), %s304_s14, 8192  }
  0x72   : > { %5619 = vsyncadd (%p6768_p7), %s304_s14, 4294959104  ;;  %p6769_p11 = scmp.eq.s32.totalorder %s5725_s28, 0 }
  0x74   : > { %5621 = dma.done.wait (%p6769_p11), [#allocation6], 32832   ;;  %p6770_p10 = pmov %p6769_p11 }
  0x76   : > { %5623 = vsyncadd (%p6770_p10), [#allocation6], 4294934464  ;;  %p6771_p1 = pmov %p6770_p10 }
  0x78   : > { %5625 = dma.done.wait (%p6771_p1), [#allocation9], 10240   ;;  %p6772_p2 = pmov %p6771_p1 }
  0x79   : > { %v4946_v0 = vld [vmem:[#allocation5 + $0xe4] ss:$16 sps:$4 sm:$0xff]   ;;  %v4950_v2 = vld [vmem:[#allocation5 + $0xe0] ss:$16 sps:$4 sm:$0xff]   ;;  %v358_v50 = vld [vmem:[%s5851_s17 + $0x8] sm:$0xff]  ;;  %s4359_s18 = sshll.u32 %s5847_s16, 7 }
  0x7a   : > { %5627 = vsyncadd (%p6772_p2), [#allocation9], 4294957056  ;;  %v4948_v1 = vld [vmem:[#allocation5 + $0x2e4] ss:$16 sps:$4 sm:$0xff]   ;;  %2299 = vmatprep.subr.bf16.mxu0 %v4946_v0  ;;  %v4951_v3 = vld [vmem:[#allocation5 + $0x2e0] ss:$16 sps:$4 sm:$0xff]  }
  0x7b   : > { %2412 = vmatprep.subr.bf16.mxu1 %v4948_v1  ;;  %v4952_v4 = vld [vmem:[#allocation5 + $0xc4] ss:$16 sps:$4 sm:$0xff]   ;;  %2300 = vmatpush1.bf16.msra.mxu0 %v4950_v2  ;;  %v4956_v6 = vld [vmem:[#allocation5 + $0xc0] ss:$16 sps:$4 sm:$0xff]   ;;  %v362_v51 = vld [vmem:[%s5851_s17 + $0x28] sm:$0xff]  ;;  %s6641_s22 = scalar_lea.vmem [#allocation11], %s4359_s18 }
  0x7c   : > { %2413 = vmatpush1.bf16.msra.mxu1 %v4951_v3  ;;  %v4954_v5 = vld [vmem:[#allocation5 + $0x2c4] ss:$16 sps:$4 sm:$0xff]   ;;  %2301 = vmatprep.subr.bf16.mxu0 %v4952_v4  ;;  %v4957_v7 = vld [vmem:[#allocation5 + $0x2c0] ss:$16 sps:$4 sm:$0xff]   ;;  %v5871_v55 = vcombine.high %v358_v50, %v362_v51  ;;  %s4768_s12 = sshll.u32 %s5725_s28, 11  ;;  %s4231_s19 = sshll.u32 %s6641_s22, 4  ;;  %s6679_s19 = int_to_ptr.vmem [resolvable:$true] %s4231_s19 }
  0x7d   : > { %2414 = vmatprep.subr.bf16.mxu1 %v4954_v5  ;;  %v4958_v8 = vld [vmem:[#allocation5 + $0xa4] ss:$16 sps:$4 sm:$0xff]   ;;  %v4962_v10 = vld [vmem:[#allocation5 + $0xa0] ss:$16 sps:$4 sm:$0xff]   ;;  %s6677_s15 = scalar_lea.hbm %s6731_s7, %s4768_s12  ;;  %s4218_s1 = scalar_lea.sflag [#allocation4], %s5847_s16 }
  0x7e   : > { %v4960_v9 = vld [vmem:[#allocation5 + $0x2a4] ss:$16 sps:$4 sm:$0xff]   ;;  %v4963_v11 = vld [vmem:[#allocation5 + $0x2a0] ss:$16 sps:$4 sm:$0xff]   ;;  %2444 = vmatprep.mubr.bf16.mxu1 %v5871_v55  ;;  %s5574_s14 = scalar_lea.vmem %s6679_s19, 2048  ;;  %p6832_p8 = scmp.ne.s32.totalorder %s6765_s13, 0 }
  0x7f   : > { %2302 = vmatpush1.bf16.msra.mxu0 %v4956_v6  ;;  %v4964_v12 = vld [vmem:[#allocation5 + $0x84] ss:$16 sps:$4 sm:$0xff]   ;;  %v4968_v14 = vld [vmem:[#allocation5 + $0x80] ss:$16 sps:$4 sm:$0xff]   ;;  %p5575_p4 = scmp.ne.s32.totalorder %s6679_s19, %s5574_s14  ;;  %s5661_s28 = smov [#allocation11]  }
  0x80   : > { %2415 = vmatpush1.bf16.msra.mxu1 %v4957_v7  ;;  %2303 = vmatprep.subr.bf16.mxu0 %v4958_v8  ;;  %v4966_v13 = vld [vmem:[#allocation5 + $0x284] ss:$16 sps:$4 sm:$0xff]   ;;  %v4969_v15 = vld [vmem:[#allocation5 + $0x280] ss:$16 sps:$4 sm:$0xff]  }
  0x81   : > { %2416 = vmatprep.subr.bf16.mxu1 %v4960_v9  ;;  %v4970_v16 = vld [vmem:[#allocation5 + $0x64] ss:$16 sps:$4 sm:$0xff]   ;;  %v4974_v18 = vld [vmem:[#allocation5 + $0x60] ss:$16 sps:$4 sm:$0xff]   ;;  %p5576_p12 = pnand %p5575_p4, %p6832_p8 }
  0x82   : > { %v4972_v17 = vld [vmem:[#allocation5 + $0x264] ss:$16 sps:$4 sm:$0xff]   ;;  %v4975_v19 = vld [vmem:[#allocation5 + $0x260] ss:$16 sps:$4 sm:$0xff]  }
  0x83   : > { %2304 = vmatpush1.bf16.msra.mxu0 %v4962_v10  ;;  %v4976_v20 = vld [vmem:[#allocation5 + $0x44] ss:$16 sps:$4 sm:$0xff]   ;;  %v4980_v22 = vld [vmem:[#allocation5 + $0x40] ss:$16 sps:$4 sm:$0xff]   ;;  %p5577_p6 = pneg %p5576_p12 }
  0x84   : > { %2417 = vmatpush1.bf16.msra.mxu1 %v4963_v11  ;;  %2305 = vmatprep.subr.bf16.mxu0 %v4964_v12  ;;  %v4978_v21 = vld [vmem:[#allocation5 + $0x244] ss:$16 sps:$4 sm:$0xff]   ;;  %v4981_v23 = vld [vmem:[#allocation5 + $0x240] ss:$16 sps:$4 sm:$0xff]   ;;  %v5878_v12 = vcombine.low %v358_v50, %v362_v51 }
  0x85   : > { %2418 = vmatprep.subr.bf16.mxu1 %v4966_v13  ;;  %v4982_v24 = vld [vmem:[#allocation5 + $0x24] ss:$16 sps:$4 sm:$0xff]   ;;  %v4986_v26 = vld [vmem:[#allocation5 + $0x20] ss:$16 sps:$4 sm:$0xff]  }
  0x86   : > { %v4984_v25 = vld [vmem:[#allocation5 + $0x224] ss:$16 sps:$4 sm:$0xff]   ;;  %v4987_v27 = vld [vmem:[#allocation5 + $0x220] ss:$16 sps:$4 sm:$0xff]  }
  0x87   : > { %2306 = vmatpush1.bf16.msra.mxu0 %v4968_v14  ;;  %v4988_v28 = vld [vmem:[#allocation5 + $0x4] ss:$16 sps:$4 sm:$0xff]   ;;  %v4992_v30 = vld [vmem:[#allocation5] ss:$16 sps:$4 sm:$0xff]   ;;  %v366_v14 = vld [vmem:[%s5851_s17 + $0x48] sm:$0xff] }
  0x88   : > { %2419 = vmatpush1.bf16.msra.mxu1 %v4969_v15  ;;  %2307 = vmatprep.subr.bf16.mxu0 %v4970_v16  ;;  %v4990_v29 = vld [vmem:[#allocation5 + $0x204] ss:$16 sps:$4 sm:$0xff]   ;;  %v4993_v31 = vld [vmem:[#allocation5 + $0x200] ss:$16 sps:$4 sm:$0xff]   ;;  %v370_v15 = vld [vmem:[%s5851_s17 + $0x68] sm:$0xff] }
  0x89   : > { %2420 = vmatprep.subr.bf16.mxu1 %v4972_v17  ;;  %v4994_v32 = vld [vmem:[#allocation5 + $0x1e4] ss:$16 sps:$4 sm:$0xff]   ;;  %v4998_v34 = vld [vmem:[#allocation5 + $0x1e0] ss:$16 sps:$4 sm:$0xff]  }
  0x8a   : > { %v4996_v33 = vld [vmem:[#allocation5 + $0x3e4] ss:$16 sps:$4 sm:$0xff]   ;;  %v4999_v35 = vld [vmem:[#allocation5 + $0x3e0] ss:$16 sps:$4 sm:$0xff]  }
  0x8b   : > { %2308 = vmatpush1.bf16.msra.mxu0 %v4974_v18  ;;  %v5000_v36 = vld [vmem:[#allocation5 + $0x1c4] ss:$16 sps:$4 sm:$0xff]   ;;  %v5004_v38 = vld [vmem:[#allocation5 + $0x1c0] ss:$16 sps:$4 sm:$0xff]  }
  0x8c   : > { %2421 = vmatpush1.bf16.msra.mxu1 %v4975_v19  ;;  %2309 = vmatprep.subr.bf16.mxu0 %v4976_v20  ;;  %v5002_v37 = vld [vmem:[#allocation5 + $0x3c4] ss:$16 sps:$4 sm:$0xff]   ;;  %v5005_v39 = vld [vmem:[#allocation5 + $0x3c0] ss:$16 sps:$4 sm:$0xff]   ;;  %v5885_v19 = vcombine.high %v366_v14, %v370_v15 }
  0x8d   : > { %2422 = vmatprep.subr.bf16.mxu1 %v4978_v21  ;;  %v5006_v40 = vld [vmem:[#allocation5 + $0x1a4] ss:$16 sps:$4 sm:$0xff]   ;;  %v5010_v42 = vld [vmem:[#allocation5 + $0x1a0] ss:$16 sps:$4 sm:$0xff]  }
  0x8e   : > { %v5008_v41 = vld [vmem:[#allocation5 + $0x3a4] ss:$16 sps:$4 sm:$0xff]   ;;  %v5011_v43 = vld [vmem:[#allocation5 + $0x3a0] ss:$16 sps:$4 sm:$0xff]  }
  0x8f   : > { %2310 = vmatpush1.bf16.msra.mxu0 %v4980_v22  ;;  %v5012_v44 = vld [vmem:[#allocation5 + $0x184] ss:$16 sps:$4 sm:$0xff]   ;;  %v5016_v46 = vld [vmem:[#allocation5 + $0x180] ss:$16 sps:$4 sm:$0xff]  }
  0x90   : > { %2423 = vmatpush1.bf16.msra.mxu1 %v4981_v23  ;;  %2311 = vmatprep.subr.bf16.mxu0 %v4982_v24  ;;  %v5014_v45 = vld [vmem:[#allocation5 + $0x384] ss:$16 sps:$4 sm:$0xff]   ;;  %v5017_v47 = vld [vmem:[#allocation5 + $0x380] ss:$16 sps:$4 sm:$0xff]  }
  0x91   : > { %2424 = vmatprep.subr.bf16.mxu1 %v4984_v25  ;;  %v357_v48 = vld [vmem:[%s5851_s17] sm:$0xff] }
  0x92   : > { %v361_v49 = vld [vmem:[%s5851_s17 + $0x20] sm:$0xff] }
  0x93   : > { %2312 = vmatpush1.bf16.msra.mxu0 %v4986_v26  ;;  %v5018_v52 = vld [vmem:[#allocation5 + $0x164] ss:$16 sps:$4 sm:$0xff]   ;;  %v5869_v53 = vcombine.high %v357_v48, %v361_v49  ;;  %v5022_v56 = vld [vmem:[#allocation5 + $0x160] ss:$16 sps:$4 sm:$0xff]   ;;  %v5876_v11 = vcombine.low %v357_v48, %v361_v49 }
  0x94   : > { %2425 = vmatpush1.bf16.msra.mxu1 %v4987_v27  ;;  %2313 = vmatprep.subr.bf16.mxu0 %v4988_v28  ;;  %v5020_v54 = vld [vmem:[#allocation5 + $0x364] ss:$16 sps:$4 sm:$0xff]   ;;  %v5023_v57 = vld [vmem:[#allocation5 + $0x360] ss:$16 sps:$4 sm:$0xff]  }
  0x95   : > { %2426 = vmatprep.subr.bf16.mxu1 %v4990_v29  ;;  %2331 = vmatprep.mubr.bf16.mxu0 %v5869_v53  ;;  %v5024_v58 = vld [vmem:[#allocation5 + $0x144] ss:$16 sps:$4 sm:$0xff]   ;;  %v5028_v60 = vld [vmem:[#allocation5 + $0x140] ss:$16 sps:$4 sm:$0xff]   ;;  %v5895_v29 = vcombine.low %v366_v14, %v370_v15 }
  0x96   : > { %v5026_v59 = vld [vmem:[#allocation5 + $0x344] ss:$16 sps:$4 sm:$0xff]   ;;  %v5029_v61 = vld [vmem:[#allocation5 + $0x340] ss:$16 sps:$4 sm:$0xff]  }
  0x97   : > { %2314 = vmatpush1.bf16.msra.mxu0 %v4992_v30  ;;  %v5030_v62 = vld [vmem:[#allocation5 + $0x124] ss:$16 sps:$4 sm:$0xff]   ;;  %v5034_v0 = vld [vmem:[#allocation5 + $0x120] ss:$16 sps:$4 sm:$0xff]   ;;  %v374_v30 = vld [vmem:[%s5851_s17 + $0x88] sm:$0xff] }
  0x98   : > { %2427 = vmatpush1.bf16.msra.mxu1 %v4993_v31  ;;  %2315 = vmatprep.subr.bf16.mxu0 %v4994_v32  ;;  %v5032_v63 = vld [vmem:[#allocation5 + $0x324] ss:$16 sps:$4 sm:$0xff]   ;;  %v5035_v1 = vld [vmem:[#allocation5 + $0x320] ss:$16 sps:$4 sm:$0xff]   ;;  %v378_v31 = vld [vmem:[%s5851_s17 + $0xa8] sm:$0xff] }
  0x99   : > { %2428 = vmatprep.subr.bf16.mxu1 %v4996_v33  ;;  %v5036_v2 = vld [vmem:[#allocation5 + $0x104] ss:$16 sps:$4 sm:$0xff]   ;;  %v5040_v4 = vld [vmem:[#allocation5 + $0x100] ss:$16 sps:$4 sm:$0xff]  }
  0x9a   : > { %v5038_v3 = vld [vmem:[#allocation5 + $0x304] ss:$16 sps:$4 sm:$0xff]   ;;  %v5041_v5 = vld [vmem:[#allocation5 + $0x300] ss:$16 sps:$4 sm:$0xff]  }
  0x9b   : > { %2316 = vmatpush2.bf16.msra.mxu0 %v4998_v34  ;;  %v5044_v6 = vld [vmem:[#allocation5 + $0x4e4] ss:$16 sps:$4 sm:$0xff]   ;;  %v5042_v8 = vld [vmem:[#allocation5 + $0x4e0] ss:$16 sps:$4 sm:$0xff]  }
  0x9c   : > { %2429 = vmatpush2.bf16.msra.mxu1 %v4999_v35  ;;  %2317 = vmatprep.subr.bf16.mxu0 %v5000_v36  ;;  %v5047_v7 = vld [vmem:[#allocation5 + $0x6e4] ss:$16 sps:$4 sm:$0xff]   ;;  %v5045_v9 = vld [vmem:[#allocation5 + $0x6e0] ss:$16 sps:$4 sm:$0xff]   ;;  %v5901_v35 = vcombine.high %v374_v30, %v378_v31 }
  0x9d   : > { %2430 = vmatprep.subr.bf16.mxu1 %v5002_v37  ;;  %v365_v10 = vld [vmem:[%s5851_s17 + $0x40] sm:$0xff] }
  0x9e   : > { %v369_v13 = vld [vmem:[%s5851_s17 + $0x60] sm:$0xff] }
  0x9f   : > { %2318 = vmatpush2.bf16.msra.mxu0 %v5004_v38  ;;  %v5050_v16 = vld [vmem:[#allocation5 + $0x4c4] ss:$16 sps:$4 sm:$0xff]   ;;  %v5883_v18 = vcombine.high %v365_v10, %v369_v13  ;;  %v5048_v20 = vld [vmem:[#allocation5 + $0x4c0] ss:$16 sps:$4 sm:$0xff]   ;;  %v5893_v28 = vcombine.low %v365_v10, %v369_v13 }
  0xa0   : > { %2431 = vmatpush2.bf16.msra.mxu1 %v5005_v39  ;;  %2319 = vmatprep.subr.bf16.mxu0 %v5006_v40  ;;  %v5053_v17 = vld [vmem:[#allocation5 + $0x6c4] ss:$16 sps:$4 sm:$0xff]   ;;  %v5051_v21 = vld [vmem:[#allocation5 + $0x6c0] ss:$16 sps:$4 sm:$0xff]  }
  0xa1   : > { %2432 = vmatprep.subr.bf16.mxu1 %v5008_v41  ;;  %v5056_v22 = vld [vmem:[#allocation5 + $0x4a4] ss:$16 sps:$4 sm:$0xff]   ;;  %v5054_v24 = vld [vmem:[#allocation5 + $0x4a0] ss:$16 sps:$4 sm:$0xff]  }
  0xa2   : > { %v5059_v23 = vld [vmem:[#allocation5 + $0x6a4] ss:$16 sps:$4 sm:$0xff]   ;;  %v5057_v25 = vld [vmem:[#allocation5 + $0x6a0] ss:$16 sps:$4 sm:$0xff]  }
  0xa3   : > { %2320 = vmatpush2.bf16.msra.mxu0 %v5010_v42  ;;  %v373_v26 = vld [vmem:[%s5851_s17 + $0x80] sm:$0xff] }
  0xa4   : > { %2433 = vmatpush2.bf16.msra.mxu1 %v5011_v43  ;;  %2321 = vmatprep.subr.bf16.mxu0 %v5012_v44  ;;  %v377_v27 = vld [vmem:[%s5851_s17 + $0xa0] sm:$0xff] }
  0xa5   : > { %2434 = vmatprep.subr.bf16.mxu1 %v5014_v45  ;;  %v5062_v32 = vld [vmem:[#allocation5 + $0x484] ss:$16 sps:$4 sm:$0xff]   ;;  %v5899_v34 = vcombine.high %v373_v26, %v377_v27  ;;  %v5060_v36 = vld [vmem:[#allocation5 + $0x480] ss:$16 sps:$4 sm:$0xff]   ;;  %v5909_v44 = vcombine.low %v373_v26, %v377_v27  ;;  %v5911_v45 = vcombine.low %v374_v30, %v378_v31 }
  0xa6   : > { %v5065_v33 = vld [vmem:[#allocation5 + $0x684] ss:$16 sps:$4 sm:$0xff]   ;;  %v5063_v37 = vld [vmem:[#allocation5 + $0x680] ss:$16 sps:$4 sm:$0xff]  }
  0xa7   : > { %2322 = vmatpush2.bf16.msra.mxu0 %v5016_v46  ;;  %v5068_v38 = vld [vmem:[#allocation5 + $0x464] ss:$16 sps:$4 sm:$0xff]   ;;  %v5066_v40 = vld [vmem:[#allocation5 + $0x460] ss:$16 sps:$4 sm:$0xff]   ;;  %v382_v46 = vld [vmem:[%s5851_s17 + $0xc8] sm:$0xff] }
  0xa8   : > { %2435 = vmatpush2.bf16.msra.mxu1 %v5017_v47  ;;  %2323 = vmatprep.subr.bf16.mxu0 %v5018_v52  ;;  %v5071_v39 = vld [vmem:[#allocation5 + $0x664] ss:$16 sps:$4 sm:$0xff]   ;;  %v5069_v41 = vld [vmem:[#allocation5 + $0x660] ss:$16 sps:$4 sm:$0xff]   ;;  %v386_v47 = vld [vmem:[%s5851_s17 + $0xe8] sm:$0xff] }
  0xa9   : > { %2436 = vmatprep.subr.bf16.mxu1 %v5020_v54  ;;  %v381_v42 = vld [vmem:[%s5851_s17 + $0xc0] sm:$0xff]  ;;  %v5917_v51 = vcombine.high %v382_v46, %v386_v47 }
  0xaa   : > { %v385_v43 = vld [vmem:[%s5851_s17 + $0xe0] sm:$0xff] }
  0xab   : > { %2324 = vmatpush2.bf16.msra.mxu0 %v5022_v56  ;;  %v5074_v48 = vld [vmem:[#allocation5 + $0x444] ss:$16 sps:$4 sm:$0xff]   ;;  %v5915_v50 = vcombine.high %v381_v42, %v385_v43  ;;  %v5072_v52 = vld [vmem:[#allocation5 + $0x440] ss:$16 sps:$4 sm:$0xff]  }
  0xac   : > { %2437 = vmatpush2.bf16.msra.mxu1 %v5023_v57  ;;  %2325 = vmatprep.subr.bf16.mxu0 %v5024_v58  ;;  %v5077_v49 = vld [vmem:[#allocation5 + $0x644] ss:$16 sps:$4 sm:$0xff]   ;;  %v5075_v54 = vld [vmem:[#allocation5 + $0x640] ss:$16 sps:$4 sm:$0xff]  }
  0xad   : > { %2438 = vmatprep.subr.bf16.mxu1 %v5026_v59  ;;  %v5080_v56 = vld [vmem:[#allocation5 + $0x424] ss:$16 sps:$4 sm:$0xff]   ;;  %v5078_v58 = vld [vmem:[#allocation5 + $0x420] ss:$16 sps:$4 sm:$0xff]  }
  0xae   : > { %v5083_v57 = vld [vmem:[#allocation5 + $0x624] ss:$16 sps:$4 sm:$0xff]   ;;  %v5096_v26 = vld [vmem:[#allocation5 + $0x5c0] ss:$16 sps:$4 sm:$0xff]  }
  0xaf   : > { %2326 = vmatpush2.bf16.msra.mxu0 %v5028_v60  ;;  %v389_v59 = vld [vmem:[%s5851_s17 + $0x100] sm:$0xff] }
  0xb0   : > { %2439 = vmatpush2.bf16.msra.mxu1 %v5029_v61  ;;  %2327 = vmatprep.subr.bf16.mxu0 %v5030_v62  ;;  %v393_v60 = vld [vmem:[%s5851_s17 + $0x120] sm:$0xff]  ;;  %v5925_v61 = vcombine.low %v381_v42, %v385_v43  ;;  %v5927_v62 = vcombine.low %v382_v46, %v386_v47 }
  0xb1   : > { %2440 = vmatprep.subr.bf16.mxu1 %v5032_v63  ;;  %v390_v63 = vld [vmem:[%s5851_s17 + $0x108] sm:$0xff]  ;;  %v397_v10 = vld [vmem:[%s5851_s17 + $0x140] sm:$0xff]  ;;  %v5941_v14 = vcombine.low %v389_v59, %v393_v60 }
  0xb2   : > { %v401_v13 = vld [vmem:[%s5851_s17 + $0x160] sm:$0xff] }
  0xb3   : > { %2328 = vmatpush2.bf16.msra.mxu0 %v5034_v0  ;;  %v394_v0 = vld [vmem:[%s5851_s17 + $0x128] sm:$0xff]  ;;  %v5099_v27 = vld [vmem:[#allocation5 + $0x7c0] ss:$16 sps:$4 sm:$0xff]   ;;  %v5104_v30 = vld [vmem:[#allocation5 + $0x5a4] ss:$16 sps:$4 sm:$0xff]  }
  0xb4   : > { %2441 = vmatpush2.bf16.msra.mxu1 %v5035_v1  ;;  %2329 = vmatprep.subr.bf16.mxu0 %v5036_v2  ;;  %v5081_v1 = vld [vmem:[#allocation5 + $0x620] ss:$16 sps:$4 sm:$0xff]   ;;  %v5086_v2 = vld [vmem:[#allocation5 + $0x404] ss:$16 sps:$4 sm:$0xff]   ;;  %v5943_v15 = vcombine.low %v390_v63, %v394_v0 }
  0xb5   : > { %2442 = vmatprep.subr.bf16.mxu1 %v5038_v3  ;;  %v5089_v3 = vld [vmem:[#allocation5 + $0x604] ss:$16 sps:$4 sm:$0xff]  }
  0xb6   : > { %v5107_v31 = vld [vmem:[#allocation5 + $0x7a4] ss:$16 sps:$4 sm:$0xff]  }
  0xb7   : > { %2330 = vmatpush2.bf16.msra.mxu0 %v5040_v4  ;;  %v5931_v4 = vcombine.high %v389_v59, %v393_v60  ;;  %v5110_v42 = vld [vmem:[#allocation5 + $0x584] ss:$16 sps:$4 sm:$0xff]  }
  0xb8   : > { %2443 = vmatpush2.bf16.msra.mxu1 %v5041_v5  ;;  %2525 = vmatprep.subr.bf16.mxu0 %v5044_v6  ;;  %v5933_v5 = vcombine.high %v390_v63, %v394_v0  ;;  %v5084_v6 = vld [vmem:[#allocation5 + $0x400] ss:$16 sps:$4 sm:$0xff]   ;;  %v5113_v43 = vld [vmem:[#allocation5 + $0x784] ss:$16 sps:$4 sm:$0xff]   ;;  %v414_v0 = vld [vmem:[%s5851_s17 + $0x1c8] sm:$0xff] }
  0xb9   : > { %2638 = vmatprep.subr.bf16.mxu1 %v5047_v7  ;;  %v5087_v7 = vld [vmem:[#allocation5 + $0x600] ss:$16 sps:$4 sm:$0xff]  }
  0xba   : > { %2332 = vmatmul.mubr.bf16.vlgmr.msra.gmra.mxu0 %v5876_v11  ;;  %v417_v59 = vld [vmem:[%s5851_s17 + $0x1e0] sm:$0xff] }
  0xbb   : > { %2445 = vmatmul.mubr.bf16.vlgmr.msra.gmra.mxu1 %v5878_v12  ;;  %2526 = vmatpush1.bf16.msra.mxu0 %v5042_v8  ;;  %v5092_v8 = vld [vmem:[#allocation5 + $0x5e4] ss:$16 sps:$4 sm:$0xff]  }
  0xbc   : > { %2639 = vmatpush1.bf16.msra.mxu1 %v5045_v9  ;;  %2527 = vmatprep.subr.bf16.mxu0 %v5050_v16  ;;  %v5095_v9 = vld [vmem:[#allocation5 + $0x7e4] ss:$16 sps:$4 sm:$0xff]   ;;  %v398_v16 = vld [vmem:[%s5851_s17 + $0x148] sm:$0xff] }
  0xbd   : > { %2640 = vmatprep.subr.bf16.mxu1 %v5053_v17  ;;  %2341 = vmatprep.mubr.bf16.mxu0 %v5883_v18  ;;  %v402_v17 = vld [vmem:[%s5851_s17 + $0x168] sm:$0xff] }
  0xbe   : > { %2454 = vmatprep.mubr.bf16.mxu1 %v5885_v19 }
  0xbf   : > { %2528 = vmatpush1.bf16.msra.mxu0 %v5048_v20  ;;  %v5090_v20 = vld [vmem:[#allocation5 + $0x5e0] ss:$16 sps:$4 sm:$0xff]  }
  0xc0   : > { %2641 = vmatpush1.bf16.msra.mxu1 %v5051_v21  ;;  %2529 = vmatprep.subr.bf16.mxu0 %v5056_v22  ;;  %v5093_v21 = vld [vmem:[#allocation5 + $0x7e0] ss:$16 sps:$4 sm:$0xff]   ;;  %v5098_v22 = vld [vmem:[#allocation5 + $0x5c4] ss:$16 sps:$4 sm:$0xff]  }
  0xc1   : > { %2642 = vmatprep.subr.bf16.mxu1 %v5059_v23  ;;  %v5101_v23 = vld [vmem:[#allocation5 + $0x7c4] ss:$16 sps:$4 sm:$0xff]  }
  0xc2   : > { %2342 = vmatmul.mubr.bf16.gmra.mxu0 %v5893_v28 }
  0xc3   : > { %2455 = vmatmul.mubr.bf16.gmra.mxu1 %v5895_v29  ;;  %2530 = vmatpush1.bf16.msra.mxu0 %v5054_v24  ;;  %v5947_v24 = vcombine.high %v397_v10, %v401_v13 }
  0xc4   : > { %2643 = vmatpush1.bf16.msra.mxu1 %v5057_v25  ;;  %2531 = vmatprep.subr.bf16.mxu0 %v5062_v32  ;;  %v5949_v25 = vcombine.high %v398_v16, %v402_v17  ;;  %v5102_v32 = vld [vmem:[#allocation5 + $0x5a0] ss:$16 sps:$4 sm:$0xff]  }
  0xc5   : > { %2644 = vmatprep.subr.bf16.mxu1 %v5065_v33  ;;  %2351 = vmatprep.mubr.bf16.mxu0 %v5899_v34  ;;  %v5105_v33 = vld [vmem:[#allocation5 + $0x7a0] ss:$16 sps:$4 sm:$0xff]  }
  0xc6   : > { %2464 = vmatprep.mubr.bf16.mxu1 %v5901_v35 }
  0xc7   : > { %2532 = vmatpush1.bf16.msra.mxu0 %v5060_v36  ;;  %v405_v36 = vld [vmem:[%s5851_s17 + $0x180] sm:$0xff] }
  0xc8   : > { %2645 = vmatpush1.bf16.msra.mxu1 %v5063_v37  ;;  %2533 = vmatprep.subr.bf16.mxu0 %v5068_v38  ;;  %v5956_v37 = vcombine.low %v397_v10, %v401_v13  ;;  %v5958_v38 = vcombine.low %v398_v16, %v402_v17  ;;  %v5128_v10 = vld [vmem:[#allocation5 + $0x524] ss:$16 sps:$4 sm:$0xff]   ;;  %v5126_v16 = vld [vmem:[#allocation5 + $0x520] ss:$16 sps:$4 sm:$0xff]  }
  0xc9   : > { %2646 = vmatprep.subr.bf16.mxu1 %v5071_v39  ;;  %v409_v39 = vld [vmem:[%s5851_s17 + $0x1a0] sm:$0xff] }
  0xca   : > { %2352 = vmatmul.mubr.bf16.gmra.mxu0 %v5909_v44  ;;  %v5963_v46 = vcombine.high %v405_v36, %v409_v39  ;;  %v5973_v60 = vcombine.low %v405_v36, %v409_v39  ;;  %v5131_v13 = vld [vmem:[#allocation5 + $0x724] ss:$16 sps:$4 sm:$0xff]   ;;  %v5129_v17 = vld [vmem:[#allocation5 + $0x720] ss:$16 sps:$4 sm:$0xff]  }
  0xcb   : > { %2465 = vmatmul.mubr.bf16.gmra.mxu1 %v5911_v45  ;;  %2534 = vmatpush1.bf16.msra.mxu0 %v5066_v40  ;;  %v406_v40 = vld [vmem:[%s5851_s17 + $0x188] sm:$0xff]  ;;  %v5132_v36 = vld [vmem:[#allocation5 + $0x500] ss:$16 sps:$4 sm:$0xff]  }
  0xcc   : > { %2647 = vmatpush1.bf16.msra.mxu1 %v5069_v41  ;;  %2535 = vmatprep.subr.bf16.mxu0 %v5074_v48  ;;  %v410_v41 = vld [vmem:[%s5851_s17 + $0x1a8] sm:$0xff]  ;;  %v5108_v48 = vld [vmem:[#allocation5 + $0x580] ss:$16 sps:$4 sm:$0xff]  }
  0xcd   : > { %2648 = vmatprep.subr.bf16.mxu1 %v5077_v49  ;;  %2361 = vmatprep.mubr.bf16.mxu0 %v5915_v50  ;;  %v5965_v47 = vcombine.high %v406_v40, %v410_v41  ;;  %v5111_v49 = vld [vmem:[#allocation5 + $0x780] ss:$16 sps:$4 sm:$0xff]   ;;  %v5975_v63 = vcombine.low %v406_v40, %v410_v41  ;;  %v5140_v40 = vld [vmem:[#allocation5 + $0xec] ss:$16 sps:$4 sm:$0xff]  }
  0xce   : > { %2474 = vmatprep.mubr.bf16.mxu1 %v5917_v51  ;;  %v5135_v39 = vld [vmem:[#allocation5 + $0x700] ss:$16 sps:$4 sm:$0xff]   ;;  %v5143_v41 = vld [vmem:[#allocation5 + $0x2ec] ss:$16 sps:$4 sm:$0xff]  }
  0xcf   : > { %2536 = vmatpush1.bf16.msra.mxu0 %v5072_v52  ;;  %v5116_v52 = vld [vmem:[#allocation5 + $0x564] ss:$16 sps:$4 sm:$0xff]  }
  0xd0   : > { %2649 = vmatpush1.bf16.msra.mxu1 %v5075_v54  ;;  %2537 = vmatprep.subr.bf16.mxu0 %v5080_v56  ;;  %v5119_v54 = vld [vmem:[#allocation5 + $0x764] ss:$16 sps:$4 sm:$0xff]   ;;  %v5114_v56 = vld [vmem:[#allocation5 + $0x560] ss:$16 sps:$4 sm:$0xff]  }
  0xd1   : > { %2650 = vmatprep.subr.bf16.mxu1 %v5083_v57  ;;  %v5117_v57 = vld [vmem:[#allocation5 + $0x760] ss:$16 sps:$4 sm:$0xff]  }
  0xd2   : > { %2362 = vmatmul.mubr.bf16.gmra.mxu0 %v5925_v61 }
  0xd3   : > { %2475 = vmatmul.mubr.bf16.gmra.mxu1 %v5927_v62  ;;  %2538 = vmatpush1.bf16.msra.mxu0 %v5078_v58  ;;  %v413_v58 = vld [vmem:[%s5851_s17 + $0x1c0] sm:$0xff] }
  0xd4   : > { %2651 = vmatpush1.bf16.msra.mxu1 %v5081_v1  ;;  %2539 = vmatprep.subr.bf16.mxu0 %v5086_v2  ;;  %v418_v1 = vld [vmem:[%s5851_s17 + $0x1e8] sm:$0xff]  ;;  %v5122_v2 = vld [vmem:[#allocation5 + $0x544] ss:$16 sps:$4 sm:$0xff]  }
  0xd5   : > { %2652 = vmatprep.subr.bf16.mxu1 %v5089_v3  ;;  %2371 = vmatprep.mubr.bf16.mxu0 %v5931_v4  ;;  %v5125_v3 = vld [vmem:[#allocation5 + $0x744] ss:$16 sps:$4 sm:$0xff]  }
  0xd6   : > { %2484 = vmatprep.mubr.bf16.mxu1 %v5933_v5 }
  0xd7   : > { %2540 = vmatpush1.bf16.msra.mxu0 %v5084_v6  ;;  %v5979_v6 = vcombine.high %v413_v58, %v417_v59 }
  0xd8   : > { %2653 = vmatpush1.bf16.msra.mxu1 %v5087_v7  ;;  %2541 = vmatprep.subr.bf16.mxu0 %v5092_v8  ;;  %v5981_v7 = vcombine.high %v414_v0, %v418_v1  ;;  %v5120_v8 = vld [vmem:[#allocation5 + $0x540] ss:$16 sps:$4 sm:$0xff]  }
  0xd9   : > { %2654 = vmatprep.subr.bf16.mxu1 %v5095_v9  ;;  %v5123_v9 = vld [vmem:[#allocation5 + $0x740] ss:$16 sps:$4 sm:$0xff]  }
  0xda   : > { %2372 = vmatmul.mubr.bf16.gmra.mxu0 %v5941_v14 }
  0xdb   : > { %2485 = vmatmul.mubr.bf16.gmra.mxu1 %v5943_v15  ;;  %2542 = vmatpush2.bf16.msra.mxu0 %v5090_v20  ;;  %v359_v20 = vld [vmem:[%s5851_s17 + $0x10] sm:$0xff] }
  0xdc   : > { %2655 = vmatpush2.bf16.msra.mxu1 %v5093_v21  ;;  %2543 = vmatprep.subr.bf16.mxu0 %v5098_v22  ;;  %v363_v21 = vld [vmem:[%s5851_s17 + $0x30] sm:$0xff]  ;;  %v5989_v22 = vcombine.low %v413_v58, %v417_v59  ;;  %v5146_v58 = vld [vmem:[#allocation5 + $0xcc] ss:$16 sps:$4 sm:$0xff]  }
  0xdd   : > { %2656 = vmatprep.subr.bf16.mxu1 %v5101_v23  ;;  %2381 = vmatprep.mubr.bf16.mxu0 %v5947_v24  ;;  %v5991_v23 = vcombine.low %v414_v0, %v418_v1  ;;  %v5149_v59 = vld [vmem:[#allocation5 + $0x2cc] ss:$16 sps:$4 sm:$0xff]  }
  0xde   : > { %2494 = vmatprep.mubr.bf16.mxu1 %v5949_v25 }
  0xdf   : > { %2544 = vmatpush2.bf16.msra.mxu0 %v5096_v26  ;;  %v360_v26 = vld [vmem:[%s5851_s17 + $0x18] sm:$0xff] }
  0xe0   : > { %2657 = vmatpush2.bf16.msra.mxu1 %v5099_v27  ;;  %2545 = vmatprep.subr.bf16.mxu0 %v5104_v30  ;;  %v364_v27 = vld [vmem:[%s5851_s17 + $0x38] sm:$0xff]  ;;  %v5134_v30 = vld [vmem:[#allocation5 + $0x504] ss:$16 sps:$4 sm:$0xff]  }
  0xe1   : > { %2658 = vmatprep.subr.bf16.mxu1 %v5107_v31  ;;  %v5137_v31 = vld [vmem:[#allocation5 + $0x704] ss:$16 sps:$4 sm:$0xff]  }
  0xe2   : > { %2382 = vmatmul.mubr.bf16.gmra.mxu0 %v5956_v37 }
  0xe3   : > { %2495 = vmatmul.mubr.bf16.gmra.mxu1 %v5958_v38  ;;  %2546 = vmatpush2.bf16.msra.mxu0 %v5102_v32  ;;  %v5995_v32 = vcombine.high %v359_v20, %v363_v21 }
  0xe4   : > { %2659 = vmatpush2.bf16.msra.mxu1 %v5105_v33  ;;  %2547 = vmatprep.subr.bf16.mxu0 %v5110_v42  ;;  %v5997_v33 = vcombine.high %v360_v26, %v364_v27  ;;  %v5138_v42 = vld [vmem:[#allocation5 + $0xe8] ss:$16 sps:$4 sm:$0xff]  }
  0xe5   : > { %2660 = vmatprep.subr.bf16.mxu1 %v5113_v43  ;;  %2391 = vmatprep.mubr.bf16.mxu0 %v5963_v46  ;;  %v367_v43 = vld [vmem:[%s5851_s17 + $0x50] sm:$0xff] }
  0xe6   : > { %2504 = vmatprep.mubr.bf16.mxu1 %v5965_v47 }
  0xe7   : > { %2548 = vmatpush2.bf16.msra.mxu0 %v5108_v48  ;;  %v371_v48 = vld [vmem:[%s5851_s17 + $0x70] sm:$0xff] }
  0xe8   : > { %2661 = vmatpush2.bf16.msra.mxu1 %v5111_v49  ;;  %2549 = vmatprep.subr.bf16.mxu0 %v5116_v52  ;;  %v6005_v49 = vcombine.low %v359_v20, %v363_v21  ;;  %v6007_v52 = vcombine.low %v360_v26, %v364_v27  ;;  %v6011_v0 = vcombine.high %v367_v43, %v371_v48  ;;  %v376_v20 = vld [vmem:[%s5851_s17 + $0x98] sm:$0xff] }
  0xe9   : > { %2662 = vmatprep.subr.bf16.mxu1 %v5119_v54  ;;  %v368_v54 = vld [vmem:[%s5851_s17 + $0x58] sm:$0xff] }
  0xea   : > { %2392 = vmatmul.mubr.bf16.gmra.mxu0 %v5973_v60  ;;  %v380_v21 = vld [vmem:[%s5851_s17 + $0xb8] sm:$0xff] }
  0xeb   : > { %2505 = vmatmul.mubr.bf16.gmra.mxu1 %v5975_v63  ;;  %2550 = vmatpush2.bf16.msra.mxu0 %v5114_v56  ;;  %v372_v56 = vld [vmem:[%s5851_s17 + $0x78] sm:$0xff] }
  0xec   : > { %2663 = vmatpush2.bf16.msra.mxu1 %v5117_v57  ;;  %2551 = vmatprep.subr.bf16.mxu0 %v5122_v2  ;;  %v5141_v57 = vld [vmem:[#allocation5 + $0x2e8] ss:$16 sps:$4 sm:$0xff]   ;;  %v6013_v1 = vcombine.high %v368_v54, %v372_v56 }
  0xed   : > { %2664 = vmatprep.subr.bf16.mxu1 %v5125_v3  ;;  %2401 = vmatprep.mubr.bf16.mxu0 %v5979_v6  ;;  %v5144_v2 = vld [vmem:[#allocation5 + $0xc8] ss:$16 sps:$4 sm:$0xff]  }
  0xee   : > { %2514 = vmatprep.mubr.bf16.mxu1 %v5981_v7  ;;  %v5147_v3 = vld [vmem:[#allocation5 + $0x2c8] ss:$16 sps:$4 sm:$0xff]  }
  0xef   : > { %2552 = vmatpush2.bf16.msra.mxu0 %v5120_v8  ;;  %v5152_v8 = vld [vmem:[#allocation5 + $0xac] ss:$16 sps:$4 sm:$0xff]   ;;  %v5150_v26 = vld [vmem:[#allocation5 + $0xa8] ss:$16 sps:$4 sm:$0xff]  }
  0xf0   : > { %2665 = vmatpush2.bf16.msra.mxu1 %v5123_v9  ;;  %2553 = vmatprep.subr.bf16.mxu0 %v5128_v10  ;;  %v5155_v9 = vld [vmem:[#allocation5 + $0x2ac] ss:$16 sps:$4 sm:$0xff]   ;;  %v375_v10 = vld [vmem:[%s5851_s17 + $0x90] sm:$0xff]  ;;  %v5153_v27 = vld [vmem:[#allocation5 + $0x2a8] ss:$16 sps:$4 sm:$0xff]  }
  0xf1   : > { %2666 = vmatprep.subr.bf16.mxu1 %v5131_v13  ;;  %v379_v13 = vld [vmem:[%s5851_s17 + $0xb0] sm:$0xff] }
  0xf2   : > { %2402 = vmatmul.mubr.bf16.gmra.mxu0 %v5989_v22 }
  0xf3   : > { %2515 = vmatmul.mubr.bf16.gmra.mxu1 %v5991_v23  ;;  %2554 = vmatpush2.bf16.msra.mxu0 %v5126_v16  ;;  %v6021_v16 = vcombine.low %v367_v43, %v371_v48  ;;  %v5167_v43 = vld [vmem:[#allocation5 + $0x26c] ss:$16 sps:$4 sm:$0xff]   ;;  %v5162_v48 = vld [vmem:[#allocation5 + $0x68] ss:$16 sps:$4 sm:$0xff]  }
  0xf4   : > { %2667 = vmatpush2.bf16.msra.mxu1 %v5129_v17  ;;  %2555 = vmatprep.subr.bf16.mxu0 %v5134_v30  ;;  %v6023_v17 = vcombine.low %v368_v54, %v372_v56  ;;  %v5158_v30 = vld [vmem:[#allocation5 + $0x8c] ss:$16 sps:$4 sm:$0xff]   ;;  %v5165_v54 = vld [vmem:[#allocation5 + $0x268] ss:$16 sps:$4 sm:$0xff]   ;;  %v383_v56 = vld [vmem:[%s5851_s17 + $0xd0] sm:$0xff] }
  0xf5   : > { %2668 = vmatprep.subr.bf16.mxu1 %v5137_v31  ;;  %2557 = vmatprep.mubr.bf16.mxu0 %v5995_v32  ;;  %v5161_v31 = vld [vmem:[#allocation5 + $0x28c] ss:$16 sps:$4 sm:$0xff]  }
  0xf6   : > { %2670 = vmatprep.mubr.bf16.mxu1 %v5997_v33 }
  0xf7   : > { %2556 = vmatpush2.bf16.msra.mxu0 %v5132_v36  ;;  %v6027_v36 = vcombine.high %v375_v10, %v379_v13 }
  0xf8   : > { %2669 = vmatpush2.bf16.msra.mxu1 %v5135_v39  ;;  %2751 = vmatprep.subr.bf16.mxu0 %v5140_v40  ;;  %v6029_v39 = vcombine.high %v376_v20, %v380_v21  ;;  %v5156_v40 = vld [vmem:[#allocation5 + $0x88] ss:$16 sps:$4 sm:$0xff]  }
  0xf9   : > { %2864 = vmatprep.subr.bf16.mxu1 %v5143_v41  ;;  %v5159_v41 = vld [vmem:[#allocation5 + $0x288] ss:$16 sps:$4 sm:$0xff]  }
  0xfa   : > { %2558 = vmatmul.mubr.bf16.vlgmr.msra.gmra.mxu0 %v6005_v49 }
  0xfb   : > { %2671 = vmatmul.mubr.bf16.vlgmr.msra.gmra.mxu1 %v6007_v52  ;;  %2752 = vmatpush1.bf16.msra.mxu0 %v5138_v42  ;;  %v5164_v42 = vld [vmem:[#allocation5 + $0x6c] ss:$16 sps:$4 sm:$0xff]  }
  0xfc   : > { %2865 = vmatpush1.bf16.msra.mxu1 %v5141_v57  ;;  %2753 = vmatprep.subr.bf16.mxu0 %v5146_v58  ;;  %v6036_v57 = vcombine.low %v375_v10, %v379_v13  ;;  %v6038_v58 = vcombine.low %v376_v20, %v380_v21  ;;  %v5168_v10 = vld [vmem:[#allocation5 + $0x48] ss:$16 sps:$4 sm:$0xff]   ;;  %v5176_v20 = vld [vmem:[#allocation5 + $0x2c] ss:$16 sps:$4 sm:$0xff]  }
  0xfd   : > { %2866 = vmatprep.subr.bf16.mxu1 %v5149_v59  ;;  %2567 = vmatprep.mubr.bf16.mxu0 %v6011_v0  ;;  %v387_v59 = vld [vmem:[%s5851_s17 + $0xf0] sm:$0xff]  ;;  %v5171_v13 = vld [vmem:[#allocation5 + $0x248] ss:$16 sps:$4 sm:$0xff]   ;;  %v5179_v21 = vld [vmem:[#allocation5 + $0x22c] ss:$16 sps:$4 sm:$0xff]  }
  0xfe   : > { %2680 = vmatprep.mubr.bf16.mxu1 %v6013_v1  ;;  %6773 = vst [vmem:[#allocation16_spill] sm:$0xff] %v6036_v57  ;;  %6774 = vst [vmem:[#allocation17_spill] sm:$0xff] %v6038_v58 }
  0xff   : > { %2754 = vmatpush1.bf16.msra.mxu0 %v5144_v2  ;;  %v384_v2 = vld [vmem:[%s5851_s17 + $0xd8] sm:$0xff] }
 0x100   : > { %2867 = vmatpush1.bf16.msra.mxu1 %v5147_v3  ;;  %2755 = vmatprep.subr.bf16.mxu0 %v5152_v8  ;;  %v388_v3 = vld [vmem:[%s5851_s17 + $0xf8] sm:$0xff] }
 0x101   : > { %2868 = vmatprep.subr.bf16.mxu1 %v5155_v9  ;;  %v5170_v8 = vld [vmem:[#allocation5 + $0x4c] ss:$16 sps:$4 sm:$0xff]  }
 0x102   : > { %2568 = vmatmul.mubr.bf16.gmra.mxu0 %v6021_v16  ;;  %v5173_v9 = vld [vmem:[#allocation5 + $0x24c] ss:$16 sps:$4 sm:$0xff]  }
 0x103   : > { %2681 = vmatmul.mubr.bf16.gmra.mxu1 %v6023_v17  ;;  %2756 = vmatpush1.bf16.msra.mxu0 %v5150_v26  ;;  %v6043_v26 = vcombine.high %v383_v56, %v387_v59 }
 0x104   : > { %2869 = vmatpush1.bf16.msra.mxu1 %v5153_v27  ;;  %2757 = vmatprep.subr.bf16.mxu0 %v5158_v30  ;;  %v6045_v27 = vcombine.high %v384_v2, %v388_v3  ;;  %v5174_v30 = vld [vmem:[#allocation5 + $0x28] ss:$16 sps:$4 sm:$0xff]  }
 0x105   : > { %2870 = vmatprep.subr.bf16.mxu1 %v5161_v31  ;;  %2577 = vmatprep.mubr.bf16.mxu0 %v6027_v36  ;;  %6775 = vst [vmem:[#allocation18_spill] sm:$0xff] %v6043_v26  ;;  %v5177_v31 = vld [vmem:[#allocation5 + $0x228] ss:$16 sps:$4 sm:$0xff]  }
 0x106   : > { %2690 = vmatprep.mubr.bf16.mxu1 %v6029_v39  ;;  %6776 = vst [vmem:[#allocation19_spill] sm:$0xff] %v6045_v27 }
 0x107   : > { %2758 = vmatpush1.bf16.msra.mxu0 %v5156_v40  ;;  %v391_v40 = vld [vmem:[%s5851_s17 + $0x110] sm:$0xff] }
 0x108   : > { %2871 = vmatpush1.bf16.msra.mxu1 %v5159_v41  ;;  %2759 = vmatprep.subr.bf16.mxu0 %v5164_v42  ;;  %v395_v41 = vld [vmem:[%s5851_s17 + $0x130] sm:$0xff]  ;;  %v6053_v42 = vcombine.low %v383_v56, %v387_v59  ;;  %v5180_v56 = vld [vmem:[#allocation5 + $0x8] ss:$16 sps:$4 sm:$0xff]  }
 0x109   : > { %2872 = vmatprep.subr.bf16.mxu1 %v5167_v43  ;;  %v6055_v43 = vcombine.low %v384_v2, %v388_v3  ;;  %v5183_v59 = vld [vmem:[#allocation5 + $0x208] ss:$16 sps:$4 sm:$0xff]   ;;  %v5188_v2 = vld [vmem:[#allocation5 + $0x1ec] ss:$16 sps:$4 sm:$0xff]  }
 0x10a   : > { %2578 = vmatmul.mubr.bf16.gmra.mxu0 %v6036_v57  ;;  %6777 = vst [vmem:[#allocation20_spill] sm:$0xff] %v6053_v42  ;;  %v396_v57 = vld [vmem:[%s5851_s17 + $0x138] sm:$0xff] }
 0x10b   : > { %2691 = vmatmul.mubr.bf16.gmra.mxu1 %v6038_v58  ;;  %2760 = vmatpush1.bf16.msra.mxu0 %v5162_v48  ;;  %6778 = vst [vmem:[#allocation21_spill] sm:$0xff] %v6055_v43  ;;  %v392_v58 = vld [vmem:[%s5851_s17 + $0x118] sm:$0xff] }
 0x10c   : > { %2873 = vmatpush1.bf16.msra.mxu1 %v5165_v54  ;;  %2761 = vmatprep.subr.bf16.mxu0 %v5170_v8  ;;  %v5182_v48 = vld [vmem:[#allocation5 + $0xc] ss:$16 sps:$4 sm:$0xff]   ;;  %v6059_v8 = vcombine.high %v391_v40, %v395_v41 }
 0x10d   : > { %2874 = vmatprep.subr.bf16.mxu1 %v5173_v9  ;;  %2587 = vmatprep.mubr.bf16.mxu0 %v6043_v26  ;;  %v5185_v54 = vld [vmem:[#allocation5 + $0x20c] ss:$16 sps:$4 sm:$0xff]   ;;  %v6061_v9 = vcombine.high %v392_v58, %v396_v57 }
 0x10e   : > { %2700 = vmatprep.mubr.bf16.mxu1 %v6045_v27  ;;  %6779 = vst [vmem:[#allocation22_spill] sm:$0xff] %v6059_v8  ;;  %v5191_v3 = vld [vmem:[#allocation5 + $0x3ec] ss:$16 sps:$4 sm:$0xff]  }
 0x10f   : > { %2762 = vmatpush1.bf16.msra.mxu0 %v5168_v10  ;;  %6780 = vst [vmem:[#allocation23_spill] sm:$0xff] %v6061_v9  ;;  %v5186_v10 = vld [vmem:[#allocation5 + $0x1e8] ss:$16 sps:$4 sm:$0xff]  }
 0x110   : > { %2875 = vmatpush1.bf16.msra.mxu1 %v5171_v13  ;;  %2763 = vmatprep.subr.bf16.mxu0 %v5176_v20  ;;  %v5189_v13 = vld [vmem:[#allocation5 + $0x3e8] ss:$16 sps:$4 sm:$0xff]   ;;  %v399_v20 = vld [vmem:[%s5851_s17 + $0x150] sm:$0xff] }
 0x111   : > { %2876 = vmatprep.subr.bf16.mxu1 %v5179_v21  ;;  %v403_v21 = vld [vmem:[%s5851_s17 + $0x170] sm:$0xff]  ;;  %v400_v27 = vld [vmem:[%s5851_s17 + $0x158] sm:$0xff] }
 0x112   : > { %2588 = vmatmul.mubr.bf16.gmra.mxu0 %v6053_v42  ;;  %v6069_v42 = vcombine.low %v391_v40, %v395_v41  ;;  %v404_v26 = vld [vmem:[%s5851_s17 + $0x178] sm:$0xff] }
 0x113   : > { %2701 = vmatmul.mubr.bf16.gmra.mxu1 %v6055_v43  ;;  %2764 = vmatpush1.bf16.msra.mxu0 %v5174_v30  ;;  %v6071_v43 = vcombine.low %v392_v58, %v396_v57  ;;  %v5194_v30 = vld [vmem:[#allocation5 + $0x1cc] ss:$16 sps:$4 sm:$0xff]   ;;  %v5192_v57 = vld [vmem:[#allocation5 + $0x1c8] ss:$16 sps:$4 sm:$0xff]  }
 0x114   : > { %2877 = vmatpush1.bf16.msra.mxu1 %v5177_v31  ;;  %2765 = vmatprep.subr.bf16.mxu0 %v5182_v48  ;;  %6781 = vst [vmem:[#allocation24_spill] sm:$0xff] %v6069_v42  ;;  %v5197_v31 = vld [vmem:[#allocation5 + $0x3cc] ss:$16 sps:$4 sm:$0xff]   ;;  %v6075_v48 = vcombine.high %v399_v20, %v403_v21  ;;  %v5195_v58 = vld [vmem:[#allocation5 + $0x3c8] ss:$16 sps:$4 sm:$0xff]  }
 0x115   : > { %2878 = vmatprep.subr.bf16.mxu1 %v5185_v54  ;;  %2597 = vmatprep.mubr.bf16.mxu0 %v6059_v8  ;;  %6782 = vst [vmem:[#allocation25_spill] sm:$0xff] %v6071_v43  ;;  %v6077_v54 = vcombine.high %v400_v27, %v404_v26  ;;  %v5200_v40 = vld [vmem:[#allocation5 + $0x1ac] ss:$16 sps:$4 sm:$0xff]  }
 0x116   : > { %2710 = vmatprep.mubr.bf16.mxu1 %v6061_v9  ;;  %6783 = vst [vmem:[#allocation26_spill] sm:$0xff] %v6075_v48  ;;  %v5203_v41 = vld [vmem:[#allocation5 + $0x3ac] ss:$16 sps:$4 sm:$0xff]  }
 0x117   : > { %2766 = vmatpush1.bf16.msra.mxu0 %v5180_v56  ;;  %6784 = vst [vmem:[#allocation27_spill] sm:$0xff] %v6077_v54  ;;  %v5198_v56 = vld [vmem:[#allocation5 + $0x1a8] ss:$16 sps:$4 sm:$0xff]  }
 0x118   : > { %2879 = vmatpush1.bf16.msra.mxu1 %v5183_v59  ;;  %2767 = vmatprep.subr.bf16.mxu0 %v5188_v2  ;;  %v5201_v59 = vld [vmem:[#allocation5 + $0x3a8] ss:$16 sps:$4 sm:$0xff]   ;;  %v407_v2 = vld [vmem:[%s5851_s17 + $0x190] sm:$0xff] }
 0x119   : > { %2880 = vmatprep.subr.bf16.mxu1 %v5191_v3  ;;  %v411_v3 = vld [vmem:[%s5851_s17 + $0x1b0] sm:$0xff]  ;;  %v408_v9 = vld [vmem:[%s5851_s17 + $0x198] sm:$0xff] }
 0x11a   : > { %2598 = vmatmul.mubr.bf16.gmra.mxu0 %v6069_v42  ;;  %v6085_v42 = vcombine.low %v399_v20, %v403_v21  ;;  %v412_v8 = vld [vmem:[%s5851_s17 + $0x1b8] sm:$0xff] }
 0x11b   : > { %2711 = vmatmul.mubr.bf16.gmra.mxu1 %v6071_v43  ;;  %2768 = vmatpush2.bf16.msra.mxu0 %v5186_v10  ;;  %v6087_v43 = vcombine.low %v400_v27, %v404_v26  ;;  %v5206_v10 = vld [vmem:[#allocation5 + $0x18c] ss:$16 sps:$4 sm:$0xff]   ;;  %v5204_v26 = vld [vmem:[#allocation5 + $0x188] ss:$16 sps:$4 sm:$0xff]  }
 0x11c   : > { %2881 = vmatpush2.bf16.msra.mxu1 %v5189_v13  ;;  %2769 = vmatprep.subr.bf16.mxu0 %v5194_v30  ;;  %6785 = vst [vmem:[#allocation28_spill] sm:$0xff] %v6085_v42  ;;  %v5209_v13 = vld [vmem:[#allocation5 + $0x38c] ss:$16 sps:$4 sm:$0xff]   ;;  %v6091_v30 = vcombine.high %v407_v2, %v411_v3  ;;  %v5207_v27 = vld [vmem:[#allocation5 + $0x388] ss:$16 sps:$4 sm:$0xff]  }
 0x11d   : > { %2882 = vmatprep.subr.bf16.mxu1 %v5197_v31  ;;  %2607 = vmatprep.mubr.bf16.mxu0 %v6075_v48  ;;  %6786 = vst [vmem:[#allocation29_spill] sm:$0xff] %v6087_v43  ;;  %v6093_v31 = vcombine.high %v408_v9, %v412_v8  ;;  %v5212_v20 = vld [vmem:[#allocation5 + $0x16c] ss:$16 sps:$4 sm:$0xff]  }
 0x11e   : > { %2720 = vmatprep.mubr.bf16.mxu1 %v6077_v54  ;;  %v5215_v21 = vld [vmem:[#allocation5 + $0x36c] ss:$16 sps:$4 sm:$0xff]  }
 0x11f   : > { %2770 = vmatpush2.bf16.msra.mxu0 %v5192_v57  ;;  %v5210_v57 = vld [vmem:[#allocation5 + $0x168] ss:$16 sps:$4 sm:$0xff]  }
 0x120   : > { %2883 = vmatpush2.bf16.msra.mxu1 %v5195_v58  ;;  %2771 = vmatprep.subr.bf16.mxu0 %v5200_v40  ;;  %v5213_v58 = vld [vmem:[#allocation5 + $0x368] ss:$16 sps:$4 sm:$0xff]   ;;  %v415_v40 = vld [vmem:[%s5851_s17 + $0x1d0] sm:$0xff] }
 0x121   : > { %2884 = vmatprep.subr.bf16.mxu1 %v5203_v41  ;;  %v419_v41 = vld [vmem:[%s5851_s17 + $0x1f0] sm:$0xff]  ;;  %v416_v54 = vld [vmem:[%s5851_s17 + $0x1d8] sm:$0xff] }
 0x122   : > { %2608 = vmatmul.mubr.bf16.gmra.mxu0 %v6085_v42  ;;  %v6101_v42 = vcombine.low %v407_v2, %v411_v3  ;;  %v420_v48 = vld [vmem:[%s5851_s17 + $0x1f8] sm:$0xff]  ;;  %s5578_s17 = sshll.u32 %s5661_s28, 4  ;;  %s5579_s17 = int_to_ptr.vmem [resolvable:$false] %s5578_s17 }
 0x123   : > { %2721 = vmatmul.mubr.bf16.gmra.mxu1 %v6087_v43  ;;  %2772 = vmatpush2.bf16.msra.mxu0 %v5198_v56  ;;  %v6103_v43 = vcombine.low %v408_v9, %v412_v8  ;;  %v5218_v56 = vld [vmem:[#allocation5 + $0x14c] ss:$16 sps:$4 sm:$0xff]   ;;  %v5216_v2 = vld [vmem:[#allocation5 + $0x148] ss:$16 sps:$4 sm:$0xff]   ;;  %s5580_s30 = scalar_lea.vmem %s5579_s17, 4096  ;;  %p5581_p3 = scmp.lt.s32.totalorder %s6679_s19, %s5579_s17 }
 0x124   : > { %2885 = vmatpush2.bf16.msra.mxu1 %v5201_v59  ;;  %2773 = vmatprep.subr.bf16.mxu0 %v5206_v10  ;;  %v5221_v59 = vld [vmem:[#allocation5 + $0x34c] ss:$16 sps:$4 sm:$0xff]   ;;  %v6107_v10 = vcombine.high %v415_v40, %v419_v41  ;;  %v5219_v3 = vld [vmem:[#allocation5 + $0x348] ss:$16 sps:$4 sm:$0xff]   ;;  %p5582_p9 = scmp.lt.s32.totalorder %s5580_s30, %s5574_s14 }
 0x125   : > { %2886 = vmatprep.subr.bf16.mxu1 %v5209_v13  ;;  %2617 = vmatprep.mubr.bf16.mxu0 %v6091_v30  ;;  %6787 = vst [vmem:[#allocation30_spill] sm:$0xff] %v6103_v43  ;;  %v6109_v13 = vcombine.high %v416_v54, %v420_v48  ;;  %v5224_v8 = vld [vmem:[#allocation5 + $0x12c] ss:$16 sps:$4 sm:$0xff]  }
 0x126   : > { %2730 = vmatprep.mubr.bf16.mxu1 %v6093_v31  ;;  %v5227_v9 = vld [vmem:[#allocation5 + $0x32c] ss:$16 sps:$4 sm:$0xff]   ;;  %p5583_p13 = por %p5582_p9, %p5581_p3 }
 0x127   : > { %2774 = vmatpush2.bf16.msra.mxu0 %v5204_v26  ;;  %v6115_v26 = vcombine.low %v415_v40, %v419_v41  ;;  %v5236_v40 = vld [vmem:[#allocation5 + $0x4ec] ss:$16 sps:$4 sm:$0xff]   ;;  %v5237_v41 = vld [vmem:[#allocation5 + $0x6e8] ss:$16 sps:$4 sm:$0xff]  }
 0x128   : > { %2887 = vmatpush2.bf16.msra.mxu1 %v5207_v27  ;;  %2775 = vmatprep.subr.bf16.mxu0 %v5212_v20  ;;  %v6117_v27 = vcombine.low %v416_v54, %v420_v48  ;;  %v5222_v20 = vld [vmem:[#allocation5 + $0x128] ss:$16 sps:$4 sm:$0xff]   ;;  %v5239_v48 = vld [vmem:[#allocation5 + $0x6ec] ss:$16 sps:$4 sm:$0xff]   ;;  %p5584_p5 = pnand %p5583_p13, %p5577_p6 }
 0x129   : > { %2888 = vmatprep.subr.bf16.mxu1 %v5215_v21  ;;  %v5225_v21 = vld [vmem:[#allocation5 + $0x328] ss:$16 sps:$4 sm:$0xff]  }
 0x12a   : > { %2618 = vmatmul.mubr.bf16.gmra.mxu0 %v6101_v42  ;;  %v5234_v54 = vld [vmem:[#allocation5 + $0x4e8] ss:$16 sps:$4 sm:$0xff]  }
 0x12b   : > { %2731 = vmatmul.mubr.bf16.gmra.mxu1 %v6103_v43  ;;  %2776 = vmatpush2.bf16.msra.mxu0 %v5210_v57  ;;  %v5230_v43 = vld [vmem:[#allocation5 + $0x10c] ss:$16 sps:$4 sm:$0xff]  }
 0x12c   : > { %2889 = vmatpush2.bf16.msra.mxu1 %v5213_v58  ;;  %2777 = vmatprep.subr.bf16.mxu0 %v5218_v56  ;;  %v5233_v57 = vld [vmem:[#allocation5 + $0x30c] ss:$16 sps:$4 sm:$0xff]   ;;  %v5228_v58 = vld [vmem:[#allocation5 + $0x108] ss:$16 sps:$4 sm:$0xff]  }
 0x12d   : > { %2890 = vmatprep.subr.bf16.mxu1 %v5221_v59  ;;  %2627 = vmatprep.mubr.bf16.mxu0 %v6107_v10  ;;  %v5231_v56 = vld [vmem:[#allocation5 + $0x308] ss:$16 sps:$4 sm:$0xff]   ;;  %v5242_v59 = vld [vmem:[#allocation5 + $0x4cc] ss:$16 sps:$4 sm:$0xff]  }
 0x12e   : > { %2740 = vmatprep.mubr.bf16.mxu1 %v6109_v13 }
 0x12f   : > { %2778 = vmatpush2.bf16.msra.mxu0 %v5216_v2  ;;  %v5245_v2 = vld [vmem:[#allocation5 + $0x6cc] ss:$16 sps:$4 sm:$0xff]  }
 0x130   : > { %2891 = vmatpush2.bf16.msra.mxu1 %v5219_v3  ;;  %2779 = vmatprep.subr.bf16.mxu0 %v5224_v8  ;;  %v5240_v3 = vld [vmem:[#allocation5 + $0x4c8] ss:$16 sps:$4 sm:$0xff]  }
 0x131   : > { %2892 = vmatprep.subr.bf16.mxu1 %v5227_v9  ;;  %v5246_v8 = vld [vmem:[#allocation5 + $0x4a8] ss:$16 sps:$4 sm:$0xff]  }
 0x132   : > { %2628 = vmatmul.mubr.bf16.gmra.mxu0 %v6115_v26  ;;  %v5249_v9 = vld [vmem:[#allocation5 + $0x6a8] ss:$16 sps:$4 sm:$0xff]  }
 0x133   : > { %2741 = vmatmul.mubr.bf16.gmra.mxu1 %v6117_v27  ;;  %2780 = vmatpush2.bf16.msra.mxu0 %v5222_v20  ;;  %v5252_v20 = vld [vmem:[#allocation5 + $0x488] ss:$16 sps:$4 sm:$0xff]  }
 0x134   : > { %2893 = vmatpush2.bf16.msra.mxu1 %v5225_v21  ;;  %2781 = vmatprep.subr.bf16.mxu0 %v5230_v43  ;;  %v5243_v43 = vld [vmem:[#allocation5 + $0x6c8] ss:$16 sps:$4 sm:$0xff]  }
 0x135   : > { %2894 = vmatprep.subr.bf16.mxu1 %v5233_v57  ;;  %2783 = vmatprep.mubr.bf16.mxu0 %v5869_v53  ;;  %v5248_v53 = vld [vmem:[#allocation5 + $0x4ac] ss:$16 sps:$4 sm:$0xff]   ;;  %v5255_v21 = vld [vmem:[#allocation5 + $0x688] ss:$16 sps:$4 sm:$0xff]  }
 0x136   : > { %2896 = vmatprep.mubr.bf16.mxu1 %v5871_v55  ;;  %v5251_v55 = vld [vmem:[#allocation5 + $0x6ac] ss:$16 sps:$4 sm:$0xff]   ;;  %v5258_v57 = vld [vmem:[#allocation5 + $0x468] ss:$16 sps:$4 sm:$0xff]  }
 0x137   : > { %2782 = vmatpush2.bf16.msra.mxu0 %v5228_v58  ;;  %v5261_v58 = vld [vmem:[#allocation5 + $0x668] ss:$16 sps:$4 sm:$0xff]  }
 0x138   : > { %2895 = vmatpush2.bf16.msra.mxu1 %v5231_v56  ;;  %2977 = vmatprep.subr.bf16.mxu0 %v5236_v40  ;;  %v5264_v56 = vld [vmem:[#allocation5 + $0x448] ss:$16 sps:$4 sm:$0xff]  }
 0x139   : > { %3090 = vmatprep.subr.bf16.mxu1 %v5239_v48  ;;  %v5267_v40 = vld [vmem:[#allocation5 + $0x648] ss:$16 sps:$4 sm:$0xff]  }
 0x13a   : > { %2784 = vmatmul.mubr.bf16.vlgmr.msra.gmra.mxu0 %v5876_v11  ;;  %v5254_v11 = vld [vmem:[#allocation5 + $0x48c] ss:$16 sps:$4 sm:$0xff]   ;;  %v5270_v48 = vld [vmem:[#allocation5 + $0x428] ss:$16 sps:$4 sm:$0xff]  }
 0x13b   : > { %2897 = vmatmul.mubr.bf16.vlgmr.msra.gmra.mxu1 %v5878_v12  ;;  %2978 = vmatpush1.bf16.msra.mxu0 %v5234_v54  ;;  %v5257_v12 = vld [vmem:[#allocation5 + $0x68c] ss:$16 sps:$4 sm:$0xff]   ;;  %v5273_v54 = vld [vmem:[#allocation5 + $0x628] ss:$16 sps:$4 sm:$0xff]  }
 0x13c   : > { %3091 = vmatpush1.bf16.msra.mxu1 %v5237_v41  ;;  %2979 = vmatprep.subr.bf16.mxu0 %v5242_v59  ;;  %v5278_v41 = vld [vmem:[#allocation5 + $0x40c] ss:$16 sps:$4 sm:$0xff]  }
 0x13d   : > { %3092 = vmatprep.subr.bf16.mxu1 %v5245_v2  ;;  %2793 = vmatprep.mubr.bf16.mxu0 %v5883_v18  ;;  %v5260_v18 = vld [vmem:[#allocation5 + $0x46c] ss:$16 sps:$4 sm:$0xff]  }
 0x13e   : > { %2906 = vmatprep.mubr.bf16.mxu1 %v5885_v19  ;;  %v5263_v19 = vld [vmem:[#allocation5 + $0x66c] ss:$16 sps:$4 sm:$0xff]  }
 0x13f   : > { %2980 = vmatpush1.bf16.msra.mxu0 %v5240_v3  ;;  %v5281_v59 = vld [vmem:[#allocation5 + $0x60c] ss:$16 sps:$4 sm:$0xff]  }
 0x140   : > { %3093 = vmatpush1.bf16.msra.mxu1 %v5243_v43  ;;  %2981 = vmatprep.subr.bf16.mxu0 %v5248_v53  ;;  %v5284_v2 = vld [vmem:[#allocation5 + $0x5ec] ss:$16 sps:$4 sm:$0xff]  }
 0x141   : > { %3094 = vmatprep.subr.bf16.mxu1 %v5251_v55  ;;  %v5287_v3 = vld [vmem:[#allocation5 + $0x7ec] ss:$16 sps:$4 sm:$0xff]  }
 0x142   : > { %2794 = vmatmul.mubr.bf16.gmra.mxu0 %v5893_v28  ;;  %v5266_v28 = vld [vmem:[#allocation5 + $0x44c] ss:$16 sps:$4 sm:$0xff]  }
 0x143   : > { %2907 = vmatmul.mubr.bf16.gmra.mxu1 %v5895_v29  ;;  %2982 = vmatpush1.bf16.msra.mxu0 %v5246_v8  ;;  %v5269_v29 = vld [vmem:[#allocation5 + $0x64c] ss:$16 sps:$4 sm:$0xff]  }
 0x144   : > { %3095 = vmatpush1.bf16.msra.mxu1 %v5249_v9  ;;  %2983 = vmatprep.subr.bf16.mxu0 %v5254_v11  ;;  %v5290_v43 = vld [vmem:[#allocation5 + $0x5cc] ss:$16 sps:$4 sm:$0xff]  }
 0x145   : > { %3096 = vmatprep.subr.bf16.mxu1 %v5257_v12  ;;  %2803 = vmatprep.mubr.bf16.mxu0 %v5899_v34  ;;  %v5272_v34 = vld [vmem:[#allocation5 + $0x42c] ss:$16 sps:$4 sm:$0xff]   ;;  %v5306_v12 = vld [vmem:[#allocation5 + $0x568] ss:$16 sps:$4 sm:$0xff]  }
 0x146   : > { %2916 = vmatprep.mubr.bf16.mxu1 %v5901_v35  ;;  %v5275_v35 = vld [vmem:[#allocation5 + $0x62c] ss:$16 sps:$4 sm:$0xff]  }
 0x147   : > { %2984 = vmatpush1.bf16.msra.mxu0 %v5252_v20  ;;  %v5293_v53 = vld [vmem:[#allocation5 + $0x7cc] ss:$16 sps:$4 sm:$0xff]   ;;  %v5309_v20 = vld [vmem:[#allocation5 + $0x768] ss:$16 sps:$4 sm:$0xff]  }
 0x148   : > { %3097 = vmatpush1.bf16.msra.mxu1 %v5255_v21  ;;  %2985 = vmatprep.subr.bf16.mxu0 %v5260_v18  ;;  %v5296_v55 = vld [vmem:[#allocation5 + $0x5ac] ss:$16 sps:$4 sm:$0xff]   ;;  %v5312_v21 = vld [vmem:[#allocation5 + $0x548] ss:$16 sps:$4 sm:$0xff]  }
 0x149   : > { %3098 = vmatprep.subr.bf16.mxu1 %v5263_v19  ;;  %v5299_v8 = vld [vmem:[#allocation5 + $0x7ac] ss:$16 sps:$4 sm:$0xff]   ;;  %v5315_v18 = vld [vmem:[#allocation5 + $0x748] ss:$16 sps:$4 sm:$0xff]   ;;  %v679_v19 = vlaneseq }
 0x14a   : > { %2804 = vmatmul.mubr.bf16.gmra.mxu0 %v5909_v44  ;;  %v5276_v44 = vld [vmem:[#allocation5 + $0x408] ss:$16 sps:$4 sm:$0xff]   ;;  %v5302_v9 = vld [vmem:[#allocation5 + $0x58c] ss:$16 sps:$4 sm:$0xff]  }
 0x14b   : > { %2917 = vmatmul.mubr.bf16.gmra.mxu1 %v5911_v45  ;;  %2986 = vmatpush1.bf16.msra.mxu0 %v5258_v57  ;;  %v5279_v45 = vld [vmem:[#allocation5 + $0x608] ss:$16 sps:$4 sm:$0xff]   ;;  %v5305_v11 = vld [vmem:[#allocation5 + $0x78c] ss:$16 sps:$4 sm:$0xff]  }
 0x14c   : > { %3099 = vmatpush1.bf16.msra.mxu1 %v5261_v58  ;;  %2987 = vmatprep.subr.bf16.mxu0 %v5266_v28  ;;  %v5318_v57 = vld [vmem:[#allocation5 + $0x528] ss:$16 sps:$4 sm:$0xff]   ;;  %v5329_v28 = vld [vmem:[#allocation5 + $0x70c] ss:$16 sps:$4 sm:$0xff]  }
 0x14d   : > { %3100 = vmatprep.subr.bf16.mxu1 %v5269_v29  ;;  %2813 = vmatprep.mubr.bf16.mxu0 %v5915_v50  ;;  %v5282_v50 = vld [vmem:[#allocation5 + $0x5e8] ss:$16 sps:$4 sm:$0xff]  }
 0x14e   : > { %2926 = vmatprep.mubr.bf16.mxu1 %v5917_v51  ;;  %v5285_v51 = vld [vmem:[#allocation5 + $0x7e8] ss:$16 sps:$4 sm:$0xff]  }
 0x14f   : > { %2988 = vmatpush1.bf16.msra.mxu0 %v5264_v56  ;;  %v5321_v58 = vld [vmem:[#allocation5 + $0x728] ss:$16 sps:$4 sm:$0xff]   ;;  %v6156_v56 = vld [vmem:[#allocation7] sm:$0xf] }
 0x150   : > { %3101 = vmatpush1.bf16.msra.mxu1 %v5267_v40  ;;  %2989 = vmatprep.subr.bf16.mxu0 %v5272_v34  ;;  %v5324_v29 = vld [vmem:[#allocation5 + $0x508] ss:$16 sps:$4 sm:$0xff]   ;;  %6789 = vst [vmem:[#allocation32_spill] sm:$0xff] %v6156_v56 }
 0x151   : > { %3102 = vmatprep.subr.bf16.mxu1 %v5275_v35  ;;  %v5332_v40 = vld [vmem:[#allocation8 + $0x74] ss:$8 sps:$4 sm:$0xff]  }
 0x152   : > { %2814 = vmatmul.mubr.bf16.gmra.mxu0 %v5925_v61  ;;  %v5288_v61 = vld [vmem:[#allocation5 + $0x5c8] ss:$16 sps:$4 sm:$0xff]  }
 0x153   : > { %2927 = vmatmul.mubr.bf16.gmra.mxu1 %v5927_v62  ;;  %2990 = vmatpush1.bf16.msra.mxu0 %v5270_v48  ;;  %v5291_v62 = vld [vmem:[#allocation5 + $0x7c8] ss:$16 sps:$4 sm:$0xff]  }
 0x154   : > { %3103 = vmatpush1.bf16.msra.mxu1 %v5273_v54  ;;  %2991 = vmatprep.subr.bf16.mxu0 %v5278_v41  ;;  %v5335_v48 = vld [vmem:[#allocation8 + $0x64] ss:$8 sps:$4 sm:$0xff]  }
 0x155   : > { %3104 = vmatprep.subr.bf16.mxu1 %v5281_v59  ;;  %2823 = vmatprep.mubr.bf16.mxu0 %v5931_v4  ;;  %v5294_v4 = vld [vmem:[#allocation5 + $0x5a8] ss:$16 sps:$4 sm:$0xff]  }
 0x156   : > { %2936 = vmatprep.mubr.bf16.mxu1 %v5933_v5  ;;  %v5297_v5 = vld [vmem:[#allocation5 + $0x7a8] ss:$16 sps:$4 sm:$0xff]  }
 0x157   : > { %2992 = vmatpush1.bf16.msra.mxu0 %v5276_v44  ;;  %v5333_v44 = vld [vmem:[#allocation8 + $0x60] ss:$8 sps:$4 sm:$0xff]  }
 0x158   : > { %3105 = vmatpush1.bf16.msra.mxu1 %v5279_v45  ;;  %2993 = vmatprep.subr.bf16.mxu0 %v5284_v2 }
 0x159   : > { %3106 = vmatprep.subr.bf16.mxu1 %v5287_v3  ;;  %v5338_v3 = vld [vmem:[#allocation8 + $0x54] ss:$8 sps:$4 sm:$0xff]  }
 0x15a   : > { %2824 = vmatmul.mubr.bf16.gmra.mxu0 %v5941_v14  ;;  %v5300_v14 = vld [vmem:[#allocation5 + $0x588] ss:$16 sps:$4 sm:$0xff]  }
 0x15b   : > { %2937 = vmatmul.mubr.bf16.gmra.mxu1 %v5943_v15  ;;  %2994 = vmatpush2.bf16.msra.mxu0 %v5282_v50  ;;  %v5303_v15 = vld [vmem:[#allocation5 + $0x788] ss:$16 sps:$4 sm:$0xff]  }
 0x15c   : > { %3107 = vmatpush2.bf16.msra.mxu1 %v5285_v51  ;;  %2995 = vmatprep.subr.bf16.mxu0 %v5290_v43  ;;  %v5341_v43 = vld [vmem:[#allocation8 + $0x44] ss:$8 sps:$4 sm:$0xff]  }
 0x15d   : > { %3108 = vmatprep.subr.bf16.mxu1 %v5293_v53  ;;  %2833 = vmatprep.mubr.bf16.mxu0 %v5947_v24  ;;  %v5308_v24 = vld [vmem:[#allocation5 + $0x56c] ss:$16 sps:$4 sm:$0xff]  }
 0x15e   : > { %2946 = vmatprep.mubr.bf16.mxu1 %v5949_v25  ;;  %v5311_v25 = vld [vmem:[#allocation5 + $0x76c] ss:$16 sps:$4 sm:$0xff]  }
 0x15f   : > { %2996 = vmatpush2.bf16.msra.mxu0 %v5288_v61 }
 0x160   : > { %3109 = vmatpush2.bf16.msra.mxu1 %v5291_v62  ;;  %2997 = vmatprep.subr.bf16.mxu0 %v5296_v55 }
 0x161   : > { %3110 = vmatprep.subr.bf16.mxu1 %v5299_v8 }
 0x162   : > { %2834 = vmatmul.mubr.bf16.gmra.mxu0 %v5956_v37  ;;  %v5314_v37 = vld [vmem:[#allocation5 + $0x54c] ss:$16 sps:$4 sm:$0xff]  }
 0x163   : > { %2947 = vmatmul.mubr.bf16.gmra.mxu1 %v5958_v38  ;;  %2998 = vmatpush2.bf16.msra.mxu0 %v5294_v4  ;;  %v5317_v38 = vld [vmem:[#allocation5 + $0x74c] ss:$16 sps:$4 sm:$0xff]  }
 0x164   : > { %3111 = vmatpush2.bf16.msra.mxu1 %v5297_v5  ;;  %2999 = vmatprep.subr.bf16.mxu0 %v5302_v9  ;;  %v5339_v4 = vld [vmem:[#allocation8 + $0x40] ss:$8 sps:$4 sm:$0xff]  }
 0x165   : > { %3112 = vmatprep.subr.bf16.mxu1 %v5305_v11  ;;  %2843 = vmatprep.mubr.bf16.mxu0 %v5963_v46  ;;  %v5320_v46 = vld [vmem:[#allocation5 + $0x52c] ss:$16 sps:$4 sm:$0xff]   ;;  %v5344_v11 = vld [vmem:[#allocation8 + $0x34] ss:$8 sps:$4 sm:$0xff]  }
 0x166   : > { %2956 = vmatprep.mubr.bf16.mxu1 %v5965_v47  ;;  %v5323_v47 = vld [vmem:[#allocation5 + $0x72c] ss:$16 sps:$4 sm:$0xff]  }
 0x167   : > { %3000 = vmatpush2.bf16.msra.mxu0 %v5300_v14 }
 0x168   : > { %3113 = vmatpush2.bf16.msra.mxu1 %v5303_v15  ;;  %3001 = vmatprep.subr.bf16.mxu0 %v5308_v24  ;;  %v5380_v24 = vld [vmem:[#allocation8 + $0x174] ss:$8 sps:$4 sm:$0xff]  }
 0x169   : > { %3114 = vmatprep.subr.bf16.mxu1 %v5311_v25  ;;  %v5347_v25 = vld [vmem:[#allocation8 + $0x24] ss:$8 sps:$4 sm:$0xff]  }
 0x16a   : > { %2844 = vmatmul.mubr.bf16.gmra.mxu0 %v5973_v60  ;;  %v6151_v60 = vshrl.u32 %v679_v19, 7  ;;  %v6792_v19 = vld [vmem:[#allocation18_spill] sm:$0xff] }
 0x16b   : > { %2957 = vmatmul.mubr.bf16.gmra.mxu1 %v5975_v63  ;;  %3002 = vmatpush2.bf16.msra.mxu0 %v5306_v12  ;;  %v5326_v63 = vld [vmem:[#allocation5 + $0x50c] ss:$16 sps:$4 sm:$0xff]  }
 0x16c   : > { %3115 = vmatpush2.bf16.msra.mxu1 %v5309_v20  ;;  %3003 = vmatprep.subr.bf16.mxu0 %v5314_v37  ;;  %6788 = vst [vmem:[#allocation31_spill] sm:$0xff] %v6151_v60  ;;  %v6752_v34 = vsub.s32 1, %v6151_v60  ;;  %v5378_v12 = vld [vmem:[#allocation8 + $0x170] ss:$8 sps:$4 sm:$0xff]  }
 0x16d   : > { %3116 = vmatprep.subr.bf16.mxu1 %v5317_v38  ;;  %2853 = vmatprep.mubr.bf16.mxu0 %v5979_v6  ;;  %v5327_v6 = vld [vmem:[#allocation5 + $0x708] ss:$16 sps:$4 sm:$0xff]  }
 0x16e   : > { %2966 = vmatprep.mubr.bf16.mxu1 %v5981_v7  ;;  %v6751_v7 = vsub.s32 0, %v6151_v60  ;;  %v6169_v35 = vrot.slane %v6156_v56, %v6752_v34  ;;  %v6790_v38 = vld [vmem:[#allocation16_spill] sm:$0xff] }
 0x16f   : > { %3004 = vmatpush2.bf16.msra.mxu0 %v5312_v21  ;;  %v6791_v21 = vld [vmem:[#allocation17_spill] sm:$0xff] }
 0x170   : > { %3117 = vmatpush2.bf16.msra.mxu1 %v5315_v18  ;;  %3005 = vmatprep.subr.bf16.mxu0 %v5320_v46  ;;  %v6793_v46 = vld [vmem:[#allocation19_spill] sm:$0xff] }
 0x171   : > { %3118 = vmatprep.subr.bf16.mxu1 %v5323_v47 }
 0x172   : > { %2854 = vmatmul.mubr.bf16.gmra.mxu0 %v5989_v22  ;;  %v6164_v22 = vrot.slane %v6156_v56, %v6751_v7 }
 0x173   : > { %2967 = vmatmul.mubr.bf16.gmra.mxu1 %v5991_v23  ;;  %3006 = vmatpush2.bf16.msra.mxu0 %v5318_v57  ;;  %v5330_v23 = vld [vmem:[#allocation8 + $0x70] ss:$8 sps:$4 sm:$0xff]  }
 0x174   : > { %3119 = vmatpush2.bf16.msra.mxu1 %v5321_v58  ;;  %3007 = vmatprep.subr.bf16.mxu0 %v5326_v63  ;;  %v5345_v58 = vld [vmem:[#allocation8 + $0x20] ss:$8 sps:$4 sm:$0xff]   ;;  %v5383_v63 = vld [vmem:[#allocation8 + $0x164] ss:$8 sps:$4 sm:$0xff]  }
 0x175   : > { %3120 = vmatprep.subr.bf16.mxu1 %v5329_v28  ;;  %3009 = vmatprep.mubr.bf16.mxu0 %v5995_v32 }
 0x176   : > { %3122 = vmatprep.mubr.bf16.mxu1 %v5997_v33 }
 0x177   : > { %3008 = vmatpush2.bf16.msra.mxu0 %v5324_v29 }
 0x178   : > { %3121 = vmatpush2.bf16.msra.mxu1 %v5327_v6  ;;  %3695 = vmatprep.subr.bf16.mxu0 %v5332_v40  ;;  %v5350_v6 = vld [vmem:[#allocation8 + $0x14] ss:$8 sps:$4 sm:$0xff]   ;;  %v5381_v40 = vld [vmem:[#allocation8 + $0x160] ss:$8 sps:$4 sm:$0xff]  }
 0x179   : > { %3808 = vmatprep.subr.bf16.mxu1 %v5380_v24 }
 0x17a   : > { %v2333_v32 = vpop.f32.mrf.mxu0  ;;  %3010 = vmatmul.mubr.bf16.vlgmr.msra.gmra.mxu0 %v6005_v49 }
 0x17b   : > { %v2446_v54 = vpop.f32.mrf.mxu1  ;;  %3123 = vmatmul.mubr.bf16.vlgmr.msra.gmra.mxu1 %v6007_v52  ;;  %v2334_v33 = vadd.f32 %v2333_v32, %v6164_v22  ;;  %3019 = vmatprep.mubr.bf16.mxu0 %v6011_v0 }
 0x17c   : > { %3132 = vmatprep.mubr.bf16.mxu1 %v6013_v1  ;;  %v2335_v41 = vpop.f32.mrf.mxu0  ;;  %3696 = vmatpush1.bf16.msra.mxu0 %v5330_v23  ;;  %v5336_v1 = vld [vmem:[#allocation8 + $0x50] ss:$8 sps:$4 sm:$0xff]  }
 0x17d   : > { %v2448_v59 = vpop.f32.mrf.mxu1  ;;  %v6176_v45 = vadd.f32 %v2446_v54, %v2334_v33  ;;  %v2336_v2 = vadd.f32 %v2335_v41, %v6169_v35  ;;  %3697 = vmatprep.subr.bf16.mxu0 %v5335_v48  ;;  %3809 = vmatpush1.bf16.msra.mxu1 %v5378_v12  ;;  %v5348_v41 = vld [vmem:[#allocation8 + $0x10] ss:$8 sps:$4 sm:$0xff]   ;;  %v5387_v12 = vld [vmem:[#allocation8 + $0x140] ss:$8 sps:$4 sm:$0xff]  }
 0x17e   : > { %v6179_v50 = vpop.f32.mrf.mxu0  ;;  %3810 = vmatprep.subr.bf16.mxu1 %v5383_v63 }
 0x17f   : > { %v6181_v49 = vpop.f32.mrf.mxu1  ;;  %v6183_v52 = vadd.f32 %v2448_v59, %v2336_v2  ;;  %v5386_v59 = vld [vmem:[#allocation8 + $0x154] ss:$8 sps:$4 sm:$0xff]   ;;  %v5384_v2 = vld [vmem:[#allocation8 + $0x150] ss:$8 sps:$4 sm:$0xff]  }
 0x180   : > { %v6185_v51 = vpop.f32.mrf.mxu0  ;;  %3698 = vmatpush1.bf16.msra.mxu0 %v5333_v44  ;;  %v5353_v44 = vld [vmem:[#allocation8 + $0x4] ss:$8 sps:$4 sm:$0xff]  }
 0x181   : > { %v6187_v0 = vpop.f32.mrf.mxu1  ;;  %3699 = vmatprep.subr.bf16.mxu0 %v5338_v3  ;;  %3811 = vmatpush1.bf16.msra.mxu1 %v5381_v40 }
 0x182   : > { %v2343_v53 = vpop.f32.mrf.mxu0  ;;  %3020 = vmatmul.mubr.bf16.gmra.mxu0 %v6021_v16  ;;  %3812 = vmatprep.subr.bf16.mxu1 %v5386_v59  ;;  %v6801_v59 = vld [vmem:[#allocation27_spill] sm:$0xff] }
 0x183   : > { %v2456_v61 = vpop.f32.mrf.mxu1  ;;  %3133 = vmatmul.mubr.bf16.gmra.mxu1 %v6023_v17  ;;  %v2344_v62 = vadd.f32 %v2343_v53, %v6164_v22  ;;  %3029 = vmatprep.mubr.bf16.mxu0 %v6027_v36  ;;  %v6795_v53 = vld [vmem:[#allocation21_spill] sm:$0xff] }
 0x184   : > { %3142 = vmatprep.mubr.bf16.mxu1 %v6029_v39  ;;  %v2345_v55 = vpop.f32.mrf.mxu0  ;;  %3700 = vmatpush1.bf16.msra.mxu0 %v5336_v1  ;;  %v5342_v39 = vld [vmem:[#allocation8 + $0x30] ss:$8 sps:$4 sm:$0xff]  }
 0x185   : > { %v2458_v8 = vpop.f32.mrf.mxu1  ;;  %v6194_v5 = vadd.f32 %v2456_v61, %v2344_v62  ;;  %v2346_v9 = vadd.f32 %v2345_v55, %v6169_v35  ;;  %3701 = vmatprep.subr.bf16.mxu0 %v5341_v43  ;;  %v6794_v43 = vld [vmem:[#allocation20_spill] sm:$0xff]  ;;  %v6796_v62 = vld [vmem:[#allocation22_spill] sm:$0xff]  ;;  %v6797_v55 = vld [vmem:[#allocation23_spill] sm:$0xff]  ;;  %3813 = vmatpush1.bf16.msra.mxu1 %v5384_v2 }
 0x186   : > { %v6197_v14 = vpop.f32.mrf.mxu0 }
 0x187   : > { %v6199_v16 = vpop.f32.mrf.mxu1  ;;  %v6201_v17 = vadd.f32 %v2458_v8, %v2346_v9  ;;  %v5351_v9 = vld [vmem:[#allocation8] ss:$8 sps:$4 sm:$0xff]   ;;  %v2348_v60 = vadd.f32 %v6197_v14, %v6164_v22 }
 0x188   : > { %v6203_v15 = vpop.f32.mrf.mxu0  ;;  %3702 = vmatpush1.bf16.msra.mxu0 %v5339_v4 }
 0x189   : > { %v6205_v36 = vpop.f32.mrf.mxu1  ;;  %3703 = vmatprep.subr.bf16.mxu0 %v5344_v11  ;;  %v5389_v11 = vld [vmem:[#allocation8 + $0x144] ss:$8 sps:$4 sm:$0xff]  }
 0x18a   : > { %v2353_v20 = vpop.f32.mrf.mxu0  ;;  %3030 = vmatmul.mubr.bf16.gmra.mxu0 %v6790_v38  ;;  %3814 = vmatprep.subr.bf16.mxu1 %v5389_v11 }
 0x18b   : > { %v2466_v37 = vpop.f32.mrf.mxu1  ;;  %3143 = vmatmul.mubr.bf16.gmra.mxu1 %v6791_v21  ;;  %v2354_v18 = vadd.f32 %v2353_v20, %v6164_v22  ;;  %3039 = vmatprep.mubr.bf16.mxu0 %v6792_v19  ;;  %v5354_v19 = vld [vmem:[#allocation8 + $0xf0] ss:$8 sps:$4 sm:$0xff]  }
 0x18c   : > { %3152 = vmatprep.mubr.bf16.mxu1 %v6793_v46  ;;  %v2355_v47 = vpop.f32.mrf.mxu0  ;;  %3704 = vmatpush1.bf16.msra.mxu0 %v5342_v39  ;;  %v5392_v46 = vld [vmem:[#allocation8 + $0x134] ss:$8 sps:$4 sm:$0xff]  }
 0x18d   : > { %v2468_v57 = vpop.f32.mrf.mxu1  ;;  %v6212_v28 = vadd.f32 %v2466_v37, %v2354_v18  ;;  %v2356_v29 = vadd.f32 %v2355_v47, %v6169_v35  ;;  %3705 = vmatprep.subr.bf16.mxu0 %v5347_v25  ;;  %v5356_v25 = vld [vmem:[#allocation8 + $0xf4] ss:$8 sps:$4 sm:$0xff]   ;;  %v5359_v47 = vld [vmem:[#allocation8 + $0xe4] ss:$8 sps:$4 sm:$0xff]   ;;  %3815 = vmatpush1.bf16.msra.mxu1 %v5387_v12 }
 0x18e   : > { %v6215_v23 = vpop.f32.mrf.mxu0  ;;  %3816 = vmatprep.subr.bf16.mxu1 %v5392_v46  ;;  %v5365_v12 = vld [vmem:[#allocation8 + $0xc4] ss:$8 sps:$4 sm:$0xff]  }
 0x18f   : > { %v6217_v48 = vpop.f32.mrf.mxu1  ;;  %v6219_v32 = vadd.f32 %v2468_v57, %v2356_v29  ;;  %v5390_v57 = vld [vmem:[#allocation8 + $0x130] ss:$8 sps:$4 sm:$0xff]   ;;  %v6798_v29 = vld [vmem:[#allocation24_spill] sm:$0xff] }
 0x190   : > { %v6221_v54 = vpop.f32.mrf.mxu0  ;;  %3706 = vmatpush1.bf16.msra.mxu0 %v5345_v58 }
 0x191   : > { %v6223_v33 = vpop.f32.mrf.mxu1  ;;  %3707 = vmatprep.subr.bf16.mxu0 %v5350_v6  ;;  %v6799_v6 = vld [vmem:[#allocation25_spill] sm:$0xff]  ;;  %3817 = vmatpush1.bf16.msra.mxu1 %v5390_v57  ;;  %v6802_v57 = vld [vmem:[#allocation28_spill] sm:$0xff] }
 0x192   : > { %v2363_v3 = vpop.f32.mrf.mxu0  ;;  %3040 = vmatmul.mubr.bf16.gmra.mxu0 %v6794_v43 }
 0x193   : > { %v2476_v1 = vpop.f32.mrf.mxu1  ;;  %3153 = vmatmul.mubr.bf16.gmra.mxu1 %v6795_v53  ;;  %v2364_v61 = vadd.f32 %v2363_v3, %v6164_v22  ;;  %3049 = vmatprep.mubr.bf16.mxu0 %v6796_v62  ;;  %v5357_v3 = vld [vmem:[#allocation8 + $0xe0] ss:$8 sps:$4 sm:$0xff]  }
 0x194   : > { %3162 = vmatprep.mubr.bf16.mxu1 %v6797_v55  ;;  %v2365_v8 = vpop.f32.mrf.mxu0  ;;  %3708 = vmatpush1.bf16.msra.mxu0 %v5348_v41  ;;  %v6800_v41 = vld [vmem:[#allocation26_spill] sm:$0xff]  ;;  %v5393_v62 = vld [vmem:[#allocation8 + $0x120] ss:$8 sps:$4 sm:$0xff]  }
 0x195   : > { %v2478_v4 = vpop.f32.mrf.mxu1  ;;  %v6230_v39 = vadd.f32 %v2476_v1, %v2364_v61  ;;  %v2366_v24 = vadd.f32 %v2365_v8, %v6169_v35  ;;  %3709 = vmatprep.subr.bf16.mxu0 %v5353_v44  ;;  %v5395_v1 = vld [vmem:[#allocation8 + $0x124] ss:$8 sps:$4 sm:$0xff]   ;;  %v5362_v61 = vld [vmem:[#allocation8 + $0xd4] ss:$8 sps:$4 sm:$0xff]  }
 0x196   : > { %v6233_v20 = vpop.f32.mrf.mxu0  ;;  %3818 = vmatprep.subr.bf16.mxu1 %v5395_v1 }
 0x197   : > { %v6235_v37 = vpop.f32.mrf.mxu1  ;;  %v6237_v38 = vadd.f32 %v2478_v4, %v2366_v24  ;;  %v5360_v24 = vld [vmem:[#allocation8 + $0xd0] ss:$8 sps:$4 sm:$0xff]   ;;  %3819 = vmatpush1.bf16.msra.mxu1 %v5393_v62 }
 0x198   : > { %v6239_v21 = vpop.f32.mrf.mxu0  ;;  %3710 = vmatpush1.bf16.msra.mxu0 %v5351_v9  ;;  %v5366_v62 = vld [vmem:[#allocation8 + $0xb0] ss:$8 sps:$4 sm:$0xff]  }
 0x199   : > { %v6241_v18 = vpop.f32.mrf.mxu1  ;;  %3711 = vmatprep.subr.bf16.mxu0 %v5356_v25  ;;  %v5398_v25 = vld [vmem:[#allocation8 + $0x114] ss:$8 sps:$4 sm:$0xff]  }
 0x19a   : > { %v2373_v58 = vpop.f32.mrf.mxu0  ;;  %3050 = vmatmul.mubr.bf16.gmra.mxu0 %v6798_v29  ;;  %3820 = vmatprep.subr.bf16.mxu1 %v5398_v25  ;;  %v5371_v25 = vld [vmem:[#allocation8 + $0xa4] ss:$8 sps:$4 sm:$0xff]  }
 0x19b   : > { %v2486_v63 = vpop.f32.mrf.mxu1  ;;  %3163 = vmatmul.mubr.bf16.gmra.mxu1 %v6799_v6  ;;  %v2374_v40 = vadd.f32 %v2373_v58, %v6164_v22  ;;  %3059 = vmatprep.mubr.bf16.mxu0 %v6800_v41  ;;  %v6803_v58 = vld [vmem:[#allocation29_spill] sm:$0xff] }
 0x19c   : > { %3172 = vmatprep.mubr.bf16.mxu1 %v6801_v59  ;;  %v2375_v44 = vpop.f32.mrf.mxu0  ;;  %3712 = vmatpush2.bf16.msra.mxu0 %v5354_v19  ;;  %v5396_v19 = vld [vmem:[#allocation8 + $0x110] ss:$8 sps:$4 sm:$0xff]   ;;  %v5401_v41 = vld [vmem:[#allocation8 + $0x104] ss:$8 sps:$4 sm:$0xff]  }
 0x19d   : > { %v2488_v2 = vpop.f32.mrf.mxu1  ;;  %v6248_v43 = vadd.f32 %v2486_v63, %v2374_v40  ;;  %v2376_v53 = vadd.f32 %v2375_v44, %v6169_v35  ;;  %3713 = vmatprep.subr.bf16.mxu0 %v5359_v47  ;;  %v5363_v40 = vld [vmem:[#allocation8 + $0xc0] ss:$8 sps:$4 sm:$0xff]   ;;  %3821 = vmatpush1.bf16.msra.mxu1 %v5396_v19 }
 0x19e   : > { %v6251_v55 = vpop.f32.mrf.mxu0  ;;  %3822 = vmatprep.subr.bf16.mxu1 %v5401_v41 }
 0x19f   : > { %v6253_v8 = vpop.f32.mrf.mxu1  ;;  %v6255_v4 = vadd.f32 %v2488_v2, %v2376_v53  ;;  %v5368_v2 = vld [vmem:[#allocation8 + $0xb4] ss:$8 sps:$4 sm:$0xff]  }
 0x1a0   : > { %v6257_v9 = vpop.f32.mrf.mxu0  ;;  %3714 = vmatpush2.bf16.msra.mxu0 %v5357_v3  ;;  %v5399_v3 = vld [vmem:[#allocation8 + $0x100] ss:$8 sps:$4 sm:$0xff]  }
 0x1a1   : > { %v6259_v11 = vpop.f32.mrf.mxu1  ;;  %3715 = vmatprep.subr.bf16.mxu0 %v5362_v61  ;;  %3823 = vmatpush1.bf16.msra.mxu1 %v5399_v3 }
 0x1a2   : > { %v2383_v46 = vpop.f32.mrf.mxu0  ;;  %3060 = vmatmul.mubr.bf16.gmra.mxu0 %v6802_v57 }
 0x1a3   : > { %v2496_v47 = vpop.f32.mrf.mxu1  ;;  %3173 = vmatmul.mubr.bf16.gmra.mxu1 %v6803_v58  ;;  %v2384_v63 = vadd.f32 %v2383_v46, %v6164_v22  ;;  %3069 = vmatprep.mubr.bf16.mxu0 %v6091_v30 }
 0x1a4   : > { %3182 = vmatprep.mubr.bf16.mxu1 %v6093_v31  ;;  %v2385_v29 = vpop.f32.mrf.mxu0  ;;  %3716 = vmatpush2.bf16.msra.mxu0 %v5360_v24  ;;  %v5404_v24 = vld [vmem:[#allocation8 + $0x1f4] ss:$8 sps:$4 sm:$0xff]  }
 0x1a5   : > { %v2498_v6 = vpop.f32.mrf.mxu1  ;;  %v6266_v59 = vadd.f32 %v2496_v47, %v2384_v63  ;;  %v2386_v44 = vadd.f32 %v2385_v29, %v6169_v35  ;;  %3717 = vmatprep.subr.bf16.mxu0 %v5365_v12  ;;  %v5402_v12 = vld [vmem:[#allocation8 + $0x1f0] ss:$8 sps:$4 sm:$0xff]   ;;  %v5369_v29 = vld [vmem:[#allocation8 + $0xa0] ss:$8 sps:$4 sm:$0xff]   ;;  %3824 = vmatprep.subr.bf16.mxu1 %v5404_v24 }
 0x1a6   : > { %v6269_v1 = vpop.f32.mrf.mxu0  ;;  %v6804_v47 = vld [vmem:[#allocation30_spill] sm:$0xff]  ;;  %3825 = vmatpush2.bf16.msra.mxu1 %v5402_v12 }
 0x1a7   : > { %v6271_v53 = vpop.f32.mrf.mxu1  ;;  %v6273_v30 = vadd.f32 %v2498_v6, %v2386_v44  ;;  %v5407_v6 = vld [vmem:[#allocation8 + $0x1e4] ss:$8 sps:$4 sm:$0xff]   ;;  %v5405_v44 = vld [vmem:[#allocation8 + $0x1e0] ss:$8 sps:$4 sm:$0xff]   ;;  %v5372_v24 = vld [vmem:[#allocation8 + $0x90] ss:$8 sps:$4 sm:$0xff]  }
 0x1a8   : > { %v6275_v31 = vpop.f32.mrf.mxu0  ;;  %3718 = vmatpush2.bf16.msra.mxu0 %v5363_v40  ;;  %3826 = vmatprep.subr.bf16.mxu1 %v5407_v6  ;;  %v5375_v6 = vld [vmem:[#allocation8 + $0x80] ss:$8 sps:$4 sm:$0xff]  }
 0x1a9   : > { %v6277_v61 = vpop.f32.mrf.mxu1  ;;  %3719 = vmatprep.subr.bf16.mxu0 %v5368_v2 }
 0x1aa   : > { %v2393_v19 = vpop.f32.mrf.mxu0  ;;  %3070 = vmatmul.mubr.bf16.gmra.mxu0 %v6101_v42  ;;  %v5374_v42 = vld [vmem:[#allocation8 + $0x94] ss:$8 sps:$4 sm:$0xff]   ;;  %3827 = vmatpush2.bf16.msra.mxu1 %v5405_v44  ;;  %v5411_v44 = vld [vmem:[#allocation8 + $0x1c0] ss:$8 sps:$4 sm:$0xff]  }
 0x1ab   : > { %v2506_v46 = vpop.f32.mrf.mxu1  ;;  %3183 = vmatmul.mubr.bf16.gmra.mxu1 %v6804_v47  ;;  %v2394_v57 = vadd.f32 %v2393_v19, %v6164_v22  ;;  %3079 = vmatprep.mubr.bf16.mxu0 %v6107_v10  ;;  %v5410_v19 = vld [vmem:[#allocation8 + $0x1d4] ss:$8 sps:$4 sm:$0xff]  }
 0x1ac   : > { %3192 = vmatprep.mubr.bf16.mxu1 %v6109_v13  ;;  %v2395_v58 = vpop.f32.mrf.mxu0  ;;  %3720 = vmatpush2.bf16.msra.mxu0 %v5366_v62 }
 0x1ad   : > { %v2508_v63 = vpop.f32.mrf.mxu1  ;;  %v6284_v40 = vadd.f32 %v2506_v46, %v2394_v57  ;;  %v2396_v41 = vadd.f32 %v2395_v58, %v6169_v35  ;;  %3721 = vmatprep.subr.bf16.mxu0 %v5371_v25  ;;  %v5377_v46 = vld [vmem:[#allocation8 + $0x84] ss:$8 sps:$4 sm:$0xff]   ;;  %v5408_v25 = vld [vmem:[#allocation8 + $0x1d0] ss:$8 sps:$4 sm:$0xff]   ;;  %3828 = vmatprep.subr.bf16.mxu1 %v5410_v19 }
 0x1ae   : > { %v6287_v2 = vpop.f32.mrf.mxu0  ;;  %3829 = vmatpush2.bf16.msra.mxu1 %v5408_v25 }
 0x1af   : > { %v6289_v3 = vpop.f32.mrf.mxu1  ;;  %v6291_v10 = vadd.f32 %v2508_v63, %v2396_v41 }
 0x1b0   : > { %v6293_v13 = vpop.f32.mrf.mxu0  ;;  %3722 = vmatpush2.bf16.msra.mxu0 %v5369_v29  ;;  %v5413_v29 = vld [vmem:[#allocation8 + $0x1c4] ss:$8 sps:$4 sm:$0xff]  }
 0x1b1   : > { %v6295_v62 = vpop.f32.mrf.mxu1  ;;  %3723 = vmatprep.subr.bf16.mxu0 %v5374_v42  ;;  %3830 = vmatprep.subr.bf16.mxu1 %v5413_v29 }
 0x1b2   : > { %v2403_v12 = vpop.f32.mrf.mxu0  ;;  %3080 = vmatmul.mubr.bf16.gmra.mxu0 %v6115_v26  ;;  %3831 = vmatpush2.bf16.msra.mxu1 %v5411_v44 }
 0x1b3   : > { %v2516_v47 = vpop.f32.mrf.mxu1  ;;  %3193 = vmatmul.mubr.bf16.gmra.mxu1 %v6117_v27  ;;  %v2404_v57 = vadd.f32 %v2403_v12, %v6164_v22 }
 0x1b4   : > { %v2405_v58 = vpop.f32.mrf.mxu0  ;;  %3724 = vmatpush2.bf16.msra.mxu0 %v5372_v24  ;;  %v5416_v24 = vld [vmem:[#allocation8 + $0x1b4] ss:$8 sps:$4 sm:$0xff]  }
 0x1b5   : > { %v2518_v63 = vpop.f32.mrf.mxu1  ;;  %v6300_v41 = vadd.f32 %v2516_v47, %v2404_v57  ;;  %v2406_v42 = vadd.f32 %v2405_v58, %v6169_v35  ;;  %3725 = vmatprep.subr.bf16.mxu0 %v5377_v46  ;;  %v2338_v47 = vadd.f32 %v6179_v50, %v6164_v22  ;;  %v5414_v46 = vld [vmem:[#allocation8 + $0x1b0] ss:$8 sps:$4 sm:$0xff]   ;;  %3832 = vmatprep.subr.bf16.mxu1 %v5416_v24 }
 0x1b6   : > { %v6303_v7 = vpop.f32.mrf.mxu0  ;;  %v2340_v58 = vadd.f32 %v6185_v51, %v6169_v35  ;;  %3833 = vmatpush2.bf16.msra.mxu1 %v5414_v46  ;;  %v5422_v51 = vld [vmem:[#allocation8 + $0x194] ss:$8 sps:$4 sm:$0xff]  }
 0x1b7   : > { %6805 = vst [vmem:[#allocation16_spill] sm:$0xff] %v6300_v41  ;;  %6806 = vst [vmem:[#allocation17_spill] sm:$0xff] %v6303_v7  ;;  %v6305_v26 = vpop.f32.mrf.mxu1  ;;  %v6307_v27 = vadd.f32 %v2518_v63, %v2406_v42  ;;  %v5419_v42 = vld [vmem:[#allocation8 + $0x1a4] ss:$8 sps:$4 sm:$0xff]   ;;  %v2451_v34 = vadd.f32 %v6181_v49, %v2338_v47  ;;  %v2461_v7 = vadd.f32 %v6199_v16, %v2348_v60 }
 0x1b8   : > { %6807 = vst [vmem:[#allocation18_spill] sm:$0xff] %v6305_v26  ;;  %v6309_v19 = vpop.f32.mrf.mxu0  ;;  %3726 = vmatpush2.bf16.msra.mxu0 %v5375_v6  ;;  %v5417_v6 = vld [vmem:[#allocation8 + $0x1a0] ss:$8 sps:$4 sm:$0xff]   ;;  %3834 = vmatprep.subr.bf16.mxu1 %v5419_v42  ;;  %v2453_v41 = vadd.f32 %v6187_v0, %v2340_v58 }
 0x1b9   : > { %6808 = vst [vmem:[#allocation19_spill] sm:$0xff] %v6307_v27  ;;  %6809 = vst [vmem:[#allocation20_spill] sm:$0xff] %v6309_v19  ;;  %v6311_v12 = vpop.f32.mrf.mxu1 }
 0x1ba   : > { %6810 = vst [vmem:[#allocation21_spill] sm:$0xff] %v6311_v12  ;;  %v2559_v25 = vpop.f32.mrf.mxu0  ;;  %3835 = vmatpush2.bf16.msra.mxu1 %v5417_v6 }
 0x1bb   : > { %v2672_v57 = vpop.f32.mrf.mxu1  ;;  %v2560_v12 = vadd.f32 %v2559_v25, %v6176_v45  ;;  %3836 = vmatprep.subr.bf16.mxu1 %v5422_v51  ;;  %v2350_v25 = vadd.f32 %v6203_v15, %v6169_v35 }
 0x1bc   : > { %v2561_v29 = vpop.f32.mrf.mxu0 }
 0x1bd   : > { %v2674_v63 = vpop.f32.mrf.mxu1  ;;  %v2562_v56 = vadd.f32 %v2561_v29, %v6183_v52  ;;  %v5420_v52 = vld [vmem:[#allocation8 + $0x190] ss:$8 sps:$4 sm:$0xff]   ;;  %v2673_v46 = vadd.f32 %v2672_v57, %v2560_v12  ;;  %v2463_v15 = vadd.f32 %v6205_v36, %v2350_v25  ;;  %v2360_v36 = vadd.f32 %v6221_v54, %v6169_v35 }
 0x1be   : > { %v2563_v50 = vpop.f32.mrf.mxu0  ;;  %3837 = vmatpush2.bf16.msra.mxu1 %v5420_v52 }
 0x1bf   : > { %v2676_v44 = vpop.f32.mrf.mxu1  ;;  %v2564_v24 = vadd.f32 %v2563_v50, %v2451_v34  ;;  %v2675_v19 = vadd.f32 %v2674_v63, %v2562_v56  ;;  %v5425_v50 = vld [vmem:[#allocation8 + $0x184] ss:$8 sps:$4 sm:$0xff]   ;;  %v3203_v12 = vmax.f32 %v2673_v46, 0.0 }
 0x1c0   : > { %v2565_v27 = vpop.f32.mrf.mxu0  ;;  %3838 = vmatprep.subr.bf16.mxu1 %v5425_v50 }
 0x1c1   : > { %v2678_v26 = vpop.f32.mrf.mxu1  ;;  %v2677_v49 = vadd.f32 %v2676_v44, %v2564_v24  ;;  %v2566_v47 = vadd.f32 %v2565_v27, %v2453_v41  ;;  %v3204_v14 = vmax.f32 %v2675_v19, 0.0  ;;  %v5423_v27 = vld [vmem:[#allocation8 + $0x180] ss:$8 sps:$4 sm:$0xff]   ;;  %v2358_v24 = vadd.f32 %v6215_v23, %v6164_v22 }
 0x1c2   : > { %v2569_v29 = vpop.f32.mrf.mxu0  ;;  %3839 = vmatpush2.bf16.msra.mxu1 %v5423_v27 }
 0x1c3   : > { %v2682_v45 = vpop.f32.mrf.mxu1  ;;  %v2679_v0 = vadd.f32 %v2678_v26, %v2566_v47  ;;  %v3207_v34 = vmax.f32 %v2677_v49, 0.0  ;;  %v2570_v57 = vadd.f32 %v2569_v29, %v6194_v5  ;;  %v2471_v23 = vadd.f32 %v6217_v48, %v2358_v24 }
 0x1c4   : > { %v2571_v58 = vpop.f32.mrf.mxu0 }
 0x1c5   : > { %v2684_v42 = vpop.f32.mrf.mxu1  ;;  %v3208_v56 = vmax.f32 %v2679_v0, 0.0  ;;  %v2572_v41 = vadd.f32 %v2571_v58, %v6201_v17  ;;  %v3267_v60 = vpack.c.bf16 %v3207_v34, %v3203_v12  ;;  %v2683_v47 = vadd.f32 %v2682_v45, %v2570_v57 }
 0x1c6   : > { %v2573_v63 = vpop.f32.mrf.mxu0 }
 0x1c7   : > { %v2686_v6 = vpop.f32.mrf.mxu1  ;;  %v2574_v26 = vadd.f32 %v2573_v63, %v2461_v7  ;;  %v3268_v44 = vpack.c.bf16 %v3208_v56, %v3204_v14  ;;  %v2685_v51 = vadd.f32 %v2684_v42, %v2572_v41  ;;  %v3211_v42 = vmax.f32 %v2683_v47, 0.0 }
 0x1c8   : > { %v2575_v16 = vpop.f32.mrf.mxu0  ;;  %v2473_v56 = vadd.f32 %v6223_v33, %v2360_v36  ;;  %v2368_v63 = vadd.f32 %v6233_v20, %v6164_v22 }
 0x1c9   : > { %v2688_v19 = vpop.f32.mrf.mxu1  ;;  %v2687_v17 = vadd.f32 %v2686_v6, %v2574_v26  ;;  %v2576_v49 = vadd.f32 %v2575_v16, %v2463_v15  ;;  %3727 = vmatprep.mubr.bf16.mxu0 %v3268_v44  ;;  %v3212_v0 = vmax.f32 %v2685_v51, 0.0 }
 0x1ca   : > { %v2579_v5 = vpop.f32.mrf.mxu0  ;;  %3728 = vmatmul.mubr.bf16.vlgmr.msra.gmra.mxu0 %v3267_v60 }
 0x1cb   : > { %v2692_v52 = vpop.f32.mrf.mxu1  ;;  %v2689_v7 = vadd.f32 %v2688_v19, %v2576_v49  ;;  %v3215_v46 = vmax.f32 %v2687_v17, 0.0  ;;  %v2580_v50 = vadd.f32 %v2579_v5, %v6212_v28  ;;  %v2370_v28 = vadd.f32 %v6239_v21, %v6169_v35 }
 0x1cc   : > { %v2581_v29 = vpop.f32.mrf.mxu0  ;;  %v2481_v19 = vadd.f32 %v6235_v37, %v2368_v63 }
 0x1cd   : > { %v2694_v25 = vpop.f32.mrf.mxu1  ;;  %v3216_v34 = vmax.f32 %v2689_v7, 0.0  ;;  %v2582_v58 = vadd.f32 %v2581_v29, %v6219_v32  ;;  %v3271_v54 = vpack.c.bf16 %v3215_v46, %v3211_v42  ;;  %v2693_v32 = vadd.f32 %v2692_v52, %v2580_v50 }
 0x1ce   : > { %v2583_v45 = vpop.f32.mrf.mxu0  ;;  %v2483_v36 = vadd.f32 %v6241_v18, %v2370_v28 }
 0x1cf   : > { %v2696_v14 = vpop.f32.mrf.mxu1  ;;  %v2584_v41 = vadd.f32 %v2583_v45, %v2471_v23  ;;  %v3272_v27 = vpack.c.bf16 %v3216_v34, %v3212_v0  ;;  %v2695_v48 = vadd.f32 %v2694_v25, %v2582_v58  ;;  %v3219_v49 = vmax.f32 %v2693_v32, 0.0 }
 0x1d0   : > { %v2585_v12 = vpop.f32.mrf.mxu0  ;;  %v2378_v23 = vadd.f32 %v6251_v55, %v6164_v22 }
 0x1d1   : > { %v2698_v57 = vpop.f32.mrf.mxu1  ;;  %v2697_v6 = vadd.f32 %v2696_v14, %v2584_v41  ;;  %v2586_v15 = vadd.f32 %v2585_v12, %v2473_v56  ;;  %3737 = vmatprep.mubr.bf16.mxu0 %v3272_v27  ;;  %v3220_v51 = vmax.f32 %v2695_v48, 0.0 }
 0x1d2   : > { %v2589_v26 = vpop.f32.mrf.mxu0  ;;  %3738 = vmatmul.mubr.bf16.gmra.mxu0 %v3271_v54  ;;  %v2491_v56 = vadd.f32 %v6253_v8, %v2378_v23  ;;  %v2398_v23 = vadd.f32 %v6287_v2, %v6164_v22 }
 0x1d3   : > { %v2702_v44 = vpop.f32.mrf.mxu1  ;;  %v2699_v33 = vadd.f32 %v2698_v57, %v2586_v15  ;;  %v3223_v24 = vmax.f32 %v2697_v6, 0.0  ;;  %v2590_v47 = vadd.f32 %v2589_v26, %v6230_v39  ;;  %v2380_v39 = vadd.f32 %v6257_v9, %v6169_v35 }
 0x1d4   : > { %v2591_v60 = vpop.f32.mrf.mxu0 }
 0x1d5   : > { %v2704_v16 = vpop.f32.mrf.mxu1  ;;  %v3224_v17 = vmax.f32 %v2699_v33, 0.0  ;;  %v2592_v20 = vadd.f32 %v2591_v60, %v6237_v38  ;;  %v3275_v21 = vpack.c.bf16 %v3223_v24, %v3219_v49  ;;  %v2703_v38 = vadd.f32 %v2702_v44, %v2590_v47 }
 0x1d6   : > { %v2593_v5 = vpop.f32.mrf.mxu0  ;;  %v2493_v48 = vadd.f32 %v6259_v11, %v2380_v39  ;;  %v2388_v44 = vadd.f32 %v6269_v1, %v6164_v22 }
 0x1d7   : > { %v2706_v52 = vpop.f32.mrf.mxu1  ;;  %v2594_v7 = vadd.f32 %v2593_v5, %v2481_v19  ;;  %v3276_v46 = vpack.c.bf16 %v3224_v17, %v3220_v51  ;;  %v2705_v37 = vadd.f32 %v2704_v16, %v2592_v20  ;;  %v3227_v54 = vmax.f32 %v2703_v38, 0.0 }
 0x1d8   : > { %v2595_v29 = vpop.f32.mrf.mxu0  ;;  %v2501_v17 = vadd.f32 %v6271_v53, %v2388_v44 }
 0x1d9   : > { %v2708_v25 = vpop.f32.mrf.mxu1  ;;  %v2707_v0 = vadd.f32 %v2706_v52, %v2594_v7  ;;  %v2596_v34 = vadd.f32 %v2595_v29, %v2483_v36  ;;  %3747 = vmatprep.mubr.bf16.mxu0 %v3276_v46  ;;  %v3228_v41 = vmax.f32 %v2705_v37, 0.0 }
 0x1da   : > { %v2599_v58 = vpop.f32.mrf.mxu0  ;;  %3748 = vmatmul.mubr.bf16.gmra.mxu0 %v3275_v21 }
 0x1db   : > { %v2712_v42 = vpop.f32.mrf.mxu1  ;;  %v2709_v18 = vadd.f32 %v2708_v25, %v2596_v34  ;;  %v3231_v50 = vmax.f32 %v2707_v0, 0.0  ;;  %v2600_v12 = vadd.f32 %v2599_v58, %v6248_v43  ;;  %v2390_v43 = vadd.f32 %v6275_v31, %v6169_v35 }
 0x1dc   : > { %v2601_v45 = vpop.f32.mrf.mxu0 }
 0x1dd   : > { %v2714_v14 = vpop.f32.mrf.mxu1  ;;  %v3232_v27 = vmax.f32 %v2709_v18, 0.0  ;;  %v2602_v55 = vadd.f32 %v2601_v45, %v6255_v4  ;;  %v3279_v9 = vpack.c.bf16 %v3231_v50, %v3227_v54  ;;  %v2713_v4 = vadd.f32 %v2712_v42, %v2600_v12 }
 0x1de   : > { %v2603_v57 = vpop.f32.mrf.mxu0  ;;  %v2503_v7 = vadd.f32 %v6277_v61, %v2390_v43  ;;  %v2511_v18 = vadd.f32 %v6289_v3, %v2398_v23 }
 0x1df   : > { %v2716_v63 = vpop.f32.mrf.mxu1  ;;  %v2604_v6 = vadd.f32 %v2603_v57, %v2491_v56  ;;  %v3280_v15 = vpack.c.bf16 %v3232_v27, %v3228_v41  ;;  %v2715_v8 = vadd.f32 %v2714_v14, %v2602_v55  ;;  %v3235_v47 = vmax.f32 %v2713_v4, 0.0 }
 0x1e0   : > { %v2605_v32 = vpop.f32.mrf.mxu0 }
 0x1e1   : > { %v2718_v26 = vpop.f32.mrf.mxu1  ;;  %v2717_v28 = vadd.f32 %v2716_v63, %v2604_v6  ;;  %v2606_v33 = vadd.f32 %v2605_v32, %v2493_v48  ;;  %3757 = vmatprep.mubr.bf16.mxu0 %v3280_v15  ;;  %v3236_v20 = vmax.f32 %v2715_v8, 0.0  ;;  %v6811_v48 = vld [vmem:[#allocation17_spill] sm:$0xff]  ;;  %v6813_v8 = vld [vmem:[#allocation31_spill] sm:$0xff] }
 0x1e2   : > { %v2609_v24 = vpop.f32.mrf.mxu0  ;;  %3758 = vmatmul.mubr.bf16.gmra.mxu0 %v3279_v9  ;;  %v2408_v6 = vadd.f32 %v6811_v48, %v6164_v22  ;;  %v6814_v22 = vld [vmem:[#allocation18_spill] sm:$0xff] }
 0x1e3   : > { %v2722_v60 = vpop.f32.mrf.mxu1  ;;  %v2719_v11 = vadd.f32 %v2718_v26, %v2606_v33  ;;  %v3239_v16 = vmax.f32 %v2717_v28, 0.0  ;;  %v2610_v5 = vadd.f32 %v2609_v24, %v6266_v59  ;;  %v2400_v59 = vadd.f32 %v6293_v13, %v6169_v35 }
 0x1e4   : > { %v2611_v19 = vpop.f32.mrf.mxu0  ;;  %v689_v28 = vsub.s32 2, %v6813_v8  ;;  %v2521_v43 = vadd.f32 %v6814_v22, %v2408_v6 }
 0x1e5   : > { %v2724_v51 = vpop.f32.mrf.mxu1  ;;  %v3240_v49 = vmax.f32 %v2719_v11, 0.0  ;;  %v2612_v1 = vadd.f32 %v2611_v19, %v6273_v30  ;;  %v3283_v31 = vpack.c.bf16 %v3239_v16, %v3235_v47  ;;  %v2723_v30 = vadd.f32 %v2722_v60, %v2610_v5  ;;  %v6815_v19 = vld [vmem:[#allocation19_spill] sm:$0xff] }
 0x1e6   : > { %v2613_v52 = vpop.f32.mrf.mxu0  ;;  %v2513_v55 = vadd.f32 %v6295_v62, %v2400_v59  ;;  %v693_v60 = vsub.s32 3, %v6813_v8 }
 0x1e7   : > { %v2726_v36 = vpop.f32.mrf.mxu1  ;;  %v2614_v46 = vadd.f32 %v2613_v52, %v2501_v17  ;;  %v3284_v21 = vpack.c.bf16 %v3240_v49, %v3236_v20  ;;  %v2725_v53 = vadd.f32 %v2724_v51, %v2612_v1  ;;  %v3243_v14 = vmax.f32 %v2723_v30, 0.0  ;;  %v6816_v20 = vld [vmem:[#allocation16_spill] sm:$0xff] }
 0x1e8   : > { %v2615_v29 = vpop.f32.mrf.mxu0 }
 0x1e9   : > { %v2728_v25 = vpop.f32.mrf.mxu1  ;;  %v2727_v37 = vadd.f32 %v2726_v36, %v2614_v46  ;;  %v2616_v0 = vadd.f32 %v2615_v29, %v2503_v7  ;;  %3767 = vmatprep.mubr.bf16.mxu0 %v3284_v21  ;;  %v3244_v50 = vmax.f32 %v2725_v53, 0.0  ;;  %v6818_v7 = vld [vmem:[#allocation32_spill] sm:$0xff] }
 0x1ea   : > { %v2619_v34 = vpop.f32.mrf.mxu0  ;;  %3768 = vmatmul.mubr.bf16.gmra.mxu0 %v3283_v31  ;;  %v6380_v46 = vrot.slane %v6818_v7, %v689_v28 }
 0x1eb   : > { %v2732_v38 = vpop.f32.mrf.mxu1  ;;  %v2729_v61 = vadd.f32 %v2728_v25, %v2616_v0  ;;  %v3247_v58 = vmax.f32 %v2727_v37, 0.0  ;;  %v2620_v56 = vadd.f32 %v2619_v34, %v6284_v40  ;;  %v6812_v40 = vld [vmem:[#allocation20_spill] sm:$0xff]  ;;  %v6383_v37 = vrot.slane %v6818_v7, %v693_v60 }
 0x1ec   : > { %v2621_v42 = vpop.f32.mrf.mxu0  ;;  %v2410_v44 = vadd.f32 %v6812_v40, %v6169_v35  ;;  %v6817_v35 = vld [vmem:[#allocation21_spill] sm:$0xff] }
 0x1ed   : > { %v2734_v39 = vpop.f32.mrf.mxu1  ;;  %v3248_v45 = vmax.f32 %v2729_v61, 0.0  ;;  %v2622_v2 = vadd.f32 %v2621_v42, %v6291_v10  ;;  %v3287_v13 = vpack.c.bf16 %v3247_v58, %v3243_v14  ;;  %v2733_v10 = vadd.f32 %v2732_v38, %v2620_v56 }
 0x1ee   : > { %v2623_v41 = vpop.f32.mrf.mxu0  ;;  %v2523_v5 = vadd.f32 %v6817_v35, %v2410_v44 }
 0x1ef   : > { %v2736_v27 = vpop.f32.mrf.mxu1  ;;  %v2624_v54 = vadd.f32 %v2623_v41, %v2511_v18  ;;  %v3288_v12 = vpack.c.bf16 %v3248_v45, %v3244_v50  ;;  %v2735_v3 = vadd.f32 %v2734_v39, %v2622_v2  ;;  %v3251_v17 = vmax.f32 %v2733_v10, 0.0 }
 0x1f0   : > { %v2625_v57 = vpop.f32.mrf.mxu0 }
 0x1f1   : > { %v2738_v63 = vpop.f32.mrf.mxu1  ;;  %v2737_v15 = vadd.f32 %v2736_v27, %v2624_v54  ;;  %v2626_v9 = vadd.f32 %v2625_v57, %v2513_v55  ;;  %3777 = vmatprep.mubr.bf16.mxu0 %v3288_v12  ;;  %v3252_v11 = vmax.f32 %v2735_v3, 0.0 }
 0x1f2   : > { %v2629_v32 = vpop.f32.mrf.mxu0  ;;  %3778 = vmatmul.mubr.bf16.gmra.mxu0 %v3287_v13 }
 0x1f3   : > { %v2742_v26 = vpop.f32.mrf.mxu1  ;;  %v2739_v62 = vadd.f32 %v2738_v63, %v2626_v9  ;;  %v3255_v33 = vmax.f32 %v2737_v15, 0.0  ;;  %v2630_v49 = vadd.f32 %v2629_v32, %v6816_v20 }
 0x1f4   : > { %v2631_v4 = vpop.f32.mrf.mxu0 }
 0x1f5   : > { %v2744_v24 = vpop.f32.mrf.mxu1  ;;  %v3256_v16 = vmax.f32 %v2739_v62, 0.0  ;;  %v2632_v51 = vadd.f32 %v2631_v4, %v6815_v19  ;;  %v3291_v21 = vpack.c.bf16 %v3255_v33, %v3251_v17  ;;  %v2743_v0 = vadd.f32 %v2742_v26, %v2630_v49 }
 0x1f6   : > { %v2633_v1 = vpop.f32.mrf.mxu0 }
 0x1f7   : > { %v2746_v47 = vpop.f32.mrf.mxu1  ;;  %v2634_v52 = vadd.f32 %v2633_v1, %v2521_v43  ;;  %v3292_v36 = vpack.c.bf16 %v3256_v16, %v3252_v11  ;;  %v2745_v25 = vadd.f32 %v2744_v24, %v2632_v51  ;;  %v3259_v2 = vmax.f32 %v2743_v0, 0.0 }
 0x1f8   : > { %v2635_v31 = vpop.f32.mrf.mxu0 }
 0x1f9   : > { %v2748_v29 = vpop.f32.mrf.mxu1  ;;  %v2747_v23 = vadd.f32 %v2746_v47, %v2634_v52  ;;  %v2636_v53 = vadd.f32 %v2635_v31, %v2523_v5  ;;  %3787 = vmatprep.mubr.bf16.mxu0 %v3292_v36  ;;  %v3260_v39 = vmax.f32 %v2745_v25, 0.0 }
 0x1fa   : > { %v2785_v30 = vpop.f32.mrf.mxu0  ;;  %3788 = vmatmul.mubr.bf16.gmra.mxu0 %v3291_v21 }
 0x1fb   : > { %v2898_v34 = vpop.f32.mrf.mxu1  ;;  %v2749_v38 = vadd.f32 %v2748_v29, %v2636_v53  ;;  %v2786_v59 = vadd.f32 %v2785_v30, %v6380_v46  ;;  %v3263_v61 = vmax.f32 %v2747_v23, 0.0 }
 0x1fc   : > { %v2787_v58 = vpop.f32.mrf.mxu0 }
 0x1fd   : > { %v2900_v42 = vpop.f32.mrf.mxu1  ;;  %v3264_v18 = vmax.f32 %v2749_v38, 0.0  ;;  %v6386_v50 = vadd.f32 %v2898_v34, %v2786_v59  ;;  %v2788_v45 = vadd.f32 %v2787_v58, %v6383_v37  ;;  %v3295_v55 = vpack.c.bf16 %v3263_v61, %v3259_v2 }
 0x1fe   : > { %v6389_v14 = vpop.f32.mrf.mxu0 }
 0x1ff   : > { %v6391_v56 = vpop.f32.mrf.mxu1  ;;  %v6393_v41 = vadd.f32 %v2900_v42, %v2788_v45  ;;  %v3296_v27 = vpack.c.bf16 %v3264_v18, %v3260_v39 }
 0x200   : > { %v6395_v54 = vpop.f32.mrf.mxu0 }
 0x201   : > { %v6397_v12 = vpop.f32.mrf.mxu1  ;;  %3797 = vmatprep.mubr.bf16.mxu0 %v3296_v27 }
 0x202   : > { %v2795_v13 = vpop.f32.mrf.mxu0  ;;  %3798 = vmatmul.mubr.bf16.gmra.mxu0 %v3295_v55 }
 0x203   : > { %v2908_v57 = vpop.f32.mrf.mxu1  ;;  %v2796_v63 = vadd.f32 %v2795_v13, %v6380_v46 }
 0x204   : > { %v2797_v48 = vpop.f32.mrf.mxu0 }
 0x205   : > { %v2910_v6 = vpop.f32.mrf.mxu1  ;;  %v6400_v3 = vadd.f32 %v2908_v57, %v2796_v63  ;;  %v2798_v15 = vadd.f32 %v2797_v48, %v6383_v37 }
 0x206   : > { %v6403_v9 = vpop.f32.mrf.mxu0 }
 0x207   : > { %v6405_v10 = vpop.f32.mrf.mxu1  ;;  %v6407_v32 = vadd.f32 %v2910_v6, %v2798_v15 }
 0x208   : > { %v6409_v26 = vpop.f32.mrf.mxu0 }
 0x209   : > { %v6411_v40 = vpop.f32.mrf.mxu1 }
 0x20a   : > { %v2805_v44 = vpop.f32.mrf.mxu0 }
 0x20b   : > { %v2918_v62 = vpop.f32.mrf.mxu1  ;;  %v2806_v28 = vadd.f32 %v2805_v44, %v6380_v46 }
 0x20c   : > { %v2807_v33 = vpop.f32.mrf.mxu0 }
 0x20d   : > { %v2920_v4 = vpop.f32.mrf.mxu1  ;;  %v6414_v24 = vadd.f32 %v2918_v62, %v2806_v28  ;;  %v2808_v60 = vadd.f32 %v2807_v33, %v6383_v37 }
 0x20e   : > { %v6417_v22 = vpop.f32.mrf.mxu0 }
 0x20f   : > { %v6419_v43 = vpop.f32.mrf.mxu1  ;;  %v6421_v11 = vadd.f32 %v2920_v4, %v2808_v60 }
 0x210   : > { %v6423_v16 = vpop.f32.mrf.mxu0 }
 0x211   : > { %v6425_v19 = vpop.f32.mrf.mxu1 }
 0x212   : > { %v2815_v51 = vpop.f32.mrf.mxu0 }
 0x213   : > { %v2928_v17 = vpop.f32.mrf.mxu1  ;;  %v2816_v20 = vadd.f32 %v2815_v51, %v6380_v46 }
 0x214   : > { %v2817_v49 = vpop.f32.mrf.mxu0 }
 0x215   : > { %v2930_v1 = vpop.f32.mrf.mxu1  ;;  %v6428_v47 = vadd.f32 %v2928_v17, %v2816_v20  ;;  %v2818_v35 = vadd.f32 %v2817_v49, %v6383_v37 }
 0x216   : > { %v6431_v5 = vpop.f32.mrf.mxu0 }
 0x217   : > { %v6433_v52 = vpop.f32.mrf.mxu1  ;;  %v6435_v36 = vadd.f32 %v2930_v1, %v2818_v35 }
 0x218   : > { %v6437_v7 = vpop.f32.mrf.mxu0 }
 0x219   : > { %v6439_v21 = vpop.f32.mrf.mxu1 }
 0x21a   : > { %v2825_v31 = vpop.f32.mrf.mxu0 }
 0x21b   : > { %v2938_v29 = vpop.f32.mrf.mxu1  ;;  %v2826_v25 = vadd.f32 %v2825_v31, %v6380_v46 }
 0x21c   : > { %v2827_v23 = vpop.f32.mrf.mxu0 }
 0x21d   : > { %v2940_v53 = vpop.f32.mrf.mxu1  ;;  %v6442_v0 = vadd.f32 %v2938_v29, %v2826_v25  ;;  %v2828_v30 = vadd.f32 %v2827_v23, %v6383_v37 }
 0x21e   : > { %v6445_v34 = vpop.f32.mrf.mxu0 }
 0x21f   : > { %v6447_v38 = vpop.f32.mrf.mxu1  ;;  %v6449_v59 = vadd.f32 %v2940_v53, %v2828_v30 }
 0x220   : > { %v6451_v61 = vpop.f32.mrf.mxu0 }
 0x221   : > { %v6453_v58 = vpop.f32.mrf.mxu1 }
 0x222   : > { %v2835_v42 = vpop.f32.mrf.mxu0 }
 0x223   : > { %v2948_v39 = vpop.f32.mrf.mxu1  ;;  %v2836_v18 = vadd.f32 %v2835_v42, %v6380_v46 }
 0x224   : > { %v2837_v45 = vpop.f32.mrf.mxu0 }
 0x225   : > { %v2950_v2 = vpop.f32.mrf.mxu1  ;;  %v6456_v27 = vadd.f32 %v2948_v39, %v2836_v18  ;;  %v2838_v55 = vadd.f32 %v2837_v45, %v6383_v37 }
 0x226   : > { %v6459_v13 = vpop.f32.mrf.mxu0 }
 0x227   : > { %v6461_v57 = vpop.f32.mrf.mxu1  ;;  %v6463_v63 = vadd.f32 %v2950_v2, %v2838_v55  ;;  %v2790_v55 = vadd.f32 %v6389_v14, %v6380_v46 }
 0x228   : > { %v6465_v48 = vpop.f32.mrf.mxu0 }
 0x229   : > { %v6467_v6 = vpop.f32.mrf.mxu1 }
 0x22a   : > { %v2845_v15 = vpop.f32.mrf.mxu0 }
 0x22b   : > { %v2958_v44 = vpop.f32.mrf.mxu1  ;;  %v2846_v62 = vadd.f32 %v2845_v15, %v6380_v46 }
 0x22c   : > { %v2847_v28 = vpop.f32.mrf.mxu0 }
 0x22d   : > { %v2960_v33 = vpop.f32.mrf.mxu1  ;;  %v6470_v4 = vadd.f32 %v2958_v44, %v2846_v62  ;;  %v2848_v60 = vadd.f32 %v2847_v28, %v6383_v37  ;;  %v2792_v62 = vadd.f32 %v6395_v54, %v6383_v37 }
 0x22e   : > { %v6473_v51 = vpop.f32.mrf.mxu0 }
 0x22f   : > { %v6475_v17 = vpop.f32.mrf.mxu1  ;;  %v6477_v20 = vadd.f32 %v2960_v33, %v2848_v60  ;;  %v2903_v60 = vadd.f32 %v6391_v56, %v2790_v55 }
 0x230   : > { %v6479_v49 = vpop.f32.mrf.mxu0 }
 0x231   : > { %v6481_v1 = vpop.f32.mrf.mxu1 }
 0x232   : > { %v2855_v35 = vpop.f32.mrf.mxu0 }
 0x233   : > { %v2968_v31 = vpop.f32.mrf.mxu1  ;;  %v2856_v29 = vadd.f32 %v2855_v35, %v6380_v46 }
 0x234   : > { %v2857_v25 = vpop.f32.mrf.mxu0 }
 0x235   : > { %v2970_v23 = vpop.f32.mrf.mxu1  ;;  %v6484_v53 = vadd.f32 %v2968_v31, %v2856_v29  ;;  %v2858_v30 = vadd.f32 %v2857_v25, %v6383_v37 }
 0x236   : > { %v6487_v42 = vpop.f32.mrf.mxu0 }
 0x237   : > { %6819 = vst [vmem:[#allocation22_spill] sm:$0xff] %v6484_v53  ;;  %v6489_v39 = vpop.f32.mrf.mxu1  ;;  %v6491_v18 = vadd.f32 %v2970_v23, %v2858_v30  ;;  %v2905_v23 = vadd.f32 %v6397_v12, %v2792_v62 }
 0x238   : > { %6820 = vst [vmem:[#allocation23_spill] sm:$0xff] %v6489_v39  ;;  %v6493_v45 = vpop.f32.mrf.mxu0 }
 0x239   : > { %6821 = vst [vmem:[#allocation24_spill] sm:$0xff] %v6491_v18  ;;  %6822 = vst [vmem:[#allocation25_spill] sm:$0xff] %v6493_v45  ;;  %v6495_v2 = vpop.f32.mrf.mxu1 }
 0x23a   : > { %6823 = vst [vmem:[#allocation26_spill] sm:$0xff] %v6495_v2  ;;  %v3011_v15 = vpop.f32.mrf.mxu0  ;;  %v2800_v2 = vadd.f32 %v6403_v9, %v6380_v46 }
 0x23b   : > { %v3124_v44 = vpop.f32.mrf.mxu1  ;;  %v3012_v31 = vadd.f32 %v3011_v15, %v6386_v50 }
 0x23c   : > { %v3013_v28 = vpop.f32.mrf.mxu0  ;;  %v2913_v12 = vadd.f32 %v6405_v10, %v2800_v2 }
 0x23d   : > { %v3126_v33 = vpop.f32.mrf.mxu1  ;;  %v3014_v35 = vadd.f32 %v3013_v28, %v6393_v41  ;;  %v3125_v39 = vadd.f32 %v3124_v44, %v3012_v31  ;;  %v2802_v41 = vadd.f32 %v6409_v26, %v6383_v37 }
 0x23e   : > { %v3015_v29 = vpop.f32.mrf.mxu0 }
 0x23f   : > { %v3128_v25 = vpop.f32.mrf.mxu1  ;;  %v3016_v30 = vadd.f32 %v3015_v29, %v2903_v60  ;;  %v3127_v53 = vadd.f32 %v3126_v33, %v3014_v35  ;;  %v3205_v9 = vmax.f32 %v3125_v39, 0.0  ;;  %v2915_v35 = vadd.f32 %v6411_v40, %v2802_v41  ;;  %v5427_v39 = vld [vmem:[#allocation10 + $0x38] sm:$0xff]  }
 0x240   : > { %v3017_v8 = vpop.f32.mrf.mxu0  ;;  %v2812_v40 = vadd.f32 %v6423_v16, %v6383_v37 }
 0x241   : > { %v3130_v14 = vpop.f32.mrf.mxu1  ;;  %v3129_v54 = vadd.f32 %v3128_v25, %v3016_v30  ;;  %v3018_v18 = vadd.f32 %v3017_v8, %v2905_v23  ;;  %v3206_v62 = vmax.f32 %v3127_v53, 0.0  ;;  %v2810_v30 = vadd.f32 %v6417_v22, %v6380_v46 }
 0x242   : > { %v3021_v45 = vpop.f32.mrf.mxu0 }
 0x243   : > { %v3134_v56 = vpop.f32.mrf.mxu1  ;;  %v3131_v50 = vadd.f32 %v3130_v14, %v3018_v18  ;;  %v3209_v55 = vmax.f32 %v3129_v54, 0.0  ;;  %v3022_v33 = vadd.f32 %v3021_v45, %v6400_v3  ;;  %v5428_v14 = vld [vmem:[#allocation10 + $0x70] sm:$0xff]  }
 0x244   : > { %v3023_v15 = vpop.f32.mrf.mxu0 }
 0x245   : > { %v3136_v28 = vpop.f32.mrf.mxu1  ;;  %v3210_v60 = vmax.f32 %v3131_v50, 0.0  ;;  %v3024_v29 = vadd.f32 %v3023_v15, %v6407_v32  ;;  %v3269_v26 = vpack.c.bf16 %v3209_v55, %v3205_v9  ;;  %v5426_v32 = vld [vmem:[#allocation10 + $0x78] sm:$0xff]   ;;  %v3135_v3 = vadd.f32 %v3134_v56, %v3022_v33  ;;  %v5429_v15 = vld [vmem:[#allocation10 + $0x30] sm:$0xff]  }
 0x246   : > { %v3025_v8 = vpop.f32.mrf.mxu0  ;;  %4769 = vmatprep.subr.bf16.mxu0 %v5426_v32  ;;  %4833 = vmatprep.subr.bf16.mxu1 %v5426_v32 }
 0x247   : > { %v3138_v44 = vpop.f32.mrf.mxu1  ;;  %v3270_v31 = vpack.c.bf16 %v3210_v60, %v3206_v62  ;;  %v3026_v25 = vadd.f32 %v3025_v8, %v2913_v12  ;;  %v3137_v10 = vadd.f32 %v3136_v28, %v3024_v29  ;;  %4770 = vmatpush3.bf16.msra.mxu0 %v5427_v39  ;;  %v2923_v28 = vadd.f32 %v6419_v43, %v2810_v30  ;;  %v5430_v60 = vld [vmem:[#allocation10 + $0x68] sm:$0xff]  }
 0x248   : > { %v3027_v18 = vpop.f32.mrf.mxu0  ;;  %4771 = vmatprep.subr.bf16.mxu0 %v5428_v14  ;;  %v3213_v29 = vmax.f32 %v3135_v3, 0.0  ;;  %v2925_v8 = vadd.f32 %v6425_v19, %v2812_v40  ;;  %v5433_v3 = vld [vmem:[#allocation10 + $0x20] sm:$0xff]  }
 0x249   : > { %v3140_v23 = vpop.f32.mrf.mxu1  ;;  %v3139_v53 = vadd.f32 %v3138_v44, %v3026_v25  ;;  %v3028_v2 = vadd.f32 %v3027_v18, %v2915_v35  ;;  %3840 = vmatprep.mubr.bf16.mxu1 %v3270_v31  ;;  %v3214_v12 = vmax.f32 %v3137_v10, 0.0  ;;  %v2820_v31 = vadd.f32 %v6431_v5, %v6380_v46 }
 0x24a   : > { %v3031_v45 = vpop.f32.mrf.mxu0  ;;  %3841 = vmatmul.mubr.bf16.vlgmr.msra.gmra.mxu1 %v3269_v26  ;;  %v2822_v5 = vadd.f32 %v6437_v7, %v6383_v37 }
 0x24b   : > { %v3144_v54 = vpop.f32.mrf.mxu1  ;;  %v3141_v41 = vadd.f32 %v3140_v23, %v3028_v2  ;;  %v3217_v50 = vmax.f32 %v3139_v53, 0.0  ;;  %4841 = vmatpush3.bf16.msra.mxu1 %v5427_v39  ;;  %v3032_v16 = vadd.f32 %v3031_v45, %v6414_v24  ;;  %4772 = vmatpush3.bf16.msra.mxu0 %v5429_v15  ;;  %v5432_v24 = vld [vmem:[#allocation10 + $0x60] sm:$0xff]   ;;  %v2933_v45 = vadd.f32 %v6433_v52, %v2820_v31 }
 0x24c   : > { %v3033_v55 = vpop.f32.mrf.mxu0  ;;  %4834 = vmatprep.subr.bf16.mxu1 %v5428_v14  ;;  %4773 = vmatprep.subr.bf16.mxu0 %v5430_v60 }
 0x24d   : > { %v3146_v22 = vpop.f32.mrf.mxu1  ;;  %v3218_v62 = vmax.f32 %v3141_v41, 0.0  ;;  %v3034_v56 = vadd.f32 %v3033_v55, %v6421_v11  ;;  %v3273_v43 = vpack.c.bf16 %v3217_v50, %v3213_v29  ;;  %v5431_v11 = vld [vmem:[#allocation10 + $0x28] sm:$0xff]   ;;  %v3145_v10 = vadd.f32 %v3144_v54, %v3032_v16  ;;  %v5434_v50 = vld [vmem:[#allocation10 + $0x58] sm:$0xff]  }
 0x24e   : > { %v3035_v9 = vpop.f32.mrf.mxu0 }
 0x24f   : > { %v3148_v33 = vpop.f32.mrf.mxu1  ;;  %v3274_v44 = vpack.c.bf16 %v3218_v62, %v3214_v12  ;;  %v3036_v35 = vadd.f32 %v3035_v9, %v2923_v28  ;;  %4842 = vmatpush3.bf16.msra.mxu1 %v5429_v15  ;;  %v3147_v18 = vadd.f32 %v3146_v22, %v3034_v56  ;;  %4774 = vmatpush3.bf16.msra.mxu0 %v5431_v11  ;;  %v3221_v55 = vmax.f32 %v3145_v10, 0.0 }
 0x250   : > { %v3037_v25 = vpop.f32.mrf.mxu0  ;;  %4835 = vmatprep.subr.bf16.mxu1 %v5430_v60  ;;  %4775 = vmatprep.subr.bf16.mxu0 %v5432_v24  ;;  %v2935_v28 = vadd.f32 %v6439_v21, %v2822_v5  ;;  %v2830_v56 = vadd.f32 %v6445_v34, %v6380_v46  ;;  %v2832_v21 = vadd.f32 %v6451_v61, %v6383_v37 }
 0x251   : > { %v3150_v26 = vpop.f32.mrf.mxu1  ;;  %v3149_v23 = vadd.f32 %v3148_v33, %v3036_v35  ;;  %v3038_v30 = vadd.f32 %v3037_v25, %v2925_v8  ;;  %3850 = vmatprep.mubr.bf16.mxu1 %v3274_v44  ;;  %v3222_v40 = vmax.f32 %v3147_v18, 0.0 }
 0x252   : > { %v3041_v53 = vpop.f32.mrf.mxu0  ;;  %3851 = vmatmul.mubr.bf16.gmra.mxu1 %v3273_v43  ;;  %v2943_v25 = vadd.f32 %v6447_v38, %v2830_v56 }
 0x253   : > { %v3154_v19 = vpop.f32.mrf.mxu1  ;;  %v3151_v2 = vadd.f32 %v3150_v26, %v3038_v30  ;;  %v3225_v32 = vmax.f32 %v3149_v23, 0.0  ;;  %4843 = vmatpush3.bf16.msra.mxu1 %v5431_v11  ;;  %v3042_v22 = vadd.f32 %v3041_v53, %v6428_v47  ;;  %4776 = vmatpush3.bf16.msra.mxu0 %v5433_v3  ;;  %v2945_v53 = vadd.f32 %v6453_v58, %v2832_v21 }
 0x254   : > { %v3043_v39 = vpop.f32.mrf.mxu0  ;;  %4836 = vmatprep.subr.bf16.mxu1 %v5432_v24  ;;  %4777 = vmatprep.subr.bf16.mxu0 %v5434_v50 }
 0x255   : > { %v3156_v14 = vpop.f32.mrf.mxu1  ;;  %v3226_v41 = vmax.f32 %v3151_v2, 0.0  ;;  %v3044_v54 = vadd.f32 %v3043_v39, %v6435_v36  ;;  %v3277_v52 = vpack.c.bf16 %v3225_v32, %v3221_v55  ;;  %v5435_v36 = vld [vmem:[#allocation10 + $0x18] sm:$0xff]   ;;  %v3155_v47 = vadd.f32 %v3154_v19, %v3042_v22 }
 0x256   : > { %v3045_v7 = vpop.f32.mrf.mxu0  ;;  %v2840_v39 = vadd.f32 %v6459_v13, %v6380_v46 }
 0x257   : > { %v3158_v15 = vpop.f32.mrf.mxu1  ;;  %v3278_v12 = vpack.c.bf16 %v3226_v41, %v3222_v40  ;;  %v3046_v62 = vadd.f32 %v3045_v7, %v2933_v45  ;;  %4844 = vmatpush3.bf16.msra.mxu1 %v5433_v3  ;;  %v3157_v16 = vadd.f32 %v3156_v14, %v3044_v54  ;;  %4778 = vmatpush3.bf16.msra.mxu0 %v5435_v36  ;;  %v3229_v23 = vmax.f32 %v3155_v47, 0.0 }
 0x258   : > { %v3047_v60 = vpop.f32.mrf.mxu0  ;;  %4837 = vmatprep.subr.bf16.mxu1 %v5434_v50  ;;  %v2953_v55 = vadd.f32 %v6461_v57, %v2840_v39 }
 0x259   : > { %v3160_v29 = vpop.f32.mrf.mxu1  ;;  %v3159_v9 = vadd.f32 %v3158_v15, %v3046_v62  ;;  %v3048_v33 = vadd.f32 %v3047_v60, %v2935_v28  ;;  %3860 = vmatprep.mubr.bf16.mxu1 %v3278_v12  ;;  %v3230_v26 = vmax.f32 %v3157_v16, 0.0  ;;  %v2850_v16 = vadd.f32 %v6473_v51, %v6380_v46 }
 0x25a   : > { %v3051_v8 = vpop.f32.mrf.mxu0  ;;  %3861 = vmatmul.mubr.bf16.gmra.mxu1 %v3277_v52 }
 0x25b   : > { %v3164_v44 = vpop.f32.mrf.mxu1  ;;  %v3161_v34 = vadd.f32 %v3160_v29, %v3048_v33  ;;  %v3233_v35 = vmax.f32 %v3159_v9, 0.0  ;;  %4845 = vmatpush3.bf16.msra.mxu1 %v5435_v36  ;;  %v3052_v30 = vadd.f32 %v3051_v8, %v6442_v0  ;;  %v2842_v0 = vadd.f32 %v6465_v48, %v6383_v37 }
 0x25c   : > { %v3053_v31 = vpop.f32.mrf.mxu0 }
 0x25d   : > { %v3166_v43 = vpop.f32.mrf.mxu1  ;;  %v3234_v11 = vmax.f32 %v3161_v34, 0.0  ;;  %v3054_v18 = vadd.f32 %v3053_v31, %v6449_v59  ;;  %v3281_v5 = vpack.c.bf16 %v3233_v35, %v3229_v23  ;;  %v3165_v59 = vadd.f32 %v3164_v44, %v3052_v30 }
 0x25e   : > { %v3055_v24 = vpop.f32.mrf.mxu0  ;;  %v2955_v56 = vadd.f32 %v6467_v6, %v2842_v0  ;;  %v2963_v35 = vadd.f32 %v6475_v17, %v2850_v16 }
 0x25f   : > { %v3168_v10 = vpop.f32.mrf.mxu1  ;;  %v3282_v61 = vpack.c.bf16 %v3234_v11, %v3230_v26  ;;  %v3056_v19 = vadd.f32 %v3055_v24, %v2943_v25  ;;  %v3167_v38 = vadd.f32 %v3166_v43, %v3054_v18  ;;  %v3237_v15 = vmax.f32 %v3165_v59, 0.0  ;;  %v6825_v59 = vld [vmem:[#allocation23_spill] sm:$0xff] }
 0x260   : > { %v3057_v2 = vpop.f32.mrf.mxu0 }
 0x261   : > { %v3170_v32 = vpop.f32.mrf.mxu1  ;;  %v3169_v14 = vadd.f32 %v3168_v10, %v3056_v19  ;;  %v3058_v3 = vadd.f32 %v3057_v2, %v2945_v53  ;;  %3870 = vmatprep.mubr.bf16.mxu1 %v3282_v61  ;;  %v3238_v22 = vmax.f32 %v3167_v38, 0.0  ;;  %v2860_v61 = vadd.f32 %v6487_v42, %v6380_v46  ;;  %v6826_v46 = vld [vmem:[#allocation24_spill] sm:$0xff] }
 0x262   : > { %v3061_v45 = vpop.f32.mrf.mxu0  ;;  %3871 = vmatmul.mubr.bf16.gmra.mxu1 %v3281_v5 }
 0x263   : > { %v3174_v40 = vpop.f32.mrf.mxu1  ;;  %v3171_v58 = vadd.f32 %v3170_v32, %v3058_v3  ;;  %v3241_v41 = vmax.f32 %v3169_v14, 0.0  ;;  %v3062_v28 = vadd.f32 %v3061_v45, %v6456_v27  ;;  %v2852_v27 = vadd.f32 %v6479_v49, %v6383_v37 }
 0x264   : > { %v3063_v54 = vpop.f32.mrf.mxu0  ;;  %v2973_v45 = vadd.f32 %v6825_v59, %v2860_v61  ;;  %v3363_v61 = vld [vmem:[%s6728_s4] sm:$0x3] }
 0x265   : > { %v3176_v50 = vpop.f32.mrf.mxu1  ;;  %v3242_v7 = vmax.f32 %v3171_v58, 0.0  ;;  %v3064_v13 = vadd.f32 %v3063_v54, %v6463_v63  ;;  %v3285_v48 = vpack.c.bf16 %v3241_v41, %v3237_v15  ;;  %v3175_v63 = vadd.f32 %v3174_v40, %v3062_v28  ;;  %v6827_v41 = vld [vmem:[#allocation22_spill] sm:$0xff] }
 0x266   : > { %v3065_v12 = vpop.f32.mrf.mxu0  ;;  %v2965_v23 = vadd.f32 %v6481_v1, %v2852_v27  ;;  %v5439_v27 = vld [vmem:[#allocation10 + $0x8] sm:$0xff]  }
 0x267   : > { %v3178_v62 = vpop.f32.mrf.mxu1  ;;  %v3286_v52 = vpack.c.bf16 %v3242_v7, %v3238_v22  ;;  %v3066_v60 = vadd.f32 %v3065_v12, %v2953_v55  ;;  %v3177_v57 = vadd.f32 %v3176_v50, %v3064_v13  ;;  %v3245_v25 = vmax.f32 %v3175_v63, 0.0  ;;  %v6828_v22 = vld [vmem:[#allocation26_spill] sm:$0xff] }
 0x268   : > { %v3067_v29 = vpop.f32.mrf.mxu0  ;;  %v5436_v63 = vld [vmem:[#allocation10 + $0x50] sm:$0xff]  }
 0x269   : > { %v3180_v36 = vpop.f32.mrf.mxu1  ;;  %v3179_v9 = vadd.f32 %v3178_v62, %v3066_v60  ;;  %v3068_v33 = vadd.f32 %v3067_v29, %v2955_v56  ;;  %3880 = vmatprep.mubr.bf16.mxu1 %v3286_v52  ;;  %v3246_v31 = vmax.f32 %v3177_v57, 0.0  ;;  %4779 = vmatprep.subr.bf16.mxu0 %v5436_v63 }
 0x26a   : > { %v3071_v47 = vpop.f32.mrf.mxu0  ;;  %3881 = vmatmul.mubr.bf16.gmra.mxu1 %v3285_v48  ;;  %4838 = vmatprep.subr.bf16.mxu1 %v5436_v63 }
 0x26b   : > { %v3184_v8 = vpop.f32.mrf.mxu1  ;;  %v3181_v6 = vadd.f32 %v3180_v36, %v3068_v33  ;;  %v3249_v44 = vmax.f32 %v3179_v9, 0.0  ;;  %v3072_v26 = vadd.f32 %v3071_v47, %v6470_v4  ;;  %v6824_v4 = vld [vmem:[#allocation25_spill] sm:$0xff]  ;;  %v5437_v47 = vld [vmem:[#allocation10 + $0x10] sm:$0xff]  }
 0x26c   : > { %v3073_v21 = vpop.f32.mrf.mxu0  ;;  %v2862_v39 = vadd.f32 %v6824_v4, %v6383_v37  ;;  %4780 = vmatpush3.bf16.msra.mxu0 %v5437_v47  ;;  %4846 = vmatpush3.bf16.msra.mxu1 %v5437_v47 }
 0x26d   : > { %v3186_v34 = vpop.f32.mrf.mxu1  ;;  %v3250_v43 = vmax.f32 %v3181_v6, 0.0  ;;  %v3074_v51 = vadd.f32 %v3073_v21, %v6477_v20  ;;  %v3289_v49 = vpack.c.bf16 %v3249_v44, %v3245_v25  ;;  %v3185_v20 = vadd.f32 %v3184_v8, %v3072_v26  ;;  %v5438_v8 = vld [vmem:[#allocation10 + $0x48] sm:$0xff]   ;;  %v5440_v6 = vld [vmem:[#allocation10 + $0x40] sm:$0xff]  }
 0x26e   : > { %v3075_v11 = vpop.f32.mrf.mxu0  ;;  %v2975_v7 = vadd.f32 %v6828_v22, %v2862_v39  ;;  %4781 = vmatprep.subr.bf16.mxu0 %v5438_v8  ;;  %4839 = vmatprep.subr.bf16.mxu1 %v5438_v8  ;;  %v5441_v44 = vld [vmem:[#allocation10] sm:$0xff]  }
 0x26f   : > { %v3188_v18 = vpop.f32.mrf.mxu1  ;;  %v3290_v30 = vpack.c.bf16 %v3250_v43, %v3246_v31  ;;  %v3076_v24 = vadd.f32 %v3075_v11, %v2963_v35  ;;  %v3187_v17 = vadd.f32 %v3186_v34, %v3074_v51  ;;  %v3253_v58 = vmax.f32 %v3185_v20, 0.0 }
 0x270   : > { %v3077_v10 = vpop.f32.mrf.mxu0  ;;  %4782 = vmatpush3.bf16.msra.mxu0 %v5439_v27  ;;  %4847 = vmatpush3.bf16.msra.mxu1 %v5439_v27 }
 0x271   : > { %v3190_v53 = vpop.f32.mrf.mxu1  ;;  %v3189_v19 = vadd.f32 %v3188_v18, %v3076_v24  ;;  %v3078_v5 = vadd.f32 %v3077_v10, %v2965_v23  ;;  %3890 = vmatprep.mubr.bf16.mxu1 %v3290_v30  ;;  %v3254_v40 = vmax.f32 %v3187_v17, 0.0  ;;  %4783 = vmatprep.subr.bf16.mxu0 %v5440_v6 }
 0x272   : > { %v3081_v2 = vpop.f32.mrf.mxu0  ;;  %3891 = vmatmul.mubr.bf16.gmra.mxu1 %v3289_v49  ;;  %4840 = vmatprep.subr.bf16.mxu1 %v5440_v6 }
 0x273   : > { %v3194_v32 = vpop.f32.mrf.mxu1  ;;  %v3191_v1 = vadd.f32 %v3190_v53, %v3078_v5  ;;  %v3257_v38 = vmax.f32 %v3189_v19, 0.0  ;;  %v3082_v54 = vadd.f32 %v3081_v2, %v6827_v41  ;;  %v6829_v19 = vld [vmem:[#allocation31_spill] sm:$0xff] }
 0x274   : > { %v3083_v14 = vpop.f32.mrf.mxu0  ;;  %4784 = vmatpush3.bf16.msra.mxu0 %v5441_v44  ;;  %4848 = vmatpush3.bf16.msra.mxu1 %v5441_v44  ;;  %v6830_v5 = vsub.s32 1, %v6829_v19  ;;  %v6831_v2 = vsub.s32 0, %v6829_v19 }
 0x275   : > { %v3196_v3 = vpop.f32.mrf.mxu1  ;;  %v3258_v0 = vmax.f32 %v3191_v1, 0.0  ;;  %v3084_v42 = vadd.f32 %v3083_v14, %v6826_v46  ;;  %v3293_v37 = vpack.c.bf16 %v3257_v38, %v3253_v58  ;;  %v3195_v52 = vadd.f32 %v3194_v32, %v3082_v54 }
 0x276   : > { %v3085_v50 = vpop.f32.mrf.mxu0  ;;  %v6576_v20 = vrot.slane %v3363_v61, %v6830_v5  ;;  %v6580_v32 = vrot.slane %v3363_v61, %v6831_v2 }
 0x277   : > { %v3198_v55 = vpop.f32.mrf.mxu1  ;;  %v3294_v13 = vpack.c.bf16 %v3258_v0, %v3254_v40  ;;  %v3086_v15 = vadd.f32 %v3085_v50, %v2973_v45  ;;  %v3197_v12 = vadd.f32 %v3196_v3, %v3084_v42  ;;  %v3261_v57 = vmax.f32 %v3195_v52, 0.0 }
 0x278   : > { %v3087_v28 = vpop.f32.mrf.mxu0 }
 0x279   : > { %v3199_v62 = vadd.f32 %v3198_v55, %v3086_v15  ;;  %v3088_v56 = vadd.f32 %v3087_v28, %v2975_v7  ;;  %3900 = vmatprep.mubr.bf16.mxu1 %v3294_v13  ;;  %v3200_v60 = vpop.f32.mrf.mxu1  ;;  %v3262_v36 = vmax.f32 %v3197_v12, 0.0 }
 0x27a   : > { %3901 = vmatmul.mubr.bf16.gmra.mxu1 %v3293_v37 }
 0x27b   : > { %v3201_v48 = vadd.f32 %v3200_v60, %v3088_v56  ;;  %v3265_v29 = vmax.f32 %v3199_v62, 0.0 }
 0x27d   : > { %v3266_v16 = vmax.f32 %v3201_v48, 0.0  ;;  %v3297_v33 = vpack.c.bf16 %v3265_v29, %v3261_v57 }
 0x27f   : > { %v3298_v9 = vpack.c.bf16 %v3266_v16, %v3262_v36 }
 0x281   : > { %3910 = vmatprep.mubr.bf16.mxu1 %v3298_v9 }
 0x282   : > { %3911 = vmatmul.mubr.bf16.gmra.mxu1 %v3297_v33 }
 0x28a   : > { %v3729_v21 = vpop.f32.mrf.mxu0 }
 0x28b   : > { %v3730_v3 = vadd.f32 %v3729_v21, %v6580_v32 }
 0x28c   : > { %v3731_v34 = vpop.f32.mrf.mxu0 }
 0x28d   : > { %v3732_v38 = vadd.f32 %v3731_v34, %v6576_v20 }
 0x28e   : > { %v3733_v35 = vpop.f32.mrf.mxu0 }
 0x28f   : > { %v3734_v14 = vadd.f32 %v3733_v35, %v6580_v32 }
 0x290   : > { %v3735_v31 = vpop.f32.mrf.mxu0 }
 0x291   : > { %v3736_v45 = vadd.f32 %v3735_v31, %v6576_v20 }
 0x292   : > { %v3739_v43 = vpop.f32.mrf.mxu0 }
 0x293   : > { %v3740_v62 = vadd.f32 %v3739_v43, %v6580_v32 }
 0x294   : > { %v3741_v51 = vpop.f32.mrf.mxu0 }
 0x295   : > { %v3742_v37 = vadd.f32 %v3741_v51, %v6576_v20 }
 0x296   : > { %v3743_v25 = vpop.f32.mrf.mxu0 }
 0x297   : > { %v3744_v28 = vadd.f32 %v3743_v25, %v6580_v32 }
 0x298   : > { %v3745_v26 = vpop.f32.mrf.mxu0 }
 0x299   : > { %v3746_v60 = vadd.f32 %v3745_v26, %v6576_v20 }
 0x29a   : > { %v3749_v11 = vpop.f32.mrf.mxu0 }
 0x29b   : > { %v3750_v31 = vadd.f32 %v3749_v11, %v6580_v32 }
 0x29c   : > { %v3751_v18 = vpop.f32.mrf.mxu0 }
 0x29d   : > { %v3752_v21 = vadd.f32 %v3751_v18, %v6576_v20 }
 0x29e   : > { %v3753_v23 = vpop.f32.mrf.mxu0 }
 0x29f   : > { %v3754_v34 = vadd.f32 %v3753_v23, %v6580_v32 }
 0x2a0   : > { %v3755_v30 = vpop.f32.mrf.mxu0 }
 0x2a1   : > { %v3756_v25 = vadd.f32 %v3755_v30, %v6576_v20 }
 0x2a2   : > { %v6561_v24 = vpop.f32.mrf.mxu0 }
 0x2a4   : > { %v6563_v49 = vpop.f32.mrf.mxu0 }
 0x2a5   : > { %v3762_v11 = vadd.f32 %v6563_v49, %v6576_v20 }
 0x2a6   : > { %v6565_v10 = vpop.f32.mrf.mxu0 }
 0x2a7   : > { %v3764_v30 = vadd.f32 %v6565_v10, %v6580_v32 }
 0x2a8   : > { %v6567_v53 = vpop.f32.mrf.mxu0 }
 0x2aa   : > { %v6572_v17 = vpop.f32.mrf.mxu0 }
 0x2ac   : > { %v6582_v39 = vpop.f32.mrf.mxu0 }
 0x2ae   : > { %v6588_v46 = vpop.f32.mrf.mxu0 }
 0x2b0   : > { %v6590_v7 = vpop.f32.mrf.mxu0 }
 0x2b2   : > { %v6596_v36 = vpop.f32.mrf.mxu0 }
 0x2b4   : > { %v6598_v27 = vpop.f32.mrf.mxu0 }
 0x2b6   : > { %v3783_v19 = vpop.f32.mrf.mxu0 }
 0x2b8   : > { %v3785_v23 = vpop.f32.mrf.mxu0 }
 0x30a   : > { %v3842_v4 = vpop.f32.mrf.mxu1 }
 0x30b   : > { %v3843_v42 = vadd.f32 %v3842_v4, %v3730_v3 }
 0x30c   : > { %v3844_v1 = vpop.f32.mrf.mxu1 }
 0x30d   : > { %v3845_v40 = vadd.f32 %v3844_v1, %v3732_v38  ;;  %v3921_v13 = vmax.f32 %v3843_v42, 0.0 }
 0x30e   : > { %v3846_v59 = vpop.f32.mrf.mxu1 }
 0x30f   : > { %v3847_v0 = vadd.f32 %v3846_v59, %v3734_v14  ;;  %v3922_v55 = vmax.f32 %v3845_v40, 0.0  ;;  %v3760_v40 = vadd.f32 %v6561_v24, %v6580_v32 }
 0x310   : > { %v3848_v58 = vpop.f32.mrf.mxu1 }
 0x311   : > { %v3849_v41 = vadd.f32 %v3848_v58, %v3736_v45  ;;  %v3923_v54 = vmax.f32 %v3847_v0, 0.0  ;;  %v3766_v58 = vadd.f32 %v6567_v53, %v6576_v20  ;;  %v3774_v53 = vadd.f32 %v6588_v46, %v6580_v32 }
 0x312   : > { %v3852_v50 = vpop.f32.mrf.mxu1 }
 0x313   : > { %v3924_v22 = vmax.f32 %v3849_v41, 0.0  ;;  %v3953_v56 = vpack.c.bf16 %v3923_v54, %v3921_v13  ;;  %v3853_v16 = vadd.f32 %v3852_v50, %v3740_v62  ;;  %v3789_v50 = vpop.f32.mrf.mxu0  ;;  %v3772_v62 = vadd.f32 %v6582_v39, %v6576_v20 }
 0x314   : > { %v3854_v15 = vpop.f32.mrf.mxu1 }
 0x315   : > { %v3954_v12 = vpack.c.bf16 %v3924_v22, %v3922_v55  ;;  %v3855_v48 = vadd.f32 %v3854_v15, %v3742_v37  ;;  %v3925_v6 = vmax.f32 %v3853_v16, 0.0 }
 0x316   : > { %v3856_v52 = vpop.f32.mrf.mxu1 }
 0x317   : > { %v3857_v29 = vadd.f32 %v3856_v52, %v3744_v28  ;;  %4136 = vmatprep.mubr.bf16.mxu0 %v3954_v12  ;;  %v3926_v47 = vmax.f32 %v3855_v48, 0.0  ;;  %v3791_v28 = vpop.f32.mrf.mxu0  ;;  %v3770_v52 = vadd.f32 %v6572_v17, %v6580_v32 }
 0x318   : > { %v3858_v57 = vpop.f32.mrf.mxu1  ;;  %4137 = vmatmul.mubr.bf16.vlgmr.msra.gmra.mxu0 %v3953_v56 }
 0x319   : > { %v3859_v9 = vadd.f32 %v3858_v57, %v3746_v60  ;;  %v3927_v33 = vmax.f32 %v3857_v29, 0.0  ;;  %v3776_v29 = vadd.f32 %v6590_v7, %v6576_v20  ;;  %v3784_v7 = vadd.f32 %v3783_v19, %v6580_v32 }
 0x31a   : > { %v3862_v63 = vpop.f32.mrf.mxu1 }
 0x31b   : > { %v3928_v8 = vmax.f32 %v3859_v9, 0.0  ;;  %v3955_v43 = vpack.c.bf16 %v3927_v33, %v3925_v6  ;;  %v3863_v5 = vadd.f32 %v3862_v63, %v3750_v31  ;;  %v3793_v9 = vpop.f32.mrf.mxu0  ;;  %v3780_v31 = vadd.f32 %v6596_v36, %v6580_v32 }
 0x31c   : > { %v3864_v44 = vpop.f32.mrf.mxu1  ;;  %v3792_v36 = vadd.f32 %v3791_v28, %v6576_v20 }
 0x31d   : > { %v3956_v35 = vpack.c.bf16 %v3928_v8, %v3926_v47  ;;  %v3865_v26 = vadd.f32 %v3864_v44, %v3752_v21  ;;  %v3929_v3 = vmax.f32 %v3863_v5, 0.0  ;;  %v3795_v44 = vpop.f32.mrf.mxu0 }
 0x31e   : > { %v3866_v51 = vpop.f32.mrf.mxu1 }
 0x31f   : > { %v3867_v61 = vadd.f32 %v3866_v51, %v3754_v34  ;;  %4144 = vmatprep.mubr.bf16.mxu0 %v3956_v35  ;;  %v3930_v18 = vmax.f32 %v3865_v26, 0.0  ;;  %v3782_v34 = vadd.f32 %v6598_v27, %v6576_v20  ;;  %v3799_v5 = vpop.f32.mrf.mxu0 }
 0x320   : > { %v3868_v2 = vpop.f32.mrf.mxu1  ;;  %4145 = vmatmul.mubr.bf16.gmra.mxu0 %v3955_v43 }
 0x321   : > { %v3869_v4 = vadd.f32 %v3868_v2, %v3756_v25  ;;  %v3931_v1 = vmax.f32 %v3867_v61, 0.0  ;;  %v3786_v25 = vadd.f32 %v3785_v23, %v6576_v20 }
 0x322   : > { %v3872_v38 = vpop.f32.mrf.mxu1 }
 0x323   : > { %v3932_v14 = vmax.f32 %v3869_v4, 0.0  ;;  %v3957_v0 = vpack.c.bf16 %v3931_v1, %v3929_v3  ;;  %v3873_v55 = vadd.f32 %v3872_v38, %v3760_v40 }
 0x324   : > { %v3874_v59 = vpop.f32.mrf.mxu1 }
 0x325   : > { %v3958_v45 = vpack.c.bf16 %v3932_v14, %v3930_v18  ;;  %v3875_v41 = vadd.f32 %v3874_v59, %v3762_v11  ;;  %v3933_v12 = vmax.f32 %v3873_v55, 0.0  ;;  %v3801_v14 = vpop.f32.mrf.mxu0  ;;  %v3794_v11 = vadd.f32 %v3793_v9, %v6580_v32 }
 0x326   : > { %v3876_v42 = vpop.f32.mrf.mxu1 }
 0x327   : > { %v3877_v54 = vadd.f32 %v3876_v42, %v3764_v30  ;;  %4152 = vmatprep.mubr.bf16.mxu0 %v3958_v45  ;;  %v3934_v10 = vmax.f32 %v3875_v41, 0.0  ;;  %v3790_v30 = vadd.f32 %v3789_v50, %v6580_v32  ;;  %v3803_v41 = vpop.f32.mrf.mxu0  ;;  %v3802_v50 = vadd.f32 %v3801_v14, %v6576_v20 }
 0x328   : > { %v3878_v22 = vpop.f32.mrf.mxu1  ;;  %4153 = vmatmul.mubr.bf16.gmra.mxu0 %v3957_v0  ;;  %v3796_v0 = vadd.f32 %v3795_v44, %v6576_v20 }
 0x329   : > { %v3879_v49 = vadd.f32 %v3878_v22, %v3766_v58  ;;  %v3935_v13 = vmax.f32 %v3877_v54, 0.0 }
 0x32a   : > { %v3882_v15 = vpop.f32.mrf.mxu1 }
 0x32b   : > { %v3936_v37 = vmax.f32 %v3879_v49, 0.0  ;;  %v3959_v60 = vpack.c.bf16 %v3935_v13, %v3933_v12  ;;  %v3883_v33 = vadd.f32 %v3882_v15, %v3770_v52 }
 0x32c   : > { %v3884_v24 = vpop.f32.mrf.mxu1 }
 0x32d   : > { %v3960_v56 = vpack.c.bf16 %v3936_v37, %v3934_v10  ;;  %v3885_v16 = vadd.f32 %v3884_v24, %v3772_v62  ;;  %v3937_v21 = vmax.f32 %v3883_v33, 0.0  ;;  %v3805_v37 = vpop.f32.mrf.mxu0  ;;  %v3804_v24 = vadd.f32 %v3803_v41, %v6580_v32 }
 0x32e   : > { %v3886_v48 = vpop.f32.mrf.mxu1 }
 0x32f   : > { %v3887_v57 = vadd.f32 %v3886_v48, %v3774_v53  ;;  %4160 = vmatprep.mubr.bf16.mxu0 %v3960_v56  ;;  %v3938_v46 = vmax.f32 %v3885_v16, 0.0  ;;  %v3800_v53 = vadd.f32 %v3799_v5, %v6580_v32 }
 0x330   : > { %v3888_v63 = vpop.f32.mrf.mxu1  ;;  %4161 = vmatmul.mubr.bf16.gmra.mxu0 %v3959_v60  ;;  %v3806_v60 = vadd.f32 %v3805_v37, %v6576_v20  ;;  %v6638_v20 = vld [vmem:[%s6730_s6] ss:$0 sm:$0xff] }
 0x331   : > { %v3889_v39 = vadd.f32 %v3888_v63, %v3776_v29  ;;  %v3939_v47 = vmax.f32 %v3887_v57, 0.0 }
 0x332   : > { %v3892_v8 = vpop.f32.mrf.mxu1 }
 0x333   : > { %v3940_v6 = vmax.f32 %v3889_v39, 0.0  ;;  %v3961_v43 = vpack.c.bf16 %v3939_v47, %v3937_v21  ;;  %v3893_v2 = vadd.f32 %v3892_v8, %v3780_v31 }
 0x334   : > { %v3894_v17 = vpop.f32.mrf.mxu1 }
 0x335   : > { %v3962_v35 = vpack.c.bf16 %v3940_v6, %v3938_v46  ;;  %v3895_v26 = vadd.f32 %v3894_v17, %v3782_v34  ;;  %v3941_v3 = vmax.f32 %v3893_v2, 0.0 }
 0x336   : > { %v3896_v51 = vpop.f32.mrf.mxu1 }
 0x337   : > { %v3897_v61 = vadd.f32 %v3896_v51, %v3784_v7  ;;  %4168 = vmatprep.mubr.bf16.mxu1 %v3962_v35  ;;  %v3942_v18 = vmax.f32 %v3895_v26, 0.0 }
 0x338   : > { %v3898_v4 = vpop.f32.mrf.mxu1  ;;  %4169 = vmatmul.mubr.bf16.vlgmr.msra.gmra.mxu1 %v3961_v43 }
 0x339   : > { %v3899_v1 = vadd.f32 %v3898_v4, %v3786_v25  ;;  %v3943_v38 = vmax.f32 %v3897_v61, 0.0 }
 0x33a   : > { %v3902_v27 = vpop.f32.mrf.mxu1 }
 0x33b   : > { %v3944_v19 = vmax.f32 %v3899_v1, 0.0  ;;  %v3963_v45 = vpack.c.bf16 %v3943_v38, %v3941_v3  ;;  %v3903_v54 = vadd.f32 %v3902_v27, %v3790_v30 }
 0x33c   : > { %v3904_v59 = vpop.f32.mrf.mxu1 }
 0x33d   : > { %v3964_v23 = vpack.c.bf16 %v3944_v19, %v3942_v18  ;;  %v3905_v42 = vadd.f32 %v3904_v59, %v3792_v36  ;;  %v3945_v28 = vmax.f32 %v3903_v54, 0.0 }
 0x33e   : > { %v3906_v40 = vpop.f32.mrf.mxu1 }
 0x33f   : > { %v3907_v58 = vadd.f32 %v3906_v40, %v3794_v11  ;;  %4176 = vmatprep.mubr.bf16.mxu1 %v3964_v23  ;;  %v3946_v15 = vmax.f32 %v3905_v42, 0.0 }
 0x340   : > { %v3908_v55 = vpop.f32.mrf.mxu1  ;;  %4177 = vmatmul.mubr.bf16.gmra.mxu1 %v3963_v45 }
 0x341   : > { %v3909_v22 = vadd.f32 %v3908_v55, %v3796_v0  ;;  %v3947_v49 = vmax.f32 %v3907_v58, 0.0 }
 0x342   : > { %v3912_v13 = vpop.f32.mrf.mxu1 }
 0x343   : > { %v3948_v10 = vmax.f32 %v3909_v22, 0.0  ;;  %v3965_v56 = vpack.c.bf16 %v3947_v49, %v3945_v28  ;;  %v3913_v16 = vadd.f32 %v3912_v13, %v3800_v53 }
 0x344   : > { %v3914_v12 = vpop.f32.mrf.mxu1 }
 0x345   : > { %v3966_v62 = vpack.c.bf16 %v3948_v10, %v3946_v15  ;;  %v3915_v48 = vadd.f32 %v3914_v12, %v3802_v50  ;;  %v3949_v47 = vmax.f32 %v3913_v16, 0.0 }
 0x346   : > { %v3916_v52 = vpop.f32.mrf.mxu1 }
 0x347   : > { %v3917_v29 = vadd.f32 %v3916_v52, %v3804_v24  ;;  %4184 = vmatprep.mubr.bf16.mxu1 %v3966_v62  ;;  %v3950_v63 = vmax.f32 %v3915_v48, 0.0 }
 0x348   : > { %v3918_v57 = vpop.f32.mrf.mxu1  ;;  %4185 = vmatmul.mubr.bf16.gmra.mxu1 %v3965_v56 }
 0x349   : > { %v3919_v9 = vadd.f32 %v3918_v57, %v3806_v60  ;;  %v3951_v33 = vmax.f32 %v3917_v29, 0.0 }
 0x34b   : > { %v3952_v39 = vmax.f32 %v3919_v9, 0.0  ;;  %v3967_v46 = vpack.c.bf16 %v3951_v33, %v3949_v47 }
 0x34d   : > { %v3968_v8 = vpack.c.bf16 %v3952_v39, %v3950_v63 }
 0x34f   : > { %4192 = vmatprep.mubr.bf16.mxu1 %v3968_v8 }
 0x350   : > { %4193 = vmatmul.mubr.bf16.gmra.mxu1 %v3967_v46 }
 0x3d8   : > { %v4785_v32 = vpop.f32.mrf.mxu0 }
 0x3da   : > { %v4786_v6 = vpop.f32.mrf.mxu0 }
 0x3db   : > { %v4787_v44 = vadd.f32 %v4786_v6, %v4785_v32 }
 0x3dc   : > { %v4788_v21 = vpop.f32.mrf.mxu0 }
 0x3dd   : > { %v4139_v17 = vadd.f32 %v4787_v44, %v6638_v20 }
 0x3de   : > { %v4789_v34 = vpop.f32.mrf.mxu0 }
 0x3df   : > { %4201 = vst [vmem:[%s6641_s22] sm:$0xff] %v4139_v17  ;;  %v4790_v7 = vadd.f32 %v4789_v34, %v4788_v21 }
 0x3e0   : > { %v4791_v35 = vpop.f32.mrf.mxu0 }
 0x3e1   : > { %v4142_v31 = vadd.f32 %v4790_v7, %v6638_v20 }
 0x3e2   : > { %v4792_v43 = vpop.f32.mrf.mxu0 }
 0x3e3   : > { %4202 = vst [vmem:[%s6641_s22 + $0x8] sm:$0xff] %v4142_v31  ;;  %v4793_v51 = vadd.f32 %v4792_v43, %v4791_v35 }
 0x3e4   : > { %v4794_v25 = vpop.f32.mrf.mxu0 }
 0x3e5   : > { %v4147_v26 = vadd.f32 %v4793_v51, %v6638_v20 }
 0x3e6   : > { %v4795_v61 = vpop.f32.mrf.mxu0 }
 0x3e7   : > { %4203 = vst [vmem:[%s6641_s22 + $0x10] sm:$0xff] %v4147_v26  ;;  %v4796_v5 = vadd.f32 %v4795_v61, %v4794_v25 }
 0x3e8   : > { %v4797_v2 = vpop.f32.mrf.mxu0 }
 0x3e9   : > { %v4150_v4 = vadd.f32 %v4796_v5, %v6638_v20 }
 0x3ea   : > { %v4798_v1 = vpop.f32.mrf.mxu0 }
 0x3eb   : > { %4204 = vst [vmem:[%s6641_s22 + $0x18] sm:$0xff] %v4150_v4  ;;  %v4799_v38 = vadd.f32 %v4798_v1, %v4797_v2 }
 0x3ec   : > { %v4800_v27 = vpop.f32.mrf.mxu0 }
 0x3ed   : > { %v4155_v18 = vadd.f32 %v4799_v38, %v6638_v20 }
 0x3ee   : > { %v4801_v19 = vpop.f32.mrf.mxu0 }
 0x3ef   : > { %4205 = vst [vmem:[%s6641_s22 + $0x20] sm:$0xff] %v4155_v18  ;;  %v4802_v14 = vadd.f32 %v4801_v19, %v4800_v27 }
 0x3f0   : > { %v4803_v3 = vpop.f32.mrf.mxu0 }
 0x3f1   : > { %v4158_v59 = vadd.f32 %v4802_v14, %v6638_v20 }
 0x3f2   : > { %v4804_v36 = vpop.f32.mrf.mxu0 }
 0x3f3   : > { %4206 = vst [vmem:[%s6641_s22 + $0x28] sm:$0xff] %v4158_v59  ;;  %v4805_v11 = vadd.f32 %v4804_v36, %v4803_v3 }
 0x3f4   : > { %v4806_v23 = vpop.f32.mrf.mxu0 }
 0x3f5   : > { %v4163_v30 = vadd.f32 %v4805_v11, %v6638_v20 }
 0x3f6   : > { %v4807_v45 = vpop.f32.mrf.mxu0 }
 0x3f7   : > { %4207 = vst [vmem:[%s6641_s22 + $0x30] sm:$0xff] %v4163_v30  ;;  %v4808_v40 = vadd.f32 %v4807_v45, %v4806_v23 }
 0x3f8   : > { %v4809_v0 = vpop.f32.mrf.mxu1 }
 0x3f9   : > { %v4166_v42 = vadd.f32 %v4808_v40, %v6638_v20 }
 0x3fa   : > { %v4810_v58 = vpop.f32.mrf.mxu1 }
 0x3fb   : > { %4208 = vst [vmem:[%s6641_s22 + $0x38] sm:$0xff] %v4166_v42  ;;  %v4811_v41 = vadd.f32 %v4810_v58, %v4809_v0 }
 0x3fc   : > { %v4812_v54 = vpop.f32.mrf.mxu1 }
 0x3fd   : > { %v4171_v55 = vadd.f32 %v4811_v41, %v6638_v20 }
 0x3fe   : > { %v4813_v22 = vpop.f32.mrf.mxu1 }
 0x3ff   : > { %4209 = vst [vmem:[%s6641_s22 + $0x40] sm:$0xff] %v4171_v55  ;;  %v4814_v49 = vadd.f32 %v4813_v22, %v4812_v54 }
 0x400   : > { %v4815_v13 = vpop.f32.mrf.mxu1 }
 0x401   : > { %v4174_v15 = vadd.f32 %v4814_v49, %v6638_v20 }
 0x402   : > { %v4816_v10 = vpop.f32.mrf.mxu1 }
 0x403   : > { %4210 = vst [vmem:[%s6641_s22 + $0x48] sm:$0xff] %v4174_v15  ;;  %v4817_v37 = vadd.f32 %v4816_v10, %v4815_v13 }
 0x404   : > { %v4818_v28 = vpop.f32.mrf.mxu1 }
 0x405   : > { %v4179_v12 = vadd.f32 %v4817_v37, %v6638_v20 }
 0x406   : > { %v4819_v50 = vpop.f32.mrf.mxu1 }
 0x407   : > { %4211 = vst [vmem:[%s6641_s22 + $0x50] sm:$0xff] %v4179_v12  ;;  %v4820_v24 = vadd.f32 %v4819_v50, %v4818_v28 }
 0x408   : > { %v4821_v62 = vpop.f32.mrf.mxu1 }
 0x409   : > { %v4182_v53 = vadd.f32 %v4820_v24, %v6638_v20 }
 0x40a   : > { %v4822_v56 = vpop.f32.mrf.mxu1 }
 0x40b   : > { %4212 = vst [vmem:[%s6641_s22 + $0x58] sm:$0xff] %v4182_v53  ;;  %v4823_v52 = vadd.f32 %v4822_v56, %v4821_v62 }
 0x40c   : > { %v4824_v60 = vpop.f32.mrf.mxu1 }
 0x40d   : > { %v4187_v48 = vadd.f32 %v4823_v52, %v6638_v20 }
 0x40e   : > { %v4825_v29 = vpop.f32.mrf.mxu1 }
 0x40f   : > { %4213 = vst [vmem:[%s6641_s22 + $0x60] sm:$0xff] %v4187_v48  ;;  %v4826_v16 = vadd.f32 %v4825_v29, %v4824_v60 }
 0x410   : > { %v4827_v57 = vpop.f32.mrf.mxu1 }
 0x411   : > { %v4190_v9 = vadd.f32 %v4826_v16, %v6638_v20 }
 0x412   : > { %v4828_v33 = vpop.f32.mrf.mxu1 }
 0x413   : > { %4214 = vst [vmem:[%s6641_s22 + $0x68] sm:$0xff] %v4190_v9  ;;  %v4829_v63 = vadd.f32 %v4828_v33, %v4827_v57 }
 0x414   : > { %v4830_v39 = vpop.f32.mrf.mxu1 }
 0x415   : > { %v4195_v47 = vadd.f32 %v4829_v63, %v6638_v20 }
 0x416   : > { %v4831_v8 = vpop.f32.mrf.mxu1 }
 0x417   : > { %4215 = vst [vmem:[%s6641_s22 + $0x70] sm:$0xff] %v4195_v47  ;;  %v4832_v46 = vadd.f32 %v4831_v8, %v4830_v39 }
 0x419   : > { %v4198_v32 = vadd.f32 %v4832_v46, %v6638_v20 }
 0x41b   : > { %4216 = vst [vmem:[%s6641_s22 + $0x78] sm:$0xff] %v4198_v32 }
 0x41c   : > { %5587 = shalt.err (!%p5584_p5)
}
 0x41d   : > { %s5588_s9 = scalar_lea.hbm %s6677_s15, 2048  ;;  %s5592_s21 = scalar_lea.hbm %s6731_s7, 4096 }
 0x41e   : > { %p5589_p0 = scmp.ne.s32.totalorder %s6677_s15, %s5588_s9  ;;  %p5593_p10 = scmp.lt.s32.totalorder %s6677_s15, %s6731_s7 }
 0x41f   : > { %p5594_p1 = scmp.lt.s32.totalorder %s5592_s21, %s5588_s9 }
 0x420   : > { %p5590_p7 = pnand %p5589_p0, %p6832_p8 }
 0x421   : > { %p5595_p2 = por %p5594_p1, %p5593_p10 }
 0x422   : > { %p5591_p11 = pneg %p5590_p7 }
 0x424   : > { %p5596_p4 = pnand %p5595_p2, %p5591_p11 }
 0x426   : > { %5599 = shalt.err (!%p5596_p4)
}
 0x427   : > { %s5662_s10 = smov 128   ;;  %s5663_s29 = smov 8  }
 0x428   : > { %4867 = dma.vmem_to_hbm [thread:$0]  (%p6832_p8), %s6679_s19, 2048, %s6677_s15, %s4218_s1, %s5662_s10, %s5662_s10, %s5663_s29  }
 0x429 PF: > { %s4246_s14 = sand.u32 1, %s5634_s24   ;;  %p6833_p12 = scmp.ne.s32.totalorder %s6760_s8, 0 }
 0x42a   : > { %p6834_p6 = scmp.ge.s32.totalorder %s5646_s27, 2  ;;  %s4247_s28 = scalar_lea.sflag [#allocation4], %s4246_s14 }
 0x42c   : > { %p4887_p3 = pnand %p6834_p6, %p6833_p12 }
 0x42e   : > { %p4888_p9 = pneg %p4887_p3 }
 0x430   : > { %5629 = dma.done.wait (%p4888_p9), %s4247_s28, 2048  }
 0x431   : > { %5631 = vsyncadd (%p4888_p9), %s4247_s28, 4294965248  ;;  %p22_p13 = scmp.ge.s32.totalorder %s5792_s23, 4   ;;  %s6835_s24 = smov %s5638_s25 }
 0x432   : > { %s6836_s25 = smov %s5642_s26  ;;  %s6837_s26 = smov %s5801_s11 }
 0x433   : > { %s6838_s27 = smov %s5792_s23  ;;  %24 = sbr.rel (!%p22_p13) target bundleno = 9 (0x9), region = 109 }
 0x438   :  { %4252 = vsyncpa [#allocation3], 1 }
 0x439   :  { %4254 = vsyncpa [#allocation3 + $0x1], 1 }
 0x43a   :  { %4255 = vsyncpa [#allocation6], 1 }
 0x43b   :  { %4256 = vsyncpa [#allocation9], 1 }
 0x43c   :  { %4257 = vsyncpa [#allocation4], 1 }
 0x43d   :  { %4259 = vsyncpa [#allocation4 + $0x1], 1 }

</bundles_post_ra>
